<compile_context>
chip_gen: v7x
topology: tpu7x:2x2x1
jax: 0.10.0
libtpu: 0.0.40
codegen_flags: <defaults>
</compile_context>

<pallas_src>
import jax
import jax.numpy as jnp
from jax.experimental import pallas as pl
from jax.experimental.pallas import tpu as pltpu
from jax.scipy.linalg import block_diag

# ----- model hyper-parameters (small, consistent with the module) -----
NUM_NODES = 4
NUM_GPUS = 4
MAX_JOBS = 8
HIDDEN = 32
NUM_HEADS = 4
EMBED = 16
HEAD_DIM = EMBED // NUM_HEADS
NUM_LAYERS = 4
LN_EPS = 1e-5

TOK_LANES = MAX_JOBS * EMBED                                   # 128 lanes = 8 tokens x 16 dims
IN_FEATS = MAX_JOBS * 5 + NUM_NODES + NUM_NODES * NUM_GPUS     # 60
OUT_LANES = 128                                                # lane-dense padded head output
BLOCK_B = 256                                                  # samples per grid step (cap)

PACKED_ORDER = [
    "wj", "bj", "wc", "bc", "wg", "bg",
    "job_g_t", "job_be_t", "clu_g", "clu_be",
    "m16", "r4s", "e4",
    "wq_blk", "bq_t", "wk_tl", "bk_tl", "wv_tl", "bv_tl", "wo_blk", "bo_t",
    "lng_t", "lnb_t",
    "w1a", "w1b", "b1", "w2", "b2", "whd", "bhd",
]


def _round_up(x, m):
    return ((x + m - 1) // m) * m


# ---------------------------------------------------------------------------
# Kernel: one batch block of BT samples, fully vectorized over the batch rows.
# ---------------------------------------------------------------------------
def actor_kernel(x_ref,
                 wj_ref, bj_ref, wc_ref, bc_ref, wg_ref, bg_ref,
                 job_g_ref, job_be_ref, clu_g_ref, clu_be_ref,
                 m16_ref, r4_ref, e4_ref,
                 wq_ref, bq_ref, wk_ref, bk_ref, wv_ref, bv_ref, wo_ref, bo_ref,
                 lng_ref, lnb_ref,
                 w1a_ref, w1b_ref, b1_ref, w2_ref, b2_ref, whd_ref, bhd_ref,
                 out_ref):
    f32 = jnp.float32
    x_in = x_ref[...]                               # (BT, 60) packed [jobs|cluster|gpu]
    M = m16_ref[...]                                # (128,128) per-token group-mean matrix

    def group_ln(z, g, b):
        # per-16-lane-token LayerNorm on a (BT, 128) slab, via the mean matrix M
        mu = jnp.dot(z, M, preferred_element_type=f32)
        d = z - mu
        var = jnp.dot(d * d, M, preferred_element_type=f32)
        return d * jax.lax.rsqrt(var + LN_EPS) * g + b

    # ---- encoders (no unaligned lane slicing: three small matmuls) ----
    job_pre = jnp.dot(x_in, wj_ref[...], preferred_element_type=f32) + bj_ref[...]  # (BT,128)
    clu_pre = jnp.dot(x_in, wc_ref[...], preferred_element_type=f32) + bc_ref[...]  # (BT,16)
    gpu_pre = jnp.dot(x_in, wg_ref[...], preferred_element_type=f32) + bg_ref[...]  # (BT,16)

    job_tok = jnp.maximum(group_ln(job_pre, job_g_ref[...], job_be_ref[...]), 0.0)

    mu_c = jnp.mean(clu_pre, axis=-1, keepdims=True)
    var_c = jnp.mean((clu_pre - mu_c) ** 2, axis=-1, keepdims=True)
    clu_tok = jnp.maximum(
        (clu_pre - mu_c) * jax.lax.rsqrt(var_c + LN_EPS) * clu_g_ref[...] + clu_be_ref[...],
        0.0)                                        # (BT, 16)
    gpu_tok = jnp.maximum(gpu_pre, 0.0)             # (BT, 16)

    # ---- K/V hoisted out of the layer loop (context is layer-invariant) ----
    # Packed weights already tile each layer's K/V across the 8 query tokens,
    # so each layer's slice is a 128-lane-aligned block of the 512-lane result.
    wk_all = wk_ref[...]; bk_all = bk_ref[...]      # (16, 512), (1, 512)
    wv_all = wv_ref[...]; bv_all = bv_ref[...]
    kt_clu = jnp.dot(clu_tok, wk_all, preferred_element_type=f32) + bk_all
    kt_gpu = jnp.dot(gpu_tok, wk_all, preferred_element_type=f32) + bk_all
    vt_clu = jnp.dot(clu_tok, wv_all, preferred_element_type=f32) + bv_all
    vt_gpu = jnp.dot(gpu_tok, wv_all, preferred_element_type=f32) + bv_all

    Rs = r4_ref[...]                                # (128, 32) per-head sum * 1/sqrt(head_dim)
    E = e4_ref[...]                                 # (32, 128) per-head expand

    # ---- 4 cross-attention layers (2 KV tokens: cluster, gpu) ----
    x = job_tok
    for i in range(NUM_LAYERS):
        lo = i * TOK_LANES                          # 128-aligned lane offset
        q = jnp.dot(x, wq_ref[i], preferred_element_type=f32) + bq_ref[i]   # (BT, 128)
        kc = kt_clu[:, lo:lo + TOK_LANES]
        kg = kt_gpu[:, lo:lo + TOK_LANES]
        vc = vt_clu[:, lo:lo + TOK_LANES]
        vg = vt_gpu[:, lo:lo + TOK_LANES]
        # scores per (job, head) for each of the 2 context tokens
        s_c = jnp.dot(q * kc, Rs, preferred_element_type=f32)               # (BT, 32)
        s_g = jnp.dot(q * kg, Rs, preferred_element_type=f32)
        m_ = jnp.maximum(s_c, s_g)
        e_c = jnp.exp(s_c - m_)
        e_g = jnp.exp(s_g - m_)
        inv = 1.0 / (e_c + e_g)
        attn = (jnp.dot(e_c * inv, E, preferred_element_type=f32) * vc
                + jnp.dot(e_g * inv, E, preferred_element_type=f32) * vg)   # (BT, 128)
        attn = jnp.dot(attn, wo_ref[i], preferred_element_type=f32) + bo_ref[i]
        x = group_ln(x + attn, lng_ref[i], lnb_ref[i])

    # ---- shared MLP + priority head (lane-dense padded output) ----
    h1 = jnp.maximum(jnp.dot(job_tok, w1a_ref[...], preferred_element_type=f32)
                     + jnp.dot(x, w1b_ref[...], preferred_element_type=f32)
                     + b1_ref[...], 0.0)                                    # (BT, 32)
    h2 = jnp.maximum(jnp.dot(h1, w2_ref[...], preferred_element_type=f32)
                     + b2_ref[...], 0.0)                                    # (BT, 32)
    out_ref[...] = (jnp.dot(h2, whd_ref[...], preferred_element_type=f32)
                    + bhd_ref[...])                                         # (BT, 128)


# ---------------------------------------------------------------------------
# Wrapper-side weight packing (layout plumbing, done once outside the kernel).
# ---------------------------------------------------------------------------
def pack_params(p):
    f32 = jnp.float32
    eye_e = jnp.eye(EMBED, dtype=f32)
    tile16 = jnp.tile(eye_e, (1, MAX_JOBS))                      # (16, 128)
    scale = 1.0 / float(HEAD_DIM) ** 0.5
    n_job_feats = 5 * MAX_JOBS                                   # 40

    def blk(w):   # replicate a (16,16) per-token weight block-diagonally over 8 tokens
        return block_diag(*([w] * MAX_JOBS))                     # (128, 128)

    # job encoder: rows 0:40 of the packed input -> 128 token lanes (block-diag)
    wj = jnp.zeros((IN_FEATS, TOK_LANES), f32)
    wj = wj.at[:n_job_feats, :].set(block_diag(*([p["job_w"]] * MAX_JOBS)))
    # cluster encoder: rows 40:44 -> 16 lanes
    wc = jnp.zeros((IN_FEATS, EMBED), f32)
    wc = wc.at[n_job_feats:n_job_feats + NUM_NODES, :].set(p["clu_w"])
    # gpu encoder: rows 44:60 -> 16 lanes
    wg = jnp.zeros((IN_FEATS, EMBED), f32)
    wg = wg.at[n_job_feats + NUM_NODES:, :].set(p["gpu_w"])

    packed = dict(
        wj=wj, bj=jnp.tile(p["job_b"], (1, MAX_JOBS)),
        wc=wc, bc=p["clu_b"],
        wg=wg, bg=p["gpu_b"],
        job_g_t=jnp.tile(p["job_g"], (1, MAX_JOBS)),
        job_be_t=jnp.tile(p["job_be"], (1, MAX_JOBS)),
        clu_g=p["clu_g"], clu_be=p["clu_be"],
        m16=block_diag(*([jnp.full((EMBED, EMBED), 1.0 / EMBED, f32)] * MAX_JOBS)),
        r4s=jnp.repeat(jnp.eye(MAX_JOBS * NUM_HEADS, dtype=f32), HEAD_DIM, axis=0) * scale,
        e4=jnp.repeat(jnp.eye(MAX_JOBS * NUM_HEADS, dtype=f32), HEAD_DIM, axis=1),
        wq_blk=jnp.stack([blk(p["wq"][i]) for i in range(NUM_LAYERS)]),
        bq_t=jnp.stack([jnp.tile(p["bq"][i], (1, MAX_JOBS)) for i in range(NUM_LAYERS)]),
        wk_tl=jnp.concatenate([p["wk"][i] @ tile16 for i in range(NUM_LAYERS)], axis=1),
        bk_tl=jnp.concatenate([jnp.tile(p["bk"][i], (1, MAX_JOBS))
                               for i in range(NUM_LAYERS)], axis=1),
        wv_tl=jnp.concatenate([p["wv"][i] @ tile16 for i in range(NUM_LAYERS)], axis=1),
        bv_tl=jnp.concatenate([jnp.tile(p["bv"][i], (1, MAX_JOBS))
                               for i in range(NUM_LAYERS)], axis=1),
        wo_blk=jnp.stack([blk(p["wo"][i]) for i in range(NUM_LAYERS)]),
        bo_t=jnp.stack([jnp.tile(p["bo"][i], (1, MAX_JOBS)) for i in range(NUM_LAYERS)]),
        lng_t=jnp.stack([jnp.tile(p["lng"][i], (1, MAX_JOBS)) for i in range(NUM_LAYERS)]),
        lnb_t=jnp.stack([jnp.tile(p["lnb"][i], (1, MAX_JOBS)) for i in range(NUM_LAYERS)]),
        w1a=p["sh_w1"][:TOK_LANES, :], w1b=p["sh_w1"][TOK_LANES:, :], b1=p["sh_b1"],
        w2=p["sh_w2"], b2=p["sh_b2"],
        whd=jnp.zeros((HIDDEN, OUT_LANES), f32).at[:, :MAX_JOBS].set(p["hd_w"]),
        bhd=jnp.zeros((1, OUT_LANES), f32).at[:, :MAX_JOBS].set(p["hd_b"]),
    )
    return packed


def _const_spec(arr):
    nd = arr.ndim
    return pl.BlockSpec(arr.shape, lambda *_args, _nd=nd: (0,) * _nd)


def actor_forward(jobs, cluster, gpu_left, params, *, block_b=BLOCK_B):
    B = jobs.shape[0]
    packed = pack_params(params)

    # one packed activation stream per sample: [jobs(40) | cluster(4) | gpu(16)]
    x = jnp.concatenate([
        jobs.astype(jnp.float32).reshape(B, MAX_JOBS * 5),
        cluster.astype(jnp.float32).reshape(B, NUM_NODES),
        gpu_left.astype(jnp.float32).reshape(B, NUM_NODES * NUM_GPUS),
    ], axis=1)                                                   # (B, 60)

    bt = min(block_b, _round_up(B, 8))
    b_pad = _round_up(B, bt)
    if b_pad != B:
        x = jnp.pad(x, ((0, b_pad - B), (0, 0)))

    plist = [packed[name] for name in PACKED_ORDER]
    pspecs = [_const_spec(q) for q in plist]

    out = pl.pallas_call(
        actor_kernel,
        out_shape=jax.ShapeDtypeStruct((b_pad, OUT_LANES), jnp.float32),
        grid=(b_pad // bt,),
        in_specs=[pl.BlockSpec((bt, IN_FEATS), lambda b: (b, 0))] + pspecs,
        out_specs=pl.BlockSpec((bt, OUT_LANES), lambda b: (b, 0)),
        compiler_params=pltpu.CompilerParams(dimension_semantics=("parallel",)),
    )(x, *plist)
    return out[:B, :MAX_JOBS]


# ---------------- deterministic parameter init ----------------
def init_params(key):
    keys = iter(jax.random.split(key, 26))

    def w(shape, scale=0.1):
        return (scale * jax.random.normal(next(keys), shape)).astype(jnp.float32)

    p = {}
    p["job_w"] = w((5, EMBED));                 p["job_b"] = w((1, EMBED))
    p["job_g"] = 1.0 + w((1, EMBED));           p["job_be"] = w((1, EMBED))
    p["clu_w"] = w((NUM_NODES, EMBED));         p["clu_b"] = w((1, EMBED))
    p["clu_g"] = 1.0 + w((1, EMBED));           p["clu_be"] = w((1, EMBED))
    p["gpu_w"] = w((NUM_NODES * NUM_GPUS, EMBED)); p["gpu_b"] = w((1, EMBED))
    p["wq"] = w((NUM_LAYERS, EMBED, EMBED));    p["bq"] = w((NUM_LAYERS, 1, EMBED))
    p["wk"] = w((NUM_LAYERS, EMBED, EMBED));    p["bk"] = w((NUM_LAYERS, 1, EMBED))
    p["wv"] = w((NUM_LAYERS, EMBED, EMBED));    p["bv"] = w((NUM_LAYERS, 1, EMBED))
    p["wo"] = w((NUM_LAYERS, EMBED, EMBED));    p["bo"] = w((NUM_LAYERS, 1, EMBED))
    p["lng"] = 1.0 + w((NUM_LAYERS, 1, EMBED)); p["lnb"] = w((NUM_LAYERS, 1, EMBED))
    p["sh_w1"] = w((EMBED * MAX_JOBS * 2, HIDDEN)); p["sh_b1"] = w((1, HIDDEN))
    p["sh_w2"] = w((HIDDEN, HIDDEN));           p["sh_b2"] = w((1, HIDDEN))
    p["hd_w"] = w((HIDDEN, MAX_JOBS));          p["hd_b"] = w((1, MAX_JOBS))
    return p


# ---------------- pure-JAX reference (for correctness check) ----------------
def reference_forward(jobs, cluster, gpu_left, p):
    B = jobs.shape[0]

    def ln(x, g, b):
        mu = x.mean(-1, keepdims=True)
        var = ((x - mu) ** 2).mean(-1, keepdims=True)
        return (x - mu) / jnp.sqrt(var + LN_EPS) * g + b

    jt = jobs.reshape(-1, 5) @ p["job_w"] + p["job_b"]
    job_tok = jax.nn.relu(ln(jt, p["job_g"], p["job_be"])).reshape(B, MAX_JOBS, EMBED)
    ct = cluster @ p["clu_w"] + p["clu_b"]
    clu_tok = jax.nn.relu(ln(ct, p["clu_g"], p["clu_be"]))[:, None, :]
    gt = gpu_left.reshape(B, -1) @ p["gpu_w"] + p["gpu_b"]
    gpu_tok = jax.nn.relu(gt)[:, None, :]
    C = jnp.concatenate([clu_tok, gpu_tok], axis=1)               # (B, 2, 16)

    x = job_tok
    scale = 1.0 / float(HEAD_DIM) ** 0.5
    for i in range(NUM_LAYERS):
        q = x @ p["wq"][i] + p["bq"][i]
        k = C @ p["wk"][i] + p["bk"][i]
        v = C @ p["wv"][i] + p["bv"][i]
        qh = q.reshape(B, MAX_JOBS, NUM_HEADS, HEAD_DIM)
        kh = k.reshape(B, 2, NUM_HEADS, HEAD_DIM)
        vh = v.reshape(B, 2, NUM_HEADS, HEAD_DIM)
        s = jnp.einsum("bqhd,bkhd->bhqk", qh, kh) * scale
        pa = jax.nn.softmax(s, axis=-1)
        ao = jnp.einsum("bhqk,bkhd->bqhd", pa, vh).reshape(B, MAX_JOBS, EMBED)
        ao = ao @ p["wo"][i] + p["bo"][i]
        x = ln(x + ao, p["lng"][i], p["lnb"][i])

    tokens = jnp.concatenate([job_tok, x], axis=1)
    flat = tokens.reshape(B, -1)
    h = jax.nn.relu(flat @ p["sh_w1"] + p["sh_b1"])
    h = jax.nn.relu(h @ p["sh_w2"] + p["sh_b2"])
    return h @ p["hd_w"] + p["hd_b"]


if __name__ == "__main__":
    key = jax.random.PRNGKey(0)
    kp, kj, kc, kg = jax.random.split(key, 4)
    params = init_params(kp)

    B = 2
    jobs = jax.random.normal(kj, (B, MAX_JOBS, 5), jnp.float32)
    cluster = jax.random.normal(kc, (B, NUM_NODES), jnp.float32)
    gpu_left = jax.random.normal(kg, (B, NUM_NODES, NUM_GPUS), jnp.float32)

    out = actor_forward(jobs, cluster, gpu_left, params)
    out = jax.block_until_ready(out)

    ref = reference_forward(jobs, cluster, gpu_left, params)
    assert out.shape == (B, MAX_JOBS)
    assert jnp.allclose(out, ref, atol=1e-3, rtol=1e-3), (out, ref)
    print("KERNEL_OK")
</pallas_src>

<mosaic_0001>
module attributes {stable_mosaic.version = 11 : i64} {
  func.func @actor_kernel(%arg0: i32, %arg1: memref<8x60xf32, #tpu.memory_space<vmem>>, %arg2: memref<60x128xf32, #tpu.memory_space<vmem>>, %arg3: memref<1x128xf32, #tpu.memory_space<vmem>>, %arg4: memref<60x16xf32, #tpu.memory_space<vmem>>, %arg5: memref<1x16xf32, #tpu.memory_space<vmem>>, %arg6: memref<60x16xf32, #tpu.memory_space<vmem>>, %arg7: memref<1x16xf32, #tpu.memory_space<vmem>>, %arg8: memref<1x128xf32, #tpu.memory_space<vmem>>, %arg9: memref<1x128xf32, #tpu.memory_space<vmem>>, %arg10: memref<1x16xf32, #tpu.memory_space<vmem>>, %arg11: memref<1x16xf32, #tpu.memory_space<vmem>>, %arg12: memref<128x128xf32, #tpu.memory_space<vmem>>, %arg13: memref<128x32xf32, #tpu.memory_space<vmem>>, %arg14: memref<32x128xf32, #tpu.memory_space<vmem>>, %arg15: memref<4x128x128xf32, #tpu.memory_space<vmem>>, %arg16: memref<4x1x128xf32, #tpu.memory_space<vmem>>, %arg17: memref<16x512xf32, #tpu.memory_space<vmem>>, %arg18: memref<1x512xf32, #tpu.memory_space<vmem>>, %arg19: memref<16x512xf32, #tpu.memory_space<vmem>>, %arg20: memref<1x512xf32, #tpu.memory_space<vmem>>, %arg21: memref<4x128x128xf32, #tpu.memory_space<vmem>>, %arg22: memref<4x1x128xf32, #tpu.memory_space<vmem>>, %arg23: memref<4x1x128xf32, #tpu.memory_space<vmem>>, %arg24: memref<4x1x128xf32, #tpu.memory_space<vmem>>, %arg25: memref<128x32xf32, #tpu.memory_space<vmem>>, %arg26: memref<128x32xf32, #tpu.memory_space<vmem>>, %arg27: memref<1x32xf32, #tpu.memory_space<vmem>>, %arg28: memref<32x32xf32, #tpu.memory_space<vmem>>, %arg29: memref<1x32xf32, #tpu.memory_space<vmem>>, %arg30: memref<32x128xf32, #tpu.memory_space<vmem>>, %arg31: memref<1x128xf32, #tpu.memory_space<vmem>>, %arg32: memref<8x128xf32, #tpu.memory_space<vmem>>) attributes {dimension_semantics = [#tpu.dimension_semantics<parallel>], iteration_bounds = array<i64: 1>, scalar_prefetch = 0 : i64, scratch_operands = 0 : i64, tpu.core_type = #tpu.core_type<tc>, window_params = [{transform_indices = @transform_0, window_bounds = array<i64: 8, 60>}, {pipeline_mode = #tpu.pipeline_mode<synchronous>, transform_indices = @transform_1, window_bounds = array<i64: 60, 128>}, {pipeline_mode = #tpu.pipeline_mode<synchronous>, transform_indices = @transform_2, window_bounds = array<i64: 1, 128>}, {pipeline_mode = #tpu.pipeline_mode<synchronous>, transform_indices = @transform_3, window_bounds = array<i64: 60, 16>}, {pipeline_mode = #tpu.pipeline_mode<synchronous>, transform_indices = @transform_4, window_bounds = array<i64: 1, 16>}, {pipeline_mode = #tpu.pipeline_mode<synchronous>, transform_indices = @transform_5, window_bounds = array<i64: 60, 16>}, {pipeline_mode = #tpu.pipeline_mode<synchronous>, transform_indices = @transform_6, window_bounds = array<i64: 1, 16>}, {pipeline_mode = #tpu.pipeline_mode<synchronous>, transform_indices = @transform_7, window_bounds = array<i64: 1, 128>}, {pipeline_mode = #tpu.pipeline_mode<synchronous>, transform_indices = @transform_8, window_bounds = array<i64: 1, 128>}, {pipeline_mode = #tpu.pipeline_mode<synchronous>, transform_indices = @transform_9, window_bounds = array<i64: 1, 16>}, {pipeline_mode = #tpu.pipeline_mode<synchronous>, transform_indices = @transform_10, window_bounds = array<i64: 1, 16>}, {pipeline_mode = #tpu.pipeline_mode<synchronous>, transform_indices = @transform_11, window_bounds = array<i64: 128, 128>}, {pipeline_mode = #tpu.pipeline_mode<synchronous>, transform_indices = @transform_12, window_bounds = array<i64: 128, 32>}, {pipeline_mode = #tpu.pipeline_mode<synchronous>, transform_indices = @transform_13, window_bounds = array<i64: 32, 128>}, {pipeline_mode = #tpu.pipeline_mode<synchronous>, transform_indices = @transform_14, window_bounds = array<i64: 4, 128, 128>}, {pipeline_mode = #tpu.pipeline_mode<synchronous>, transform_indices = @transform_15, window_bounds = array<i64: 4, 1, 128>}, {pipeline_mode = #tpu.pipeline_mode<synchronous>, transform_indices = @transform_16, window_bounds = array<i64: 16, 512>}, {pipeline_mode = #tpu.pipeline_mode<synchronous>, transform_indices = @transform_17, window_bounds = array<i64: 1, 512>}, {pipeline_mode = #tpu.pipeline_mode<synchronous>, transform_indices = @transform_18, window_bounds = array<i64: 16, 512>}, {pipeline_mode = #tpu.pipeline_mode<synchronous>, transform_indices = @transform_19, window_bounds = array<i64: 1, 512>}, {pipeline_mode = #tpu.pipeline_mode<synchronous>, transform_indices = @transform_20, window_bounds = array<i64: 4, 128, 128>}, {pipeline_mode = #tpu.pipeline_mode<synchronous>, transform_indices = @transform_21, window_bounds = array<i64: 4, 1, 128>}, {pipeline_mode = #tpu.pipeline_mode<synchronous>, transform_indices = @transform_22, window_bounds = array<i64: 4, 1, 128>}, {pipeline_mode = #tpu.pipeline_mode<synchronous>, transform_indices = @transform_23, window_bounds = array<i64: 4, 1, 128>}, {pipeline_mode = #tpu.pipeline_mode<synchronous>, transform_indices = @transform_24, window_bounds = array<i64: 128, 32>}, {pipeline_mode = #tpu.pipeline_mode<synchronous>, transform_indices = @transform_25, window_bounds = array<i64: 128, 32>}, {pipeline_mode = #tpu.pipeline_mode<synchronous>, transform_indices = @transform_26, window_bounds = array<i64: 1, 32>}, {pipeline_mode = #tpu.pipeline_mode<synchronous>, transform_indices = @transform_27, window_bounds = array<i64: 32, 32>}, {pipeline_mode = #tpu.pipeline_mode<synchronous>, transform_indices = @transform_28, window_bounds = array<i64: 1, 32>}, {pipeline_mode = #tpu.pipeline_mode<synchronous>, transform_indices = @transform_29, window_bounds = array<i64: 32, 128>}, {pipeline_mode = #tpu.pipeline_mode<synchronous>, transform_indices = @transform_30, window_bounds = array<i64: 1, 128>}, {transform_indices = @transform_31, window_bounds = array<i64: 8, 128>}]} {
    %c0 = arith.constant 0 : index
    %c0_0 = arith.constant 0 : index
    %0 = vector.load %arg1[%c0, %c0_0] : memref<8x60xf32, #tpu.memory_space<vmem>>, vector<8x60xf32>
    %c0_1 = arith.constant 0 : index
    %c0_2 = arith.constant 0 : index
    %1 = vector.load %arg12[%c0_1, %c0_2] : memref<128x128xf32, #tpu.memory_space<vmem>>, vector<128x128xf32>
    %c0_3 = arith.constant 0 : index
    %c0_4 = arith.constant 0 : index
    %2 = vector.load %arg2[%c0_3, %c0_4] : memref<60x128xf32, #tpu.memory_space<vmem>>, vector<60x128xf32>
    %cst = arith.constant dense<0.000000e+00> : vector<8x128xf32>
    %3 = tpu.matmul %0, %2, %cst {dimension_numbers = #tpu.dot_dimension_numbers<[1], [0], [0], [1], [0, 0, 1, 1], [], []>} : vector<8x60xf32>, vector<60x128xf32>, vector<8x128xf32> -> vector<8x128xf32>
    %c0_5 = arith.constant 0 : index
    %c0_6 = arith.constant 0 : index
    %4 = vector.load %arg3[%c0_5, %c0_6] : memref<1x128xf32, #tpu.memory_space<vmem>>, vector<1x128xf32>
    %5 = vector.broadcast %4 : vector<1x128xf32> to vector<8x128xf32>
    %6 = arith.addf %3, %5 : vector<8x128xf32>
    %c0_7 = arith.constant 0 : index
    %c0_8 = arith.constant 0 : index
    %7 = vector.load %arg4[%c0_7, %c0_8] : memref<60x16xf32, #tpu.memory_space<vmem>>, vector<60x16xf32>
    %cst_9 = arith.constant dense<0.000000e+00> : vector<8x16xf32>
    %8 = tpu.matmul %0, %7, %cst_9 {dimension_numbers = #tpu.dot_dimension_numbers<[1], [0], [0], [1], [0, 0, 1, 1], [], []>} : vector<8x60xf32>, vector<60x16xf32>, vector<8x16xf32> -> vector<8x16xf32>
    %c0_10 = arith.constant 0 : index
    %c0_11 = arith.constant 0 : index
    %9 = vector.load %arg5[%c0_10, %c0_11] : memref<1x16xf32, #tpu.memory_space<vmem>>, vector<1x16xf32>
    %10 = vector.broadcast %9 : vector<1x16xf32> to vector<8x16xf32>
    %11 = arith.addf %8, %10 : vector<8x16xf32>
    %c0_12 = arith.constant 0 : index
    %c0_13 = arith.constant 0 : index
    %12 = vector.load %arg6[%c0_12, %c0_13] : memref<60x16xf32, #tpu.memory_space<vmem>>, vector<60x16xf32>
    %cst_14 = arith.constant dense<0.000000e+00> : vector<8x16xf32>
    %13 = tpu.matmul %0, %12, %cst_14 {dimension_numbers = #tpu.dot_dimension_numbers<[1], [0], [0], [1], [0, 0, 1, 1], [], []>} : vector<8x60xf32>, vector<60x16xf32>, vector<8x16xf32> -> vector<8x16xf32>
    %c0_15 = arith.constant 0 : index
    %c0_16 = arith.constant 0 : index
    %14 = vector.load %arg7[%c0_15, %c0_16] : memref<1x16xf32, #tpu.memory_space<vmem>>, vector<1x16xf32>
    %15 = vector.broadcast %14 : vector<1x16xf32> to vector<8x16xf32>
    %16 = arith.addf %13, %15 : vector<8x16xf32>
    %c0_17 = arith.constant 0 : index
    %c0_18 = arith.constant 0 : index
    %17 = vector.load %arg8[%c0_17, %c0_18] : memref<1x128xf32, #tpu.memory_space<vmem>>, vector<1x128xf32>
    %c0_19 = arith.constant 0 : index
    %c0_20 = arith.constant 0 : index
    %18 = vector.load %arg9[%c0_19, %c0_20] : memref<1x128xf32, #tpu.memory_space<vmem>>, vector<1x128xf32>
    %cst_21 = arith.constant dense<0.000000e+00> : vector<8x128xf32>
    %19 = tpu.matmul %6, %1, %cst_21 {dimension_numbers = #tpu.dot_dimension_numbers<[1], [0], [0], [1], [0, 0, 1, 1], [], []>} : vector<8x128xf32>, vector<128x128xf32>, vector<8x128xf32> -> vector<8x128xf32>
    %20 = arith.subf %6, %19 : vector<8x128xf32>
    %21 = arith.mulf %20, %20 : vector<8x128xf32>
    %cst_22 = arith.constant dense<0.000000e+00> : vector<8x128xf32>
    %22 = tpu.matmul %21, %1, %cst_22 {dimension_numbers = #tpu.dot_dimension_numbers<[1], [0], [0], [1], [0, 0, 1, 1], [], []>} : vector<8x128xf32>, vector<128x128xf32>, vector<8x128xf32> -> vector<8x128xf32>
    %cst_23 = arith.constant 9.99999974E-6 : f32
    %23 = vector.broadcast %cst_23 : f32 to vector<8x128xf32>
    %24 = arith.addf %22, %23 : vector<8x128xf32>
    %25 = math.rsqrt %24 : vector<8x128xf32>
    %26 = arith.mulf %20, %25 : vector<8x128xf32>
    %27 = vector.broadcast %17 : vector<1x128xf32> to vector<8x128xf32>
    %28 = arith.mulf %26, %27 : vector<8x128xf32>
    %29 = vector.broadcast %18 : vector<1x128xf32> to vector<8x128xf32>
    %30 = arith.addf %28, %29 : vector<8x128xf32>
    %cst_24 = arith.constant 0.000000e+00 : f32
    %31 = vector.broadcast %cst_24 : f32 to vector<8x128xf32>
    %32 = arith.maximumf %30, %31 : vector<8x128xf32>
    %cst_25 = arith.constant dense<0.000000e+00> : vector<8xf32>
    %33 = vector.multi_reduction <add>, %11, %cst_25 [1] : vector<8x16xf32> to vector<8xf32>
    %34 = vector.shape_cast %33 : vector<8xf32> to vector<8x1xf32>
    %cst_26 = arith.constant 1.600000e+01 : f32
    %35 = vector.broadcast %cst_26 : f32 to vector<8x1xf32>
    %36 = arith.divf %34, %35 : vector<8x1xf32>
    %37 = vector.broadcast %36 : vector<8x1xf32> to vector<8x16xf32>
    %38 = arith.subf %11, %37 : vector<8x16xf32>
    %39 = arith.mulf %38, %38 : vector<8x16xf32>
    %cst_27 = arith.constant dense<0.000000e+00> : vector<8xf32>
    %40 = vector.multi_reduction <add>, %39, %cst_27 [1] : vector<8x16xf32> to vector<8xf32>
    %41 = vector.shape_cast %40 : vector<8xf32> to vector<8x1xf32>
    %cst_28 = arith.constant 1.600000e+01 : f32
    %42 = vector.broadcast %cst_28 : f32 to vector<8x1xf32>
    %43 = arith.divf %41, %42 : vector<8x1xf32>
    %44 = vector.broadcast %36 : vector<8x1xf32> to vector<8x16xf32>
    %45 = arith.subf %11, %44 : vector<8x16xf32>
    %cst_29 = arith.constant 9.99999974E-6 : f32
    %46 = vector.broadcast %cst_29 : f32 to vector<8x1xf32>
    %47 = arith.addf %43, %46 : vector<8x1xf32>
    %48 = math.rsqrt %47 : vector<8x1xf32>
    %49 = vector.broadcast %48 : vector<8x1xf32> to vector<8x16xf32>
    %50 = arith.mulf %45, %49 : vector<8x16xf32>
    %c0_30 = arith.constant 0 : index
    %c0_31 = arith.constant 0 : index
    %51 = vector.load %arg10[%c0_30, %c0_31] : memref<1x16xf32, #tpu.memory_space<vmem>>, vector<1x16xf32>
    %52 = vector.broadcast %51 : vector<1x16xf32> to vector<8x16xf32>
    %53 = arith.mulf %50, %52 : vector<8x16xf32>
    %c0_32 = arith.constant 0 : index
    %c0_33 = arith.constant 0 : index
    %54 = vector.load %arg11[%c0_32, %c0_33] : memref<1x16xf32, #tpu.memory_space<vmem>>, vector<1x16xf32>
    %55 = vector.broadcast %54 : vector<1x16xf32> to vector<8x16xf32>
    %56 = arith.addf %53, %55 : vector<8x16xf32>
    %cst_34 = arith.constant 0.000000e+00 : f32
    %57 = vector.broadcast %cst_34 : f32 to vector<8x16xf32>
    %58 = arith.maximumf %56, %57 : vector<8x16xf32>
    %cst_35 = arith.constant 0.000000e+00 : f32
    %59 = vector.broadcast %cst_35 : f32 to vector<8x16xf32>
    %60 = arith.maximumf %16, %59 : vector<8x16xf32>
    %c0_36 = arith.constant 0 : index
    %c0_37 = arith.constant 0 : index
    %61 = vector.load %arg17[%c0_36, %c0_37] : memref<16x512xf32, #tpu.memory_space<vmem>>, vector<16x512xf32>
    %c0_38 = arith.constant 0 : index
    %c0_39 = arith.constant 0 : index
    %62 = vector.load %arg18[%c0_38, %c0_39] : memref<1x512xf32, #tpu.memory_space<vmem>>, vector<1x512xf32>
    %c0_40 = arith.constant 0 : index
    %c0_41 = arith.constant 0 : index
    %63 = vector.load %arg19[%c0_40, %c0_41] : memref<16x512xf32, #tpu.memory_space<vmem>>, vector<16x512xf32>
    %c0_42 = arith.constant 0 : index
    %c0_43 = arith.constant 0 : index
    %64 = vector.load %arg20[%c0_42, %c0_43] : memref<1x512xf32, #tpu.memory_space<vmem>>, vector<1x512xf32>
    %cst_44 = arith.constant dense<0.000000e+00> : vector<8x512xf32>
    %65 = tpu.matmul %58, %61, %cst_44 {dimension_numbers = #tpu.dot_dimension_numbers<[1], [0], [0], [1], [0, 0, 1, 1], [], []>} : vector<8x16xf32>, vector<16x512xf32>, vector<8x512xf32> -> vector<8x512xf32>
    %66 = vector.broadcast %62 : vector<1x512xf32> to vector<8x512xf32>
    %67 = arith.addf %65, %66 : vector<8x512xf32>
    %cst_45 = arith.constant dense<0.000000e+00> : vector<8x512xf32>
    %68 = tpu.matmul %60, %61, %cst_45 {dimension_numbers = #tpu.dot_dimension_numbers<[1], [0], [0], [1], [0, 0, 1, 1], [], []>} : vector<8x16xf32>, vector<16x512xf32>, vector<8x512xf32> -> vector<8x512xf32>
    %69 = vector.broadcast %62 : vector<1x512xf32> to vector<8x512xf32>
    %70 = arith.addf %68, %69 : vector<8x512xf32>
    %cst_46 = arith.constant dense<0.000000e+00> : vector<8x512xf32>
    %71 = tpu.matmul %58, %63, %cst_46 {dimension_numbers = #tpu.dot_dimension_numbers<[1], [0], [0], [1], [0, 0, 1, 1], [], []>} : vector<8x16xf32>, vector<16x512xf32>, vector<8x512xf32> -> vector<8x512xf32>
    %72 = vector.broadcast %64 : vector<1x512xf32> to vector<8x512xf32>
    %73 = arith.addf %71, %72 : vector<8x512xf32>
    %cst_47 = arith.constant dense<0.000000e+00> : vector<8x512xf32>
    %74 = tpu.matmul %60, %63, %cst_47 {dimension_numbers = #tpu.dot_dimension_numbers<[1], [0], [0], [1], [0, 0, 1, 1], [], []>} : vector<8x16xf32>, vector<16x512xf32>, vector<8x512xf32> -> vector<8x512xf32>
    %75 = vector.broadcast %64 : vector<1x512xf32> to vector<8x512xf32>
    %76 = arith.addf %74, %75 : vector<8x512xf32>
    %c0_48 = arith.constant 0 : index
    %c0_49 = arith.constant 0 : index
    %77 = vector.load %arg13[%c0_48, %c0_49] : memref<128x32xf32, #tpu.memory_space<vmem>>, vector<128x32xf32>
    %c0_50 = arith.constant 0 : index
    %c0_51 = arith.constant 0 : index
    %78 = vector.load %arg14[%c0_50, %c0_51] : memref<32x128xf32, #tpu.memory_space<vmem>>, vector<32x128xf32>
    %c0_52 = arith.constant 0 : index
    %c0_53 = arith.constant 0 : index
    %c0_54 = arith.constant 0 : index
    %79 = vector.load %arg15[%c0_52, %c0_53, %c0_54] : memref<4x128x128xf32, #tpu.memory_space<vmem>>, vector<1x128x128xf32>
    %80 = vector.shape_cast %79 : vector<1x128x128xf32> to vector<128x128xf32>
    %cst_55 = arith.constant dense<0.000000e+00> : vector<8x128xf32>
    %81 = tpu.matmul %32, %80, %cst_55 {dimension_numbers = #tpu.dot_dimension_numbers<[1], [0], [0], [1], [0, 0, 1, 1], [], []>} : vector<8x128xf32>, vector<128x128xf32>, vector<8x128xf32> -> vector<8x128xf32>
    %c0_56 = arith.constant 0 : index
    %c0_57 = arith.constant 0 : index
    %c0_58 = arith.constant 0 : index
    %82 = vector.load %arg16[%c0_56, %c0_57, %c0_58] : memref<4x1x128xf32, #tpu.memory_space<vmem>>, vector<1x1x128xf32>
    %83 = vector.shape_cast %82 : vector<1x1x128xf32> to vector<1x128xf32>
    %84 = vector.broadcast %83 : vector<1x128xf32> to vector<8x128xf32>
    %85 = arith.addf %81, %84 : vector<8x128xf32>
    %86 = vector.extract_strided_slice %67 {offsets = [0, 0], sizes = [8, 128], strides = [1, 1]} : vector<8x512xf32> to vector<8x128xf32>
    %87 = vector.extract_strided_slice %70 {offsets = [0, 0], sizes = [8, 128], strides = [1, 1]} : vector<8x512xf32> to vector<8x128xf32>
    %88 = vector.extract_strided_slice %73 {offsets = [0, 0], sizes = [8, 128], strides = [1, 1]} : vector<8x512xf32> to vector<8x128xf32>
    %89 = vector.extract_strided_slice %76 {offsets = [0, 0], sizes = [8, 128], strides = [1, 1]} : vector<8x512xf32> to vector<8x128xf32>
    %90 = arith.mulf %85, %86 : vector<8x128xf32>
    %cst_59 = arith.constant dense<0.000000e+00> : vector<8x32xf32>
    %91 = tpu.matmul %90, %77, %cst_59 {dimension_numbers = #tpu.dot_dimension_numbers<[1], [0], [0], [1], [0, 0, 1, 1], [], []>} : vector<8x128xf32>, vector<128x32xf32>, vector<8x32xf32> -> vector<8x32xf32>
    %92 = arith.mulf %85, %87 : vector<8x128xf32>
    %cst_60 = arith.constant dense<0.000000e+00> : vector<8x32xf32>
    %93 = tpu.matmul %92, %77, %cst_60 {dimension_numbers = #tpu.dot_dimension_numbers<[1], [0], [0], [1], [0, 0, 1, 1], [], []>} : vector<8x128xf32>, vector<128x32xf32>, vector<8x32xf32> -> vector<8x32xf32>
    %94 = arith.maximumf %91, %93 : vector<8x32xf32>
    %95 = arith.subf %91, %94 : vector<8x32xf32>
    %96 = math.exp %95 : vector<8x32xf32>
    %97 = arith.subf %93, %94 : vector<8x32xf32>
    %98 = math.exp %97 : vector<8x32xf32>
    %99 = arith.addf %96, %98 : vector<8x32xf32>
    %cst_61 = arith.constant 1.000000e+00 : f32
    %100 = vector.broadcast %cst_61 : f32 to vector<8x32xf32>
    %101 = arith.divf %100, %99 : vector<8x32xf32>
    %102 = arith.mulf %96, %101 : vector<8x32xf32>
    %cst_62 = arith.constant dense<0.000000e+00> : vector<8x128xf32>
    %103 = tpu.matmul %102, %78, %cst_62 {dimension_numbers = #tpu.dot_dimension_numbers<[1], [0], [0], [1], [0, 0, 1, 1], [], []>} : vector<8x32xf32>, vector<32x128xf32>, vector<8x128xf32> -> vector<8x128xf32>
    %104 = arith.mulf %103, %88 : vector<8x128xf32>
    %105 = arith.mulf %98, %101 : vector<8x32xf32>
    %cst_63 = arith.constant dense<0.000000e+00> : vector<8x128xf32>
    %106 = tpu.matmul %105, %78, %cst_63 {dimension_numbers = #tpu.dot_dimension_numbers<[1], [0], [0], [1], [0, 0, 1, 1], [], []>} : vector<8x32xf32>, vector<32x128xf32>, vector<8x128xf32> -> vector<8x128xf32>
    %107 = arith.mulf %106, %89 : vector<8x128xf32>
    %108 = arith.addf %104, %107 : vector<8x128xf32>
    %c0_64 = arith.constant 0 : index
    %c0_65 = arith.constant 0 : index
    %c0_66 = arith.constant 0 : index
    %109 = vector.load %arg21[%c0_64, %c0_65, %c0_66] : memref<4x128x128xf32, #tpu.memory_space<vmem>>, vector<1x128x128xf32>
    %110 = vector.shape_cast %109 : vector<1x128x128xf32> to vector<128x128xf32>
    %cst_67 = arith.constant dense<0.000000e+00> : vector<8x128xf32>
    %111 = tpu.matmul %108, %110, %cst_67 {dimension_numbers = #tpu.dot_dimension_numbers<[1], [0], [0], [1], [0, 0, 1, 1], [], []>} : vector<8x128xf32>, vector<128x128xf32>, vector<8x128xf32> -> vector<8x128xf32>
    %c0_68 = arith.constant 0 : index
    %c0_69 = arith.constant 0 : index
    %c0_70 = arith.constant 0 : index
    %112 = vector.load %arg22[%c0_68, %c0_69, %c0_70] : memref<4x1x128xf32, #tpu.memory_space<vmem>>, vector<1x1x128xf32>
    %113 = vector.shape_cast %112 : vector<1x1x128xf32> to vector<1x128xf32>
    %114 = vector.broadcast %113 : vector<1x128xf32> to vector<8x128xf32>
    %115 = arith.addf %111, %114 : vector<8x128xf32>
    %116 = arith.addf %32, %115 : vector<8x128xf32>
    %c0_71 = arith.constant 0 : index
    %c0_72 = arith.constant 0 : index
    %c0_73 = arith.constant 0 : index
    %117 = vector.load %arg23[%c0_71, %c0_72, %c0_73] : memref<4x1x128xf32, #tpu.memory_space<vmem>>, vector<1x1x128xf32>
    %118 = vector.shape_cast %117 : vector<1x1x128xf32> to vector<1x128xf32>
    %c0_74 = arith.constant 0 : index
    %c0_75 = arith.constant 0 : index
    %c0_76 = arith.constant 0 : index
    %119 = vector.load %arg24[%c0_74, %c0_75, %c0_76] : memref<4x1x128xf32, #tpu.memory_space<vmem>>, vector<1x1x128xf32>
    %120 = vector.shape_cast %119 : vector<1x1x128xf32> to vector<1x128xf32>
    %cst_77 = arith.constant dense<0.000000e+00> : vector<8x128xf32>
    %121 = tpu.matmul %116, %1, %cst_77 {dimension_numbers = #tpu.dot_dimension_numbers<[1], [0], [0], [1], [0, 0, 1, 1], [], []>} : vector<8x128xf32>, vector<128x128xf32>, vector<8x128xf32> -> vector<8x128xf32>
    %122 = arith.subf %116, %121 : vector<8x128xf32>
    %123 = arith.mulf %122, %122 : vector<8x128xf32>
    %cst_78 = arith.constant dense<0.000000e+00> : vector<8x128xf32>
    %124 = tpu.matmul %123, %1, %cst_78 {dimension_numbers = #tpu.dot_dimension_numbers<[1], [0], [0], [1], [0, 0, 1, 1], [], []>} : vector<8x128xf32>, vector<128x128xf32>, vector<8x128xf32> -> vector<8x128xf32>
    %cst_79 = arith.constant 9.99999974E-6 : f32
    %125 = vector.broadcast %cst_79 : f32 to vector<8x128xf32>
    %126 = arith.addf %124, %125 : vector<8x128xf32>
    %127 = math.rsqrt %126 : vector<8x128xf32>
    %128 = arith.mulf %122, %127 : vector<8x128xf32>
    %129 = vector.broadcast %118 : vector<1x128xf32> to vector<8x128xf32>
    %130 = arith.mulf %128, %129 : vector<8x128xf32>
    %131 = vector.broadcast %120 : vector<1x128xf32> to vector<8x128xf32>
    %132 = arith.addf %130, %131 : vector<8x128xf32>
    %c1 = arith.constant 1 : index
    %c0_80 = arith.constant 0 : index
    %c0_81 = arith.constant 0 : index
    %133 = vector.load %arg15[%c1, %c0_80, %c0_81] : memref<4x128x128xf32, #tpu.memory_space<vmem>>, vector<1x128x128xf32>
    %134 = vector.shape_cast %133 : vector<1x128x128xf32> to vector<128x128xf32>
    %cst_82 = arith.constant dense<0.000000e+00> : vector<8x128xf32>
    %135 = tpu.matmul %132, %134, %cst_82 {dimension_numbers = #tpu.dot_dimension_numbers<[1], [0], [0], [1], [0, 0, 1, 1], [], []>} : vector<8x128xf32>, vector<128x128xf32>, vector<8x128xf32> -> vector<8x128xf32>
    %c1_83 = arith.constant 1 : index
    %c0_84 = arith.constant 0 : index
    %c0_85 = arith.constant 0 : index
    %136 = vector.load %arg16[%c1_83, %c0_84, %c0_85] : memref<4x1x128xf32, #tpu.memory_space<vmem>>, vector<1x1x128xf32>
    %137 = vector.shape_cast %136 : vector<1x1x128xf32> to vector<1x128xf32>
    %138 = vector.broadcast %137 : vector<1x128xf32> to vector<8x128xf32>
    %139 = arith.addf %135, %138 : vector<8x128xf32>
    %140 = vector.extract_strided_slice %67 {offsets = [0, 128], sizes = [8, 128], strides = [1, 1]} : vector<8x512xf32> to vector<8x128xf32>
    %141 = vector.extract_strided_slice %70 {offsets = [0, 128], sizes = [8, 128], strides = [1, 1]} : vector<8x512xf32> to vector<8x128xf32>
    %142 = vector.extract_strided_slice %73 {offsets = [0, 128], sizes = [8, 128], strides = [1, 1]} : vector<8x512xf32> to vector<8x128xf32>
    %143 = vector.extract_strided_slice %76 {offsets = [0, 128], sizes = [8, 128], strides = [1, 1]} : vector<8x512xf32> to vector<8x128xf32>
    %144 = arith.mulf %139, %140 : vector<8x128xf32>
    %cst_86 = arith.constant dense<0.000000e+00> : vector<8x32xf32>
    %145 = tpu.matmul %144, %77, %cst_86 {dimension_numbers = #tpu.dot_dimension_numbers<[1], [0], [0], [1], [0, 0, 1, 1], [], []>} : vector<8x128xf32>, vector<128x32xf32>, vector<8x32xf32> -> vector<8x32xf32>
    %146 = arith.mulf %139, %141 : vector<8x128xf32>
    %cst_87 = arith.constant dense<0.000000e+00> : vector<8x32xf32>
    %147 = tpu.matmul %146, %77, %cst_87 {dimension_numbers = #tpu.dot_dimension_numbers<[1], [0], [0], [1], [0, 0, 1, 1], [], []>} : vector<8x128xf32>, vector<128x32xf32>, vector<8x32xf32> -> vector<8x32xf32>
    %148 = arith.maximumf %145, %147 : vector<8x32xf32>
    %149 = arith.subf %145, %148 : vector<8x32xf32>
    %150 = math.exp %149 : vector<8x32xf32>
    %151 = arith.subf %147, %148 : vector<8x32xf32>
    %152 = math.exp %151 : vector<8x32xf32>
    %153 = arith.addf %150, %152 : vector<8x32xf32>
    %cst_88 = arith.constant 1.000000e+00 : f32
    %154 = vector.broadcast %cst_88 : f32 to vector<8x32xf32>
    %155 = arith.divf %154, %153 : vector<8x32xf32>
    %156 = arith.mulf %150, %155 : vector<8x32xf32>
    %cst_89 = arith.constant dense<0.000000e+00> : vector<8x128xf32>
    %157 = tpu.matmul %156, %78, %cst_89 {dimension_numbers = #tpu.dot_dimension_numbers<[1], [0], [0], [1], [0, 0, 1, 1], [], []>} : vector<8x32xf32>, vector<32x128xf32>, vector<8x128xf32> -> vector<8x128xf32>
    %158 = arith.mulf %157, %142 : vector<8x128xf32>
    %159 = arith.mulf %152, %155 : vector<8x32xf32>
    %cst_90 = arith.constant dense<0.000000e+00> : vector<8x128xf32>
    %160 = tpu.matmul %159, %78, %cst_90 {dimension_numbers = #tpu.dot_dimension_numbers<[1], [0], [0], [1], [0, 0, 1, 1], [], []>} : vector<8x32xf32>, vector<32x128xf32>, vector<8x128xf32> -> vector<8x128xf32>
    %161 = arith.mulf %160, %143 : vector<8x128xf32>
    %162 = arith.addf %158, %161 : vector<8x128xf32>
    %c1_91 = arith.constant 1 : index
    %c0_92 = arith.constant 0 : index
    %c0_93 = arith.constant 0 : index
    %163 = vector.load %arg21[%c1_91, %c0_92, %c0_93] : memref<4x128x128xf32, #tpu.memory_space<vmem>>, vector<1x128x128xf32>
    %164 = vector.shape_cast %163 : vector<1x128x128xf32> to vector<128x128xf32>
    %cst_94 = arith.constant dense<0.000000e+00> : vector<8x128xf32>
    %165 = tpu.matmul %162, %164, %cst_94 {dimension_numbers = #tpu.dot_dimension_numbers<[1], [0], [0], [1], [0, 0, 1, 1], [], []>} : vector<8x128xf32>, vector<128x128xf32>, vector<8x128xf32> -> vector<8x128xf32>
    %c1_95 = arith.constant 1 : index
    %c0_96 = arith.constant 0 : index
    %c0_97 = arith.constant 0 : index
    %166 = vector.load %arg22[%c1_95, %c0_96, %c0_97] : memref<4x1x128xf32, #tpu.memory_space<vmem>>, vector<1x1x128xf32>
    %167 = vector.shape_cast %166 : vector<1x1x128xf32> to vector<1x128xf32>
    %168 = vector.broadcast %167 : vector<1x128xf32> to vector<8x128xf32>
    %169 = arith.addf %165, %168 : vector<8x128xf32>
    %170 = arith.addf %132, %169 : vector<8x128xf32>
    %c1_98 = arith.constant 1 : index
    %c0_99 = arith.constant 0 : index
    %c0_100 = arith.constant 0 : index
    %171 = vector.load %arg23[%c1_98, %c0_99, %c0_100] : memref<4x1x128xf32, #tpu.memory_space<vmem>>, vector<1x1x128xf32>
    %172 = vector.shape_cast %171 : vector<1x1x128xf32> to vector<1x128xf32>
    %c1_101 = arith.constant 1 : index
    %c0_102 = arith.constant 0 : index
    %c0_103 = arith.constant 0 : index
    %173 = vector.load %arg24[%c1_101, %c0_102, %c0_103] : memref<4x1x128xf32, #tpu.memory_space<vmem>>, vector<1x1x128xf32>
    %174 = vector.shape_cast %173 : vector<1x1x128xf32> to vector<1x128xf32>
    %cst_104 = arith.constant dense<0.000000e+00> : vector<8x128xf32>
    %175 = tpu.matmul %170, %1, %cst_104 {dimension_numbers = #tpu.dot_dimension_numbers<[1], [0], [0], [1], [0, 0, 1, 1], [], []>} : vector<8x128xf32>, vector<128x128xf32>, vector<8x128xf32> -> vector<8x128xf32>
    %176 = arith.subf %170, %175 : vector<8x128xf32>
    %177 = arith.mulf %176, %176 : vector<8x128xf32>
    %cst_105 = arith.constant dense<0.000000e+00> : vector<8x128xf32>
    %178 = tpu.matmul %177, %1, %cst_105 {dimension_numbers = #tpu.dot_dimension_numbers<[1], [0], [0], [1], [0, 0, 1, 1], [], []>} : vector<8x128xf32>, vector<128x128xf32>, vector<8x128xf32> -> vector<8x128xf32>
    %cst_106 = arith.constant 9.99999974E-6 : f32
    %179 = vector.broadcast %cst_106 : f32 to vector<8x128xf32>
    %180 = arith.addf %178, %179 : vector<8x128xf32>
    %181 = math.rsqrt %180 : vector<8x128xf32>
    %182 = arith.mulf %176, %181 : vector<8x128xf32>
    %183 = vector.broadcast %172 : vector<1x128xf32> to vector<8x128xf32>
    %184 = arith.mulf %182, %183 : vector<8x128xf32>
    %185 = vector.broadcast %174 : vector<1x128xf32> to vector<8x128xf32>
    %186 = arith.addf %184, %185 : vector<8x128xf32>
    %c2 = arith.constant 2 : index
    %c0_107 = arith.constant 0 : index
    %c0_108 = arith.constant 0 : index
    %187 = vector.load %arg15[%c2, %c0_107, %c0_108] : memref<4x128x128xf32, #tpu.memory_space<vmem>>, vector<1x128x128xf32>
    %188 = vector.shape_cast %187 : vector<1x128x128xf32> to vector<128x128xf32>
    %cst_109 = arith.constant dense<0.000000e+00> : vector<8x128xf32>
    %189 = tpu.matmul %186, %188, %cst_109 {dimension_numbers = #tpu.dot_dimension_numbers<[1], [0], [0], [1], [0, 0, 1, 1], [], []>} : vector<8x128xf32>, vector<128x128xf32>, vector<8x128xf32> -> vector<8x128xf32>
    %c2_110 = arith.constant 2 : index
    %c0_111 = arith.constant 0 : index
    %c0_112 = arith.constant 0 : index
    %190 = vector.load %arg16[%c2_110, %c0_111, %c0_112] : memref<4x1x128xf32, #tpu.memory_space<vmem>>, vector<1x1x128xf32>
    %191 = vector.shape_cast %190 : vector<1x1x128xf32> to vector<1x128xf32>
    %192 = vector.broadcast %191 : vector<1x128xf32> to vector<8x128xf32>
    %193 = arith.addf %189, %192 : vector<8x128xf32>
    %194 = vector.extract_strided_slice %67 {offsets = [0, 256], sizes = [8, 128], strides = [1, 1]} : vector<8x512xf32> to vector<8x128xf32>
    %195 = vector.extract_strided_slice %70 {offsets = [0, 256], sizes = [8, 128], strides = [1, 1]} : vector<8x512xf32> to vector<8x128xf32>
    %196 = vector.extract_strided_slice %73 {offsets = [0, 256], sizes = [8, 128], strides = [1, 1]} : vector<8x512xf32> to vector<8x128xf32>
    %197 = vector.extract_strided_slice %76 {offsets = [0, 256], sizes = [8, 128], strides = [1, 1]} : vector<8x512xf32> to vector<8x128xf32>
    %198 = arith.mulf %193, %194 : vector<8x128xf32>
    %cst_113 = arith.constant dense<0.000000e+00> : vector<8x32xf32>
    %199 = tpu.matmul %198, %77, %cst_113 {dimension_numbers = #tpu.dot_dimension_numbers<[1], [0], [0], [1], [0, 0, 1, 1], [], []>} : vector<8x128xf32>, vector<128x32xf32>, vector<8x32xf32> -> vector<8x32xf32>
    %200 = arith.mulf %193, %195 : vector<8x128xf32>
    %cst_114 = arith.constant dense<0.000000e+00> : vector<8x32xf32>
    %201 = tpu.matmul %200, %77, %cst_114 {dimension_numbers = #tpu.dot_dimension_numbers<[1], [0], [0], [1], [0, 0, 1, 1], [], []>} : vector<8x128xf32>, vector<128x32xf32>, vector<8x32xf32> -> vector<8x32xf32>
    %202 = arith.maximumf %199, %201 : vector<8x32xf32>
    %203 = arith.subf %199, %202 : vector<8x32xf32>
    %204 = math.exp %203 : vector<8x32xf32>
    %205 = arith.subf %201, %202 : vector<8x32xf32>
    %206 = math.exp %205 : vector<8x32xf32>
    %207 = arith.addf %204, %206 : vector<8x32xf32>
    %cst_115 = arith.constant 1.000000e+00 : f32
    %208 = vector.broadcast %cst_115 : f32 to vector<8x32xf32>
    %209 = arith.divf %208, %207 : vector<8x32xf32>
    %210 = arith.mulf %204, %209 : vector<8x32xf32>
    %cst_116 = arith.constant dense<0.000000e+00> : vector<8x128xf32>
    %211 = tpu.matmul %210, %78, %cst_116 {dimension_numbers = #tpu.dot_dimension_numbers<[1], [0], [0], [1], [0, 0, 1, 1], [], []>} : vector<8x32xf32>, vector<32x128xf32>, vector<8x128xf32> -> vector<8x128xf32>
    %212 = arith.mulf %211, %196 : vector<8x128xf32>
    %213 = arith.mulf %206, %209 : vector<8x32xf32>
    %cst_117 = arith.constant dense<0.000000e+00> : vector<8x128xf32>
    %214 = tpu.matmul %213, %78, %cst_117 {dimension_numbers = #tpu.dot_dimension_numbers<[1], [0], [0], [1], [0, 0, 1, 1], [], []>} : vector<8x32xf32>, vector<32x128xf32>, vector<8x128xf32> -> vector<8x128xf32>
    %215 = arith.mulf %214, %197 : vector<8x128xf32>
    %216 = arith.addf %212, %215 : vector<8x128xf32>
    %c2_118 = arith.constant 2 : index
    %c0_119 = arith.constant 0 : index
    %c0_120 = arith.constant 0 : index
    %217 = vector.load %arg21[%c2_118, %c0_119, %c0_120] : memref<4x128x128xf32, #tpu.memory_space<vmem>>, vector<1x128x128xf32>
    %218 = vector.shape_cast %217 : vector<1x128x128xf32> to vector<128x128xf32>
    %cst_121 = arith.constant dense<0.000000e+00> : vector<8x128xf32>
    %219 = tpu.matmul %216, %218, %cst_121 {dimension_numbers = #tpu.dot_dimension_numbers<[1], [0], [0], [1], [0, 0, 1, 1], [], []>} : vector<8x128xf32>, vector<128x128xf32>, vector<8x128xf32> -> vector<8x128xf32>
    %c2_122 = arith.constant 2 : index
    %c0_123 = arith.constant 0 : index
    %c0_124 = arith.constant 0 : index
    %220 = vector.load %arg22[%c2_122, %c0_123, %c0_124] : memref<4x1x128xf32, #tpu.memory_space<vmem>>, vector<1x1x128xf32>
    %221 = vector.shape_cast %220 : vector<1x1x128xf32> to vector<1x128xf32>
    %222 = vector.broadcast %221 : vector<1x128xf32> to vector<8x128xf32>
    %223 = arith.addf %219, %222 : vector<8x128xf32>
    %224 = arith.addf %186, %223 : vector<8x128xf32>
    %c2_125 = arith.constant 2 : index
    %c0_126 = arith.constant 0 : index
    %c0_127 = arith.constant 0 : index
    %225 = vector.load %arg23[%c2_125, %c0_126, %c0_127] : memref<4x1x128xf32, #tpu.memory_space<vmem>>, vector<1x1x128xf32>
    %226 = vector.shape_cast %225 : vector<1x1x128xf32> to vector<1x128xf32>
    %c2_128 = arith.constant 2 : index
    %c0_129 = arith.constant 0 : index
    %c0_130 = arith.constant 0 : index
    %227 = vector.load %arg24[%c2_128, %c0_129, %c0_130] : memref<4x1x128xf32, #tpu.memory_space<vmem>>, vector<1x1x128xf32>
    %228 = vector.shape_cast %227 : vector<1x1x128xf32> to vector<1x128xf32>
    %cst_131 = arith.constant dense<0.000000e+00> : vector<8x128xf32>
    %229 = tpu.matmul %224, %1, %cst_131 {dimension_numbers = #tpu.dot_dimension_numbers<[1], [0], [0], [1], [0, 0, 1, 1], [], []>} : vector<8x128xf32>, vector<128x128xf32>, vector<8x128xf32> -> vector<8x128xf32>
    %230 = arith.subf %224, %229 : vector<8x128xf32>
    %231 = arith.mulf %230, %230 : vector<8x128xf32>
    %cst_132 = arith.constant dense<0.000000e+00> : vector<8x128xf32>
    %232 = tpu.matmul %231, %1, %cst_132 {dimension_numbers = #tpu.dot_dimension_numbers<[1], [0], [0], [1], [0, 0, 1, 1], [], []>} : vector<8x128xf32>, vector<128x128xf32>, vector<8x128xf32> -> vector<8x128xf32>
    %cst_133 = arith.constant 9.99999974E-6 : f32
    %233 = vector.broadcast %cst_133 : f32 to vector<8x128xf32>
    %234 = arith.addf %232, %233 : vector<8x128xf32>
    %235 = math.rsqrt %234 : vector<8x128xf32>
    %236 = arith.mulf %230, %235 : vector<8x128xf32>
    %237 = vector.broadcast %226 : vector<1x128xf32> to vector<8x128xf32>
    %238 = arith.mulf %236, %237 : vector<8x128xf32>
    %239 = vector.broadcast %228 : vector<1x128xf32> to vector<8x128xf32>
    %240 = arith.addf %238, %239 : vector<8x128xf32>
    %c3 = arith.constant 3 : index
    %c0_134 = arith.constant 0 : index
    %c0_135 = arith.constant 0 : index
    %241 = vector.load %arg15[%c3, %c0_134, %c0_135] : memref<4x128x128xf32, #tpu.memory_space<vmem>>, vector<1x128x128xf32>
    %242 = vector.shape_cast %241 : vector<1x128x128xf32> to vector<128x128xf32>
    %cst_136 = arith.constant dense<0.000000e+00> : vector<8x128xf32>
    %243 = tpu.matmul %240, %242, %cst_136 {dimension_numbers = #tpu.dot_dimension_numbers<[1], [0], [0], [1], [0, 0, 1, 1], [], []>} : vector<8x128xf32>, vector<128x128xf32>, vector<8x128xf32> -> vector<8x128xf32>
    %c3_137 = arith.constant 3 : index
    %c0_138 = arith.constant 0 : index
    %c0_139 = arith.constant 0 : index
    %244 = vector.load %arg16[%c3_137, %c0_138, %c0_139] : memref<4x1x128xf32, #tpu.memory_space<vmem>>, vector<1x1x128xf32>
    %245 = vector.shape_cast %244 : vector<1x1x128xf32> to vector<1x128xf32>
    %246 = vector.broadcast %245 : vector<1x128xf32> to vector<8x128xf32>
    %247 = arith.addf %243, %246 : vector<8x128xf32>
    %248 = vector.extract_strided_slice %67 {offsets = [0, 384], sizes = [8, 128], strides = [1, 1]} : vector<8x512xf32> to vector<8x128xf32>
    %249 = vector.extract_strided_slice %70 {offsets = [0, 384], sizes = [8, 128], strides = [1, 1]} : vector<8x512xf32> to vector<8x128xf32>
    %250 = vector.extract_strided_slice %73 {offsets = [0, 384], sizes = [8, 128], strides = [1, 1]} : vector<8x512xf32> to vector<8x128xf32>
    %251 = vector.extract_strided_slice %76 {offsets = [0, 384], sizes = [8, 128], strides = [1, 1]} : vector<8x512xf32> to vector<8x128xf32>
    %252 = arith.mulf %247, %248 : vector<8x128xf32>
    %cst_140 = arith.constant dense<0.000000e+00> : vector<8x32xf32>
    %253 = tpu.matmul %252, %77, %cst_140 {dimension_numbers = #tpu.dot_dimension_numbers<[1], [0], [0], [1], [0, 0, 1, 1], [], []>} : vector<8x128xf32>, vector<128x32xf32>, vector<8x32xf32> -> vector<8x32xf32>
    %254 = arith.mulf %247, %249 : vector<8x128xf32>
    %cst_141 = arith.constant dense<0.000000e+00> : vector<8x32xf32>
    %255 = tpu.matmul %254, %77, %cst_141 {dimension_numbers = #tpu.dot_dimension_numbers<[1], [0], [0], [1], [0, 0, 1, 1], [], []>} : vector<8x128xf32>, vector<128x32xf32>, vector<8x32xf32> -> vector<8x32xf32>
    %256 = arith.maximumf %253, %255 : vector<8x32xf32>
    %257 = arith.subf %253, %256 : vector<8x32xf32>
    %258 = math.exp %257 : vector<8x32xf32>
    %259 = arith.subf %255, %256 : vector<8x32xf32>
    %260 = math.exp %259 : vector<8x32xf32>
    %261 = arith.addf %258, %260 : vector<8x32xf32>
    %cst_142 = arith.constant 1.000000e+00 : f32
    %262 = vector.broadcast %cst_142 : f32 to vector<8x32xf32>
    %263 = arith.divf %262, %261 : vector<8x32xf32>
    %264 = arith.mulf %258, %263 : vector<8x32xf32>
    %cst_143 = arith.constant dense<0.000000e+00> : vector<8x128xf32>
    %265 = tpu.matmul %264, %78, %cst_143 {dimension_numbers = #tpu.dot_dimension_numbers<[1], [0], [0], [1], [0, 0, 1, 1], [], []>} : vector<8x32xf32>, vector<32x128xf32>, vector<8x128xf32> -> vector<8x128xf32>
    %266 = arith.mulf %265, %250 : vector<8x128xf32>
    %267 = arith.mulf %260, %263 : vector<8x32xf32>
    %cst_144 = arith.constant dense<0.000000e+00> : vector<8x128xf32>
    %268 = tpu.matmul %267, %78, %cst_144 {dimension_numbers = #tpu.dot_dimension_numbers<[1], [0], [0], [1], [0, 0, 1, 1], [], []>} : vector<8x32xf32>, vector<32x128xf32>, vector<8x128xf32> -> vector<8x128xf32>
    %269 = arith.mulf %268, %251 : vector<8x128xf32>
    %270 = arith.addf %266, %269 : vector<8x128xf32>
    %c3_145 = arith.constant 3 : index
    %c0_146 = arith.constant 0 : index
    %c0_147 = arith.constant 0 : index
    %271 = vector.load %arg21[%c3_145, %c0_146, %c0_147] : memref<4x128x128xf32, #tpu.memory_space<vmem>>, vector<1x128x128xf32>
    %272 = vector.shape_cast %271 : vector<1x128x128xf32> to vector<128x128xf32>
    %cst_148 = arith.constant dense<0.000000e+00> : vector<8x128xf32>
    %273 = tpu.matmul %270, %272, %cst_148 {dimension_numbers = #tpu.dot_dimension_numbers<[1], [0], [0], [1], [0, 0, 1, 1], [], []>} : vector<8x128xf32>, vector<128x128xf32>, vector<8x128xf32> -> vector<8x128xf32>
    %c3_149 = arith.constant 3 : index
    %c0_150 = arith.constant 0 : index
    %c0_151 = arith.constant 0 : index
    %274 = vector.load %arg22[%c3_149, %c0_150, %c0_151] : memref<4x1x128xf32, #tpu.memory_space<vmem>>, vector<1x1x128xf32>
    %275 = vector.shape_cast %274 : vector<1x1x128xf32> to vector<1x128xf32>
    %276 = vector.broadcast %275 : vector<1x128xf32> to vector<8x128xf32>
    %277 = arith.addf %273, %276 : vector<8x128xf32>
    %278 = arith.addf %240, %277 : vector<8x128xf32>
    %c3_152 = arith.constant 3 : index
    %c0_153 = arith.constant 0 : index
    %c0_154 = arith.constant 0 : index
    %279 = vector.load %arg23[%c3_152, %c0_153, %c0_154] : memref<4x1x128xf32, #tpu.memory_space<vmem>>, vector<1x1x128xf32>
    %280 = vector.shape_cast %279 : vector<1x1x128xf32> to vector<1x128xf32>
    %c3_155 = arith.constant 3 : index
    %c0_156 = arith.constant 0 : index
    %c0_157 = arith.constant 0 : index
    %281 = vector.load %arg24[%c3_155, %c0_156, %c0_157] : memref<4x1x128xf32, #tpu.memory_space<vmem>>, vector<1x1x128xf32>
    %282 = vector.shape_cast %281 : vector<1x1x128xf32> to vector<1x128xf32>
    %cst_158 = arith.constant dense<0.000000e+00> : vector<8x128xf32>
    %283 = tpu.matmul %278, %1, %cst_158 {dimension_numbers = #tpu.dot_dimension_numbers<[1], [0], [0], [1], [0, 0, 1, 1], [], []>} : vector<8x128xf32>, vector<128x128xf32>, vector<8x128xf32> -> vector<8x128xf32>
    %284 = arith.subf %278, %283 : vector<8x128xf32>
    %285 = arith.mulf %284, %284 : vector<8x128xf32>
    %cst_159 = arith.constant dense<0.000000e+00> : vector<8x128xf32>
    %286 = tpu.matmul %285, %1, %cst_159 {dimension_numbers = #tpu.dot_dimension_numbers<[1], [0], [0], [1], [0, 0, 1, 1], [], []>} : vector<8x128xf32>, vector<128x128xf32>, vector<8x128xf32> -> vector<8x128xf32>
    %cst_160 = arith.constant 9.99999974E-6 : f32
    %287 = vector.broadcast %cst_160 : f32 to vector<8x128xf32>
    %288 = arith.addf %286, %287 : vector<8x128xf32>
    %289 = math.rsqrt %288 : vector<8x128xf32>
    %290 = arith.mulf %284, %289 : vector<8x128xf32>
    %291 = vector.broadcast %280 : vector<1x128xf32> to vector<8x128xf32>
    %292 = arith.mulf %290, %291 : vector<8x128xf32>
    %293 = vector.broadcast %282 : vector<1x128xf32> to vector<8x128xf32>
    %294 = arith.addf %292, %293 : vector<8x128xf32>
    %c0_161 = arith.constant 0 : index
    %c0_162 = arith.constant 0 : index
    %295 = vector.load %arg25[%c0_161, %c0_162] : memref<128x32xf32, #tpu.memory_space<vmem>>, vector<128x32xf32>
    %cst_163 = arith.constant dense<0.000000e+00> : vector<8x32xf32>
    %296 = tpu.matmul %32, %295, %cst_163 {dimension_numbers = #tpu.dot_dimension_numbers<[1], [0], [0], [1], [0, 0, 1, 1], [], []>} : vector<8x128xf32>, vector<128x32xf32>, vector<8x32xf32> -> vector<8x32xf32>
    %c0_164 = arith.constant 0 : index
    %c0_165 = arith.constant 0 : index
    %297 = vector.load %arg26[%c0_164, %c0_165] : memref<128x32xf32, #tpu.memory_space<vmem>>, vector<128x32xf32>
    %cst_166 = arith.constant dense<0.000000e+00> : vector<8x32xf32>
    %298 = tpu.matmul %294, %297, %cst_166 {dimension_numbers = #tpu.dot_dimension_numbers<[1], [0], [0], [1], [0, 0, 1, 1], [], []>} : vector<8x128xf32>, vector<128x32xf32>, vector<8x32xf32> -> vector<8x32xf32>
    %299 = arith.addf %296, %298 : vector<8x32xf32>
    %c0_167 = arith.constant 0 : index
    %c0_168 = arith.constant 0 : index
    %300 = vector.load %arg27[%c0_167, %c0_168] : memref<1x32xf32, #tpu.memory_space<vmem>>, vector<1x32xf32>
    %301 = vector.broadcast %300 : vector<1x32xf32> to vector<8x32xf32>
    %302 = arith.addf %299, %301 : vector<8x32xf32>
    %cst_169 = arith.constant 0.000000e+00 : f32
    %303 = vector.broadcast %cst_169 : f32 to vector<8x32xf32>
    %304 = arith.maximumf %302, %303 : vector<8x32xf32>
    %c0_170 = arith.constant 0 : index
    %c0_171 = arith.constant 0 : index
    %305 = vector.load %arg28[%c0_170, %c0_171] : memref<32x32xf32, #tpu.memory_space<vmem>>, vector<32x32xf32>
    %cst_172 = arith.constant dense<0.000000e+00> : vector<8x32xf32>
    %306 = tpu.matmul %304, %305, %cst_172 {dimension_numbers = #tpu.dot_dimension_numbers<[1], [0], [0], [1], [0, 0, 1, 1], [], []>} : vector<8x32xf32>, vector<32x32xf32>, vector<8x32xf32> -> vector<8x32xf32>
    %c0_173 = arith.constant 0 : index
    %c0_174 = arith.constant 0 : index
    %307 = vector.load %arg29[%c0_173, %c0_174] : memref<1x32xf32, #tpu.memory_space<vmem>>, vector<1x32xf32>
    %308 = vector.broadcast %307 : vector<1x32xf32> to vector<8x32xf32>
    %309 = arith.addf %306, %308 : vector<8x32xf32>
    %cst_175 = arith.constant 0.000000e+00 : f32
    %310 = vector.broadcast %cst_175 : f32 to vector<8x32xf32>
    %311 = arith.maximumf %309, %310 : vector<8x32xf32>
    %c0_176 = arith.constant 0 : index
    %c0_177 = arith.constant 0 : index
    %312 = vector.load %arg30[%c0_176, %c0_177] : memref<32x128xf32, #tpu.memory_space<vmem>>, vector<32x128xf32>
    %cst_178 = arith.constant dense<0.000000e+00> : vector<8x128xf32>
    %313 = tpu.matmul %311, %312, %cst_178 {dimension_numbers = #tpu.dot_dimension_numbers<[1], [0], [0], [1], [0, 0, 1, 1], [], []>} : vector<8x32xf32>, vector<32x128xf32>, vector<8x128xf32> -> vector<8x128xf32>
    %c0_179 = arith.constant 0 : index
    %c0_180 = arith.constant 0 : index
    %314 = vector.load %arg31[%c0_179, %c0_180] : memref<1x128xf32, #tpu.memory_space<vmem>>, vector<1x128xf32>
    %315 = vector.broadcast %314 : vector<1x128xf32> to vector<8x128xf32>
    %316 = arith.addf %313, %315 : vector<8x128xf32>
    %c0_181 = arith.constant 0 : index
    %c0_182 = arith.constant 0 : index
    %317 = vector.load %arg32[%c0_181, %c0_182] : memref<8x128xf32, #tpu.memory_space<vmem>>, vector<8x128xf32>
    tpu.vector_store %arg32[%c0_181, %c0_182], %316 {strides = array<i32>} : memref<8x128xf32, #tpu.memory_space<vmem>>, vector<8x128xf32>,
    return
  }
  func.func @transform_0(%arg0: i32) -> (i32, i32) {
    %c0_i32 = arith.constant 0 : i32
    %c0_i32_0 = arith.constant 0 : i32
    return %arg0, %c0_i32 : i32, i32
  }
  func.func @transform_1(%arg0: i32) -> (i32, i32) {
    %c0_i32 = arith.constant 0 : i32
    %c0_i32_0 = arith.constant 0 : i32
    %c0_i32_1 = arith.constant 0 : i32
    return %c0_i32, %c0_i32_0 : i32, i32
  }
  func.func @transform_2(%arg0: i32) -> (i32, i32) {
    %c0_i32 = arith.constant 0 : i32
    %c0_i32_0 = arith.constant 0 : i32
    %c0_i32_1 = arith.constant 0 : i32
    return %c0_i32, %c0_i32_0 : i32, i32
  }
  func.func @transform_3(%arg0: i32) -> (i32, i32) {
    %c0_i32 = arith.constant 0 : i32
    %c0_i32_0 = arith.constant 0 : i32
    %c0_i32_1 = arith.constant 0 : i32
    return %c0_i32, %c0_i32_0 : i32, i32
  }
  func.func @transform_4(%arg0: i32) -> (i32, i32) {
    %c0_i32 = arith.constant 0 : i32
    %c0_i32_0 = arith.constant 0 : i32
    %c0_i32_1 = arith.constant 0 : i32
    return %c0_i32, %c0_i32_0 : i32, i32
  }
  func.func @transform_5(%arg0: i32) -> (i32, i32) {
    %c0_i32 = arith.constant 0 : i32
    %c0_i32_0 = arith.constant 0 : i32
    %c0_i32_1 = arith.constant 0 : i32
    return %c0_i32, %c0_i32_0 : i32, i32
  }
  func.func @transform_6(%arg0: i32) -> (i32, i32) {
    %c0_i32 = arith.constant 0 : i32
    %c0_i32_0 = arith.constant 0 : i32
    %c0_i32_1 = arith.constant 0 : i32
    return %c0_i32, %c0_i32_0 : i32, i32
  }
  func.func @transform_7(%arg0: i32) -> (i32, i32) {
    %c0_i32 = arith.constant 0 : i32
    %c0_i32_0 = arith.constant 0 : i32
    %c0_i32_1 = arith.constant 0 : i32
    return %c0_i32, %c0_i32_0 : i32, i32
  }
  func.func @transform_8(%arg0: i32) -> (i32, i32) {
    %c0_i32 = arith.constant 0 : i32
    %c0_i32_0 = arith.constant 0 : i32
    %c0_i32_1 = arith.constant 0 : i32
    return %c0_i32, %c0_i32_0 : i32, i32
  }
  func.func @transform_9(%arg0: i32) -> (i32, i32) {
    %c0_i32 = arith.constant 0 : i32
    %c0_i32_0 = arith.constant 0 : i32
    %c0_i32_1 = arith.constant 0 : i32
    return %c0_i32, %c0_i32_0 : i32, i32
  }
  func.func @transform_10(%arg0: i32) -> (i32, i32) {
    %c0_i32 = arith.constant 0 : i32
    %c0_i32_0 = arith.constant 0 : i32
    %c0_i32_1 = arith.constant 0 : i32
    return %c0_i32, %c0_i32_0 : i32, i32
  }
  func.func @transform_11(%arg0: i32) -> (i32, i32) {
    %c0_i32 = arith.constant 0 : i32
    %c0_i32_0 = arith.constant 0 : i32
    %c0_i32_1 = arith.constant 0 : i32
    return %c0_i32, %c0_i32_0 : i32, i32
  }
  func.func @transform_12(%arg0: i32) -> (i32, i32) {
    %c0_i32 = arith.constant 0 : i32
    %c0_i32_0 = arith.constant 0 : i32
    %c0_i32_1 = arith.constant 0 : i32
    return %c0_i32, %c0_i32_0 : i32, i32
  }
  func.func @transform_13(%arg0: i32) -> (i32, i32) {
    %c0_i32 = arith.constant 0 : i32
    %c0_i32_0 = arith.constant 0 : i32
    %c0_i32_1 = arith.constant 0 : i32
    return %c0_i32, %c0_i32_0 : i32, i32
  }
  func.func @transform_14(%arg0: i32) -> (i32, i32, i32) {
    %c0_i32 = arith.constant 0 : i32
    %c0_i32_0 = arith.constant 0 : i32
    %c0_i32_1 = arith.constant 0 : i32
    %c0_i32_2 = arith.constant 0 : i32
    return %c0_i32, %c0_i32_0, %c0_i32_1 : i32, i32, i32
  }
  func.func @transform_15(%arg0: i32) -> (i32, i32, i32) {
    %c0_i32 = arith.constant 0 : i32
    %c0_i32_0 = arith.constant 0 : i32
    %c0_i32_1 = arith.constant 0 : i32
    %c0_i32_2 = arith.constant 0 : i32
    return %c0_i32, %c0_i32_0, %c0_i32_1 : i32, i32, i32
  }
  func.func @transform_16(%arg0: i32) -> (i32, i32) {
    %c0_i32 = arith.constant 0 : i32
    %c0_i32_0 = arith.constant 0 : i32
    %c0_i32_1 = arith.constant 0 : i32
    return %c0_i32, %c0_i32_0 : i32, i32
  }
  func.func @transform_17(%arg0: i32) -> (i32, i32) {
    %c0_i32 = arith.constant 0 : i32
    %c0_i32_0 = arith.constant 0 : i32
    %c0_i32_1 = arith.constant 0 : i32
    return %c0_i32, %c0_i32_0 : i32, i32
  }
  func.func @transform_18(%arg0: i32) -> (i32, i32) {
    %c0_i32 = arith.constant 0 : i32
    %c0_i32_0 = arith.constant 0 : i32
    %c0_i32_1 = arith.constant 0 : i32
    return %c0_i32, %c0_i32_0 : i32, i32
  }
  func.func @transform_19(%arg0: i32) -> (i32, i32) {
    %c0_i32 = arith.constant 0 : i32
    %c0_i32_0 = arith.constant 0 : i32
    %c0_i32_1 = arith.constant 0 : i32
    return %c0_i32, %c0_i32_0 : i32, i32
  }
  func.func @transform_20(%arg0: i32) -> (i32, i32, i32) {
    %c0_i32 = arith.constant 0 : i32
    %c0_i32_0 = arith.constant 0 : i32
    %c0_i32_1 = arith.constant 0 : i32
    %c0_i32_2 = arith.constant 0 : i32
    return %c0_i32, %c0_i32_0, %c0_i32_1 : i32, i32, i32
  }
  func.func @transform_21(%arg0: i32) -> (i32, i32, i32) {
    %c0_i32 = arith.constant 0 : i32
    %c0_i32_0 = arith.constant 0 : i32
    %c0_i32_1 = arith.constant 0 : i32
    %c0_i32_2 = arith.constant 0 : i32
    return %c0_i32, %c0_i32_0, %c0_i32_1 : i32, i32, i32
  }
  func.func @transform_22(%arg0: i32) -> (i32, i32, i32) {
    %c0_i32 = arith.constant 0 : i32
    %c0_i32_0 = arith.constant 0 : i32
    %c0_i32_1 = arith.constant 0 : i32
    %c0_i32_2 = arith.constant 0 : i32
    return %c0_i32, %c0_i32_0, %c0_i32_1 : i32, i32, i32
  }
  func.func @transform_23(%arg0: i32) -> (i32, i32, i32) {
    %c0_i32 = arith.constant 0 : i32
    %c0_i32_0 = arith.constant 0 : i32
    %c0_i32_1 = arith.constant 0 : i32
    %c0_i32_2 = arith.constant 0 : i32
    return %c0_i32, %c0_i32_0, %c0_i32_1 : i32, i32, i32
  }
  func.func @transform_24(%arg0: i32) -> (i32, i32) {
    %c0_i32 = arith.constant 0 : i32
    %c0_i32_0 = arith.constant 0 : i32
    %c0_i32_1 = arith.constant 0 : i32
    return %c0_i32, %c0_i32_0 : i32, i32
  }
  func.func @transform_25(%arg0: i32) -> (i32, i32) {
    %c0_i32 = arith.constant 0 : i32
    %c0_i32_0 = arith.constant 0 : i32
    %c0_i32_1 = arith.constant 0 : i32
    return %c0_i32, %c0_i32_0 : i32, i32
  }
  func.func @transform_26(%arg0: i32) -> (i32, i32) {
    %c0_i32 = arith.constant 0 : i32
    %c0_i32_0 = arith.constant 0 : i32
    %c0_i32_1 = arith.constant 0 : i32
    return %c0_i32, %c0_i32_0 : i32, i32
  }
  func.func @transform_27(%arg0: i32) -> (i32, i32) {
    %c0_i32 = arith.constant 0 : i32
    %c0_i32_0 = arith.constant 0 : i32
    %c0_i32_1 = arith.constant 0 : i32
    return %c0_i32, %c0_i32_0 : i32, i32
  }
  func.func @transform_28(%arg0: i32) -> (i32, i32) {
    %c0_i32 = arith.constant 0 : i32
    %c0_i32_0 = arith.constant 0 : i32
    %c0_i32_1 = arith.constant 0 : i32
    return %c0_i32, %c0_i32_0 : i32, i32
  }
  func.func @transform_29(%arg0: i32) -> (i32, i32) {
    %c0_i32 = arith.constant 0 : i32
    %c0_i32_0 = arith.constant 0 : i32
    %c0_i32_1 = arith.constant 0 : i32
    return %c0_i32, %c0_i32_0 : i32, i32
  }
  func.func @transform_30(%arg0: i32) -> (i32, i32) {
    %c0_i32 = arith.constant 0 : i32
    %c0_i32_0 = arith.constant 0 : i32
    %c0_i32_1 = arith.constant 0 : i32
    return %c0_i32, %c0_i32_0 : i32, i32
  }
  func.func @transform_31(%arg0: i32) -> (i32, i32) {
    %c0_i32 = arith.constant 0 : i32
    %c0_i32_0 = arith.constant 0 : i32
    return %arg0, %c0_i32 : i32, i32
  }
}

</mosaic_0001>

<bundles_post_ra>
// kernel: tpu_custom_call.1
= control target key start
LH: loop header
LB: loop body
LE: loop exit
PB: predicated region body
PF: predicated region fallthrough
CT: control target
= control target key end

     0   :  { %s7654_s6 = smov 1   ;;  %s7655_s10 = smov 2   ;;  %s8854_s0 = inlined_call_operand.smem [shape: u32[32], index: -1, kind: input, shape index: {}] }
   0x1   :  { %s7722_s5 = sld [smem:[%s8854_s0]]   ;;  %s7656_s14 = smov 3  }
   0x2   :  { %s7727_s9 = sld [smem:[%s8854_s0 + %s7654_s6]]   ;;  %s7657_s18 = smov 4  }
   0x3   :  { %s7732_s13 = sld [smem:[%s8854_s0 + %s7655_s10]]   ;;  %s7658_s22 = smov 5  }
   0x4   :  { %s7737_s17 = sld [smem:[%s8854_s0 + %s7656_s14]]   ;;  %s7659_s26 = smov 6  }
   0x5   :  { %s7742_s21 = sld [smem:[%s8854_s0 + %s7657_s18]]   ;;  %s7660_s30 = smov 7  }
   0x6   :  { %s7747_s25 = sld [smem:[%s8854_s0 + %s7658_s22]]   ;;  %s7661_s4 = smov 8  }
   0x7   :  { %s7752_s29 = sld [smem:[%s8854_s0 + %s7659_s26]]   ;;  %s7662_s10 = smov 9  }
   0x8   :  { %s7757_s3 = sld [smem:[%s8854_s0 + %s7660_s30]]   ;;  %s7663_s15 = smov 10  }
   0x9   :  { %8867 = sst [smem:[#allocation43_spill]] %s7732_s13  ;;  %s7664_s20 = smov 11  }
   0xa   :  { %8868 = sst [smem:[#allocation44_spill]] %s7737_s17  ;;  %s7665_s26 = smov 12  }
   0xb   :  { %8869 = sst [smem:[#allocation45_spill]] %s7742_s21  ;;  %s7666_s1 = smov 13  }
   0xc   :  { %8870 = sst [smem:[#allocation46_spill]] %s7747_s25  ;;  %s7667_s7 = smov 14  }
   0xd   :  { %s7762_s8 = sld [smem:[%s8854_s0 + %s7661_s4]]   ;;  %s7669_s22 = smov 16  }
   0xe   :  { %s7767_s14 = sld [smem:[%s8854_s0 + %s7662_s10]]   ;;  %s7670_s28 = smov 17  }
   0xf   :  { %s7772_s19 = sld [smem:[%s8854_s0 + %s7663_s15]]   ;;  %s7668_s15 = smov 15  }
  0x10   :  { %s7777_s24 = sld [smem:[%s8854_s0 + %s7664_s20]]  }
  0x11   :  { %s7782_s30 = sld [smem:[%s8854_s0 + %s7665_s26]]  }
  0x12   :  { %s7787_s6 = sld [smem:[%s8854_s0 + %s7666_s1]]  }
  0x13   :  { %s7792_s12 = sld [smem:[%s8854_s0 + %s7667_s7]]   ;;  %s7671_s7 = smov 18  }
  0x14   :  { %s7797_s20 = sld [smem:[%s8854_s0 + %s7668_s15]]   ;;  %s7672_s15 = smov 19  }
  0x15   :  { %s7802_s27 = sld [smem:[%s8854_s0 + %s7669_s22]]   ;;  %s7673_s22 = smov 20  }
  0x16   :  { %8871 = sst [smem:[#allocation47_spill]] %s7777_s24 }
  0x17   :  { %8872 = sst [smem:[#allocation48_spill]] %s7782_s30 }
  0x18   :  { %s7807_s4 = sld [smem:[%s8854_s0 + %s7670_s28]]   ;;  %s7674_s28 = smov 21  }
  0x19   :  { %8873 = sst [smem:[#allocation49_spill]] %s7792_s12 }
  0x1a   :  { %s7812_s30 = sld [smem:[%s8854_s0 + %s7671_s7]]   ;;  %s7675_s7 = smov 22  }
  0x1b   :  { %s7817_s12 = sld [smem:[%s8854_s0 + %s7672_s15]]   ;;  %s7676_s15 = smov 23  }
  0x1c   :  { %s7822_s21 = sld [smem:[%s8854_s0 + %s7673_s22]]   ;;  %s7677_s22 = smov 24  }
  0x1d   :  { %s7827_s13 = sld [smem:[%s8854_s0 + %s7674_s28]]   ;;  %s7678_s28 = smov 25  }
  0x1e   :  { %s7837_s25 = sld [smem:[%s8854_s0 + %s7676_s15]]   ;;  %s7680_s15 = smov 27  }
  0x1f   :  { %s7842_s24 = sld [smem:[%s8854_s0 + %s7677_s22]]   ;;  %s7681_s22 = smov 28  }
  0x20   :  { %8874 = sst [smem:[#allocation50_spill]] %s7812_s30 }
  0x21   :  { %s7832_s30 = sld [smem:[%s8854_s0 + %s7675_s7]]   ;;  %s7679_s7 = smov 26  }
  0x22   :  { %8875 = sst [smem:[#allocation51_spill]] %s7822_s21 }
  0x23   :  { %s7847_s17 = sld [smem:[%s8854_s0 + %s7678_s28]]   ;;  %s7682_s28 = smov 29  }
  0x24   :  { %s7857_s21 = sld [smem:[%s8854_s0 + %s7680_s15]]   ;;  %s7684_s15 = smov 31  }
  0x25   :  { %8877 = sst [smem:[#allocation53_spill]] %s7842_s24 }
  0x26   :  { %s7862_s24 = sld [smem:[%s8854_s0 + %s7681_s22]]  }
  0x27   :  { %8876 = sst [smem:[#allocation52_spill]] %s7832_s30 }
  0x28   :  { %s7852_s30 = sld [smem:[%s8854_s0 + %s7679_s7]]   ;;  %s7683_s7 = smov 30  }
  0x29   :  { %8878 = sst [smem:[#allocation54_spill]] %s7847_s17 }
  0x2a   :  { %8880 = sst [smem:[#allocation56_spill]] %s7857_s21 }
  0x2b   :  { %s7867_s17 = sld [smem:[%s8854_s0 + %s7682_s28]]  }
  0x2c   :  { %s7877_s21 = sld [smem:[%s8854_s0 + %s7684_s15]]  }
  0x2e   :  { %8879 = sst [smem:[#allocation55_spill]] %s7852_s30 }
  0x2f   :  { %s7872_s30 = sld [smem:[%s8854_s0 + %s7683_s7]]  }
  0x30   :  { %68 = vsyncpa [#allocation3], 0 }
  0x31   :  { %69 = vsyncpa [#allocation6], 0 }
  0x32   :  { %70 = vsyncpa [#allocation9], 0 }
  0x33   :  { %71 = vsyncpa [#allocation12], 0 }
  0x34   :  { %72 = vsyncpa [#allocation15], 0 }
  0x35   :  { %73 = vsyncpa [#allocation18], 0 }
  0x36   :  { %74 = vsyncpa [#allocation21], 0 }
  0x37   :  { %75 = vsyncpa [#allocation24], 0 }
  0x38   :  { %76 = vsyncpa [#allocation27], 0 }
  0x39   :  { %77 = vsyncpa [#allocation30], 0 }
  0x3a   :  { %78 = vsyncpa [#allocation4], 0  ;;  %s7685_s22 = smov [#allocation5]   ;;  %s7214_s26 = scalar_lea.hbm %s7727_s9, 1024 }
  0x3b   :  { %s94_s23 = sshll.u32 %s7685_s22, 4  ;;  %p7215_p0 = scmp.ne.s32.totalorder %s7727_s9, %s7214_s26  ;;  %s95_s23 = int_to_ptr.vmem [resolvable:$true] %s94_s23 }
  0x3c   :  { %p7218_p1 = scmp.lt.u32.totalorder %s7214_s26, %s7727_s9 }
  0x3e   :  { %p7220_p2 = pnand %p7218_p1, %p7215_p0 }
  0x40   :  { %7223 = shalt.err (!%p7220_p2)
}
  0x41   :  { %s7224_s0 = scalar_lea.vmem %s95_s23, 1024  ;;  %p7229_p4 = scmp.lt.s32.totalorder %s95_s23, %s95_s23 }
  0x42   :  { %p7225_p3 = scmp.ne.s32.totalorder %s95_s23, %s7224_s0  ;;  %p7230_p5 = scmp.lt.s32.totalorder %s7224_s0, %s7224_s0 }
  0x44   :  { %p7231_p6 = por %p7230_p5, %p7229_p4 }
  0x46   :  { %p7232_p7 = pnand %p7231_p6, %p7225_p3 }
  0x48   :  { %7235 = shalt.err (!%p7232_p7)
}
  0x49   :  { %s7686_s28 = smov 128   ;;  %s7687_s1 = smov 8  }
  0x4a   :  { %100 = dma.hbm_to_vmem [thread:$0]  %s7727_s9, 1024, %s95_s23, [#allocation6], %s7686_s28, %s7686_s28, %s7687_s1  }
  0x4b   :  { %s7688_s2 = smov [#allocation8]   ;;  %s7689_s10 = smov [#allocation11]  }
  0x4c   :  { %s125_s7 = sshll.u32 %s7688_s2, 4  ;;  %s145_s11 = sshll.u32 %s7689_s10, 4  ;;  %s126_s7 = int_to_ptr.vmem [resolvable:$true] %s125_s7  ;;  %s146_s11 = int_to_ptr.vmem [resolvable:$true] %s145_s11 }
  0x4d   :  { %s7236_s15 = scalar_lea.hbm %s7757_s3, 16 }
  0x4e   :  { %p7237_p8 = scmp.ne.s32.totalorder %s7757_s3, %s7236_s15  ;;  %p7240_p9 = scmp.lt.u32.totalorder %s7236_s15, %s7757_s3 }
  0x50   :  { %p7242_p10 = pnand %p7240_p9, %p7237_p8 }
  0x52   :  { %7245 = shalt.err (!%p7242_p10)
}
  0x53   :  { %s7246_s16 = scalar_lea.vmem %s126_s7, 16  ;;  %s7250_s18 = scalar_lea.vmem %s126_s7, 32 }
  0x54   :  { %p7247_p11 = scmp.ne.s32.totalorder %s126_s7, %s7246_s16  ;;  %p7251_p12 = scmp.lt.s32.totalorder %s126_s7, %s126_s7 }
  0x55   :  { %p7252_p13 = scmp.lt.s32.totalorder %s7250_s18, %s7246_s16 }
  0x57   :  { %p7253_p0 = por %p7252_p13, %p7251_p12 }
  0x59   :  { %p7254_p1 = pnand %p7253_p0, %p7247_p11 }
  0x5b   :  { %7257 = shalt.err (!%p7254_p1)
}
  0x5c   :  { %128 = dma.hbm_to_vmem [thread:$0]  %s7757_s3, 16, %s126_s7, [#allocation9]  }
  0x5d   :  { %s7258_s9 = scalar_lea.hbm %s7767_s14, 16 }
  0x5e   :  { %p7259_p2 = scmp.ne.s32.totalorder %s7767_s14, %s7258_s9  ;;  %p7262_p3 = scmp.lt.u32.totalorder %s7258_s9, %s7767_s14 }
  0x60   :  { %p7264_p4 = pnand %p7262_p3, %p7259_p2 }
  0x62   :  { %7267 = shalt.err (!%p7264_p4)
}
  0x63   :  { %s7268_s22 = scalar_lea.vmem %s146_s11, 16  ;;  %s7272_s23 = scalar_lea.vmem %s146_s11, 32 }
  0x64   :  { %p7269_p5 = scmp.ne.s32.totalorder %s146_s11, %s7268_s22  ;;  %p7273_p6 = scmp.lt.s32.totalorder %s146_s11, %s146_s11 }
  0x65   :  { %p7274_p7 = scmp.lt.s32.totalorder %s7272_s23, %s7268_s22 }
  0x67   :  { %p7275_p8 = por %p7274_p7, %p7273_p6 }
  0x69   :  { %p7276_p9 = pnand %p7275_p8, %p7269_p5 }
  0x6b   :  { %7279 = shalt.err (!%p7276_p9)
}
  0x6c   :  { %148 = dma.hbm_to_vmem [thread:$0]  %s7767_s14, 16, %s146_s11, [#allocation12]  }
  0x6d   :  { %s7690_s3 = smov [#allocation14]   ;;  %s7691_s0 = smov [#allocation17]  }
  0x6e   :  { %s168_s26 = sshll.u32 %s7690_s3, 4  ;;  %s194_s2 = sshll.u32 %s7691_s0, 4  ;;  %s169_s26 = int_to_ptr.vmem [resolvable:$true] %s168_s26  ;;  %s195_s2 = int_to_ptr.vmem [resolvable:$true] %s194_s2 }
  0x6f   :  { %s7280_s7 = scalar_lea.hbm %s7787_s6, 512 }
  0x70   :  { %p7281_p10 = scmp.ne.s32.totalorder %s7787_s6, %s7280_s7  ;;  %p7284_p11 = scmp.lt.u32.totalorder %s7280_s7, %s7787_s6 }
  0x72   :  { %p7286_p12 = pnand %p7284_p11, %p7281_p10 }
  0x74   :  { %7289 = shalt.err (!%p7286_p12)
}
  0x75   :  { %s7290_s10 = scalar_lea.vmem %s169_s26, 512  ;;  %p7295_p0 = scmp.lt.s32.totalorder %s169_s26, %s169_s26 }
  0x76   :  { %p7291_p13 = scmp.ne.s32.totalorder %s169_s26, %s7290_s10  ;;  %p7296_p1 = scmp.lt.s32.totalorder %s7290_s10, %s7290_s10 }
  0x78   :  { %p7297_p2 = por %p7296_p1, %p7295_p0 }
  0x7a   :  { %p7298_p3 = pnand %p7297_p2, %p7291_p13 }
  0x7c   :  { %7301 = shalt.err (!%p7298_p3)
}
  0x7d   :  { %174 = dma.hbm_to_vmem [thread:$0]  %s7787_s6, 512, %s169_s26, [#allocation15], %s7686_s28, %s7686_s28, %s7687_s1  }
  0x7e   :  { %s7302_s14 = scalar_lea.hbm %s7802_s27, 1024 }
  0x7f   :  { %p7303_p4 = scmp.ne.s32.totalorder %s7802_s27, %s7302_s14  ;;  %p7306_p5 = scmp.lt.u32.totalorder %s7302_s14, %s7802_s27 }
  0x81   :  { %p7308_p6 = pnand %p7306_p5, %p7303_p4 }
  0x83   :  { %7311 = shalt.err (!%p7308_p6)
}
  0x84   :  { %s7312_s11 = scalar_lea.vmem %s195_s2, 1024  ;;  %p7317_p8 = scmp.lt.s32.totalorder %s195_s2, %s195_s2 }
  0x85   :  { %p7313_p7 = scmp.ne.s32.totalorder %s195_s2, %s7312_s11  ;;  %p7318_p9 = scmp.lt.s32.totalorder %s7312_s11, %s7312_s11 }
  0x87   :  { %p7319_p10 = por %p7318_p9, %p7317_p8 }
  0x89   :  { %p7320_p11 = pnand %p7319_p10, %p7313_p7 }
  0x8b   :  { %7323 = shalt.err (!%p7320_p11)
}
  0x8c   :  { %s7692_s15 = smov 512   ;;  %s7693_s16 = smov 32  }
  0x8d   :  { %200 = dma.hbm_to_vmem [thread:$0]  %s7802_s27, 1024, %s195_s2, [#allocation18], %s7692_s15, %s7692_s15, %s7693_s16  }
  0x8e   :  { %s7694_s6 = smov [#allocation20]   ;;  %s7324_s9 = scalar_lea.hbm %s7817_s12, 64 }
  0x8f   :  { %s219_s18 = sshll.u32 %s7694_s6, 4  ;;  %p7325_p12 = scmp.ne.s32.totalorder %s7817_s12, %s7324_s9  ;;  %s220_s18 = int_to_ptr.vmem [resolvable:$true] %s219_s18 }
  0x90   :  { %p7328_p13 = scmp.lt.u32.totalorder %s7324_s9, %s7817_s12 }
  0x92   :  { %p7330_p0 = pnand %p7328_p13, %p7325_p12 }
  0x94   :  { %7333 = shalt.err (!%p7330_p0)
}
  0x95   :  { %s7334_s22 = scalar_lea.vmem %s220_s18, 64  ;;  %p7339_p2 = scmp.lt.s32.totalorder %s220_s18, %s220_s18 }
  0x96   :  { %p7335_p1 = scmp.ne.s32.totalorder %s220_s18, %s7334_s22  ;;  %p7340_p3 = scmp.lt.s32.totalorder %s7334_s22, %s7334_s22 }
  0x98   :  { %p7341_p4 = por %p7340_p3, %p7339_p2 }
  0x9a   :  { %p7342_p5 = pnand %p7341_p4, %p7335_p1 }
  0x9c   :  { %7345 = shalt.err (!%p7342_p5)
}
  0x9d   :  { %222 = dma.hbm_to_vmem [thread:$0]  %s7817_s12, 64, %s220_s18, [#allocation21]  }
  0x9e   :  { %s7695_s27 = smov [#allocation23]   ;;  %s7696_s3 = smov [#allocation26]  }
  0x9f   :  { %s240_s23 = sshll.u32 %s7695_s27, 4  ;;  %s264_s26 = sshll.u32 %s7696_s3, 4  ;;  %s241_s23 = int_to_ptr.vmem [resolvable:$true] %s240_s23  ;;  %s7909_s26 = int_to_ptr.vmem [resolvable:$true] %s264_s26 }
  0xa0   :  { %s7346_s0 = scalar_lea.hbm %s7827_s13, 64 }
  0xa1   :  { %p7347_p6 = scmp.ne.s32.totalorder %s7827_s13, %s7346_s0  ;;  %p7350_p7 = scmp.lt.u32.totalorder %s7346_s0, %s7827_s13 }
  0xa3   :  { %p7352_p8 = pnand %p7350_p7, %p7347_p6 }
  0xa5   :  { %7355 = shalt.err (!%p7352_p8)
}
  0xa6   :  { %s7356_s2 = scalar_lea.vmem %s241_s23, 64  ;;  %p7361_p10 = scmp.lt.s32.totalorder %s241_s23, %s241_s23 }
  0xa7   :  { %p7357_p9 = scmp.ne.s32.totalorder %s241_s23, %s7356_s2  ;;  %p7362_p11 = scmp.lt.s32.totalorder %s7356_s2, %s7356_s2 }
  0xa9   :  { %p7363_p12 = por %p7362_p11, %p7361_p10 }
  0xab   :  { %p7364_p13 = pnand %p7363_p12, %p7357_p9 }
  0xad   :  { %7367 = shalt.err (!%p7364_p13)
}
  0xae   :  { %s7697_s12 = smov 16   ;;  %s7698_s7 = smov 1  }
  0xaf   :  { %246 = dma.hbm_to_vmem [thread:$0]  %s7827_s13, 64, %s241_s23, [#allocation24], %s7697_s12, %s7697_s12, %s7698_s7  }
  0xb0   :  { %s7368_s10 = scalar_lea.hbm %s7837_s25, 64 }
  0xb1   :  { %p7369_p0 = scmp.ne.s32.totalorder %s7837_s25, %s7368_s10  ;;  %p7372_p1 = scmp.lt.u32.totalorder %s7368_s10, %s7837_s25 }
  0xb3   :  { %p7374_p2 = pnand %p7372_p1, %p7369_p0 }
  0xb5   :  { %7377 = shalt.err (!%p7374_p2)
}
  0xb6   :  { %s7378_s14 = scalar_lea.vmem %s7909_s26, 64  ;;  %p7383_p4 = scmp.lt.s32.totalorder %s7909_s26, %s7909_s26 }
  0xb7   :  { %p7379_p3 = scmp.ne.s32.totalorder %s7909_s26, %s7378_s14  ;;  %p7384_p5 = scmp.lt.s32.totalorder %s7378_s14, %s7378_s14 }
  0xb9   :  { %p7385_p6 = por %p7384_p5, %p7383_p4 }
  0xbb   :  { %p7386_p7 = pnand %p7385_p6, %p7379_p3 }
  0xbd   :  { %7389 = shalt.err (!%p7386_p7)
}
  0xbe   :  { %270 = dma.hbm_to_vmem [thread:$0]  %s7837_s25, 64, %s7909_s26, [#allocation27], %s7697_s12, %s7697_s12, %s7698_s7  }
  0xbf   :  { %s7699_s13 = smov [#allocation2]   ;;  %s7700_s15 = smov [#allocation7]  }
  0xc0   :  { %s85_s11 = sshll.u32 %s7699_s13, 4  ;;  %s115_s16 = sshll.u32 %s7700_s15, 4  ;;  %s86_s11 = int_to_ptr.vmem [resolvable:$true] %s85_s11  ;;  %s116_s16 = int_to_ptr.vmem [resolvable:$true] %s115_s16 }
  0xc1   :  { %s7390_s6 = scalar_lea.hbm %s7722_s5, 128 }
  0xc2   :  { %p7391_p8 = scmp.ne.s32.totalorder %s7722_s5, %s7390_s6  ;;  %p7394_p9 = scmp.lt.u32.totalorder %s7390_s6, %s7722_s5 }
  0xc4   :  { %p7396_p10 = pnand %p7394_p9, %p7391_p8 }
  0xc6   :  { %7399 = shalt.err (!%p7396_p10)
}
  0xc7   :  { %s7400_s18 = scalar_lea.vmem %s86_s11, 128  ;;  %p7405_p12 = scmp.lt.s32.totalorder %s86_s11, %s86_s11 }
  0xc8   :  { %p7401_p11 = scmp.ne.s32.totalorder %s86_s11, %s7400_s18  ;;  %p7406_p13 = scmp.lt.s32.totalorder %s7400_s18, %s7400_s18 }
  0xca   :  { %p7407_p0 = por %p7406_p13, %p7405_p12 }
  0xcc   :  { %p7408_p1 = pnand %p7407_p0, %p7401_p11 }
  0xce   :  { %7411 = shalt.err (!%p7408_p1)
}
  0xcf   :  { %88 = dma.hbm_to_vmem [thread:$0]  %s7722_s5, 128, %s86_s11, [#allocation3]  }
  0xd0   :  { %s7412_s25 = scalar_lea.hbm %s7752_s29, 16 }
  0xd1   :  { %p7413_p2 = scmp.ne.s32.totalorder %s7752_s29, %s7412_s25  ;;  %p7416_p3 = scmp.lt.u32.totalorder %s7412_s25, %s7752_s29 }
  0xd3   :  { %p7418_p4 = pnand %p7416_p3, %p7413_p2 }
  0xd5   :  { %7421 = shalt.err (!%p7418_p4)
}
  0xd6   :  { %s7422_s9 = scalar_lea.vmem %s116_s16, 16  ;;  %s7426_s22 = scalar_lea.vmem %s116_s16, 32 }
  0xd7   :  { %p7423_p5 = scmp.ne.s32.totalorder %s116_s16, %s7422_s9  ;;  %p7427_p6 = scmp.lt.s32.totalorder %s116_s16, %s116_s16 }
  0xd8   :  { %p7428_p7 = scmp.lt.s32.totalorder %s7426_s22, %s7422_s9 }
  0xda   :  { %p7429_p8 = por %p7428_p7, %p7427_p6 }
  0xdc   :  { %p7430_p9 = pnand %p7429_p8, %p7423_p5 }
  0xde   :  { %7433 = shalt.err (!%p7430_p9)
}
  0xdf   :  { %118 = dma.hbm_to_vmem [thread:$0]  %s7752_s29, 16, %s116_s16, [#allocation6]  }
  0xe0   :  { %s7701_s27 = smov [#allocation10]   ;;  %s7702_s23 = smov [#allocation13]  }
  0xe1   :  { %s135_s5 = sshll.u32 %s7701_s27, 4  ;;  %s155_s3 = sshll.u32 %s7702_s23, 4  ;;  %s136_s5 = int_to_ptr.vmem [resolvable:$true] %s135_s5  ;;  %s156_s3 = int_to_ptr.vmem [resolvable:$true] %s155_s3 }
  0xe2   :  { %s7434_s26 = scalar_lea.hbm %s7762_s8, 16 }
  0xe3   :  { %p7435_p10 = scmp.ne.s32.totalorder %s7762_s8, %s7434_s26  ;;  %p7438_p11 = scmp.lt.u32.totalorder %s7434_s26, %s7762_s8 }
  0xe5   :  { %p7440_p12 = pnand %p7438_p11, %p7435_p10 }
  0xe7   :  { %7443 = shalt.err (!%p7440_p12)
}
  0xe8   :  { %s7444_s0 = scalar_lea.vmem %s136_s5, 16  ;;  %s7448_s2 = scalar_lea.vmem %s136_s5, 32 }
  0xe9   :  { %p7445_p13 = scmp.ne.s32.totalorder %s136_s5, %s7444_s0  ;;  %p7449_p0 = scmp.lt.s32.totalorder %s136_s5, %s136_s5 }
  0xea   :  { %p7450_p1 = scmp.lt.s32.totalorder %s7448_s2, %s7444_s0 }
  0xec   :  { %p7451_p2 = por %p7450_p1, %p7449_p0 }
  0xee   :  { %p7452_p3 = pnand %p7451_p2, %p7445_p13 }
  0xf0   :  { %7455 = shalt.err (!%p7452_p3)
}
  0xf1   :  { %138 = dma.hbm_to_vmem [thread:$0]  %s7762_s8, 16, %s136_s5, [#allocation9]  }
  0xf2   :  { %s7456_s29 = scalar_lea.hbm %s7772_s19, 16 }
  0xf3   :  { %p7457_p4 = scmp.ne.s32.totalorder %s7772_s19, %s7456_s29  ;;  %p7460_p5 = scmp.lt.u32.totalorder %s7456_s29, %s7772_s19 }
  0xf5   :  { %p7462_p6 = pnand %p7460_p5, %p7457_p4 }
  0xf7   :  { %7465 = shalt.err (!%p7462_p6)
}
  0xf8   :  { %s7466_s10 = scalar_lea.vmem %s156_s3, 16  ;;  %s7470_s14 = scalar_lea.vmem %s156_s3, 32 }
  0xf9   :  { %p7467_p7 = scmp.ne.s32.totalorder %s156_s3, %s7466_s10  ;;  %p7471_p8 = scmp.lt.s32.totalorder %s156_s3, %s156_s3 }
  0xfa   :  { %p7472_p9 = scmp.lt.s32.totalorder %s7470_s14, %s7466_s10 }
  0xfc   :  { %p7473_p10 = por %p7472_p9, %p7471_p8 }
  0xfe   :  { %p7474_p11 = pnand %p7473_p10, %p7467_p7 }
 0x100   :  { %7477 = shalt.err (!%p7474_p11)
}
 0x101   :  { %158 = dma.hbm_to_vmem [thread:$0]  %s7772_s19, 16, %s156_s3, [#allocation12]  }
 0x102   :  { %s7703_s13 = smov [#allocation16]   ;;  %s7704_s11 = smov [#allocation19]  }
 0x103   :  { %s182_s8 = sshll.u32 %s7703_s13, 4  ;;  %s207_s15 = sshll.u32 %s7704_s11, 4  ;;  %s183_s8 = int_to_ptr.vmem [resolvable:$true] %s182_s8  ;;  %s208_s15 = int_to_ptr.vmem [resolvable:$true] %s207_s15 }
 0x104   :  { %s7478_s16 = scalar_lea.hbm %s7797_s20, 64 }
 0x105   :  { %p7479_p12 = scmp.ne.s32.totalorder %s7797_s20, %s7478_s16  ;;  %p7482_p13 = scmp.lt.u32.totalorder %s7478_s16, %s7797_s20 }
 0x107   :  { %p7484_p0 = pnand %p7482_p13, %p7479_p12 }
 0x109   :  { %7487 = shalt.err (!%p7484_p0)
}
 0x10a   :  { %s7488_s6 = scalar_lea.vmem %s183_s8, 64  ;;  %p7493_p2 = scmp.lt.s32.totalorder %s183_s8, %s183_s8 }
 0x10b   :  { %p7489_p1 = scmp.ne.s32.totalorder %s183_s8, %s7488_s6  ;;  %p7494_p3 = scmp.lt.s32.totalorder %s7488_s6, %s7488_s6 }
 0x10d   :  { %p7495_p4 = por %p7494_p3, %p7493_p2 }
 0x10f   :  { %p7496_p5 = pnand %p7495_p4, %p7489_p1 }
 0x111   :  { %7499 = shalt.err (!%p7496_p5)
}
 0x112   :  { %188 = dma.hbm_to_vmem [thread:$0]  %s7797_s20, 64, %s183_s8, [#allocation15], %s7697_s12, %s7697_s12, %s7698_s7  }
 0x113   :  { %s7500_s19 = scalar_lea.hbm %s7807_s4, 64 }
 0x114   :  { %p7501_p6 = scmp.ne.s32.totalorder %s7807_s4, %s7500_s19  ;;  %p7504_p7 = scmp.lt.u32.totalorder %s7500_s19, %s7807_s4 }
 0x116   :  { %p7506_p8 = pnand %p7504_p7, %p7501_p6 }
 0x118   :  { %7509 = shalt.err (!%p7506_p8)
}
 0x119   :  { %s7510_s18 = scalar_lea.vmem %s208_s15, 64  ;;  %p7515_p10 = scmp.lt.s32.totalorder %s208_s15, %s208_s15 }
 0x11a   :  { %p7511_p9 = scmp.ne.s32.totalorder %s208_s15, %s7510_s18  ;;  %p7516_p11 = scmp.lt.s32.totalorder %s7510_s18, %s7510_s18 }
 0x11c   :  { %p7517_p12 = por %p7516_p11, %p7515_p10 }
 0x11e   :  { %p7518_p13 = pnand %p7517_p12, %p7511_p9 }
 0x120   :  { %7521 = shalt.err (!%p7518_p13)
}
 0x121   :  { %s8881_s25 = sld [smem:[#allocation51_spill]]  ;;  %s7705_s9 = smov [#allocation22]  }
 0x122   :  { %210 = dma.hbm_to_vmem [thread:$0]  %s7807_s4, 64, %s208_s15, [#allocation18]  }
 0x123   :  { %s228_s22 = sshll.u32 %s7705_s9, 4  ;;  %s7706_s20 = smov [#allocation25]   ;;  %s229_s22 = int_to_ptr.vmem [resolvable:$true] %s228_s22 }
 0x124   :  { %s252_s27 = sshll.u32 %s7706_s20, 4  ;;  %s7957_s27 = int_to_ptr.vmem [resolvable:$true] %s252_s27 }
 0x127   :  { %s7522_s5 = scalar_lea.hbm %s8881_s25, 8192 }
 0x128   :  { %p7523_p0 = scmp.ne.s32.totalorder %s8881_s25, %s7522_s5  ;;  %p7526_p1 = scmp.lt.u32.totalorder %s7522_s5, %s8881_s25 }
 0x12a   :  { %p7528_p2 = pnand %p7526_p1, %p7523_p0 }
 0x12c   :  { %7531 = shalt.err (!%p7528_p2)
}
 0x12d   :  { %s7532_s23 = scalar_lea.vmem %s229_s22, 8192  ;;  %p7537_p4 = scmp.lt.s32.totalorder %s229_s22, %s229_s22 }
 0x12e   :  { %p7533_p3 = scmp.ne.s32.totalorder %s229_s22, %s7532_s23  ;;  %p7538_p5 = scmp.lt.s32.totalorder %s7532_s23, %s7532_s23 }
 0x130   :  { %p7539_p6 = por %p7538_p5, %p7537_p4 }
 0x132   :  { %p7540_p7 = pnand %p7539_p6, %p7533_p3 }
 0x134   :  { %7543 = shalt.err (!%p7540_p7)
}
 0x135   :  { %s8882_s4 = sld [smem:[#allocation52_spill]] }
 0x136   :  { %234 = dma.hbm_to_vmem [thread:$0]  %s8881_s25, 8192, %s229_s22, [#allocation21], %s7686_s28, %s7686_s28, %s7687_s1  }
 0x13b   :  { %s7544_s3 = scalar_lea.hbm %s8882_s4, 64 }
 0x13c   :  { %p7545_p8 = scmp.ne.s32.totalorder %s8882_s4, %s7544_s3  ;;  %p7548_p9 = scmp.lt.u32.totalorder %s7544_s3, %s8882_s4 }
 0x13e   :  { %p7550_p10 = pnand %p7548_p9, %p7545_p8 }
 0x140   :  { %7553 = shalt.err (!%p7550_p10)
}
 0x141   :  { %s7554_s26 = scalar_lea.vmem %s7957_s27, 64  ;;  %p7559_p12 = scmp.lt.s32.totalorder %s7957_s27, %s7957_s27 }
 0x142   :  { %p7555_p11 = scmp.ne.s32.totalorder %s7957_s27, %s7554_s26  ;;  %p7560_p13 = scmp.lt.s32.totalorder %s7554_s26, %s7554_s26 }
 0x144   :  { %p7561_p0 = por %p7560_p13, %p7559_p12 }
 0x146   :  { %p7562_p1 = pnand %p7561_p0, %p7555_p11 }
 0x148   :  { %7565 = shalt.err (!%p7562_p1)
}
 0x149   :  { %s8883_s0 = sld [smem:[#allocation55_spill]]  ;;  %s7707_s2 = smov [#allocation28]  }
 0x14a   :  { %258 = dma.hbm_to_vmem [thread:$0]  %s8882_s4, 64, %s7957_s27, [#allocation24], %s7697_s12, %s7697_s12, %s7698_s7  }
 0x14b   :  { %s281_s29 = sshll.u32 %s7707_s2, 4  ;;  %s7708_s10 = smov [#allocation29]   ;;  %s282_s29 = int_to_ptr.vmem [resolvable:$true] %s281_s29 }
 0x14c   :  { %s294_s14 = sshll.u32 %s7708_s10, 4  ;;  %s7978_s14 = int_to_ptr.vmem [resolvable:$true] %s294_s14 }
 0x14f   :  { %s7566_s13 = scalar_lea.hbm %s8883_s0, 16 }
 0x150   :  { %p7567_p2 = scmp.ne.s32.totalorder %s8883_s0, %s7566_s13  ;;  %p7570_p3 = scmp.lt.u32.totalorder %s7566_s13, %s8883_s0 }
 0x152   :  { %p7572_p4 = pnand %p7570_p3, %p7567_p2 }
 0x154   :  { %7575 = shalt.err (!%p7572_p4)
}
 0x155   :  { %s7576_s8 = scalar_lea.vmem %s282_s29, 16  ;;  %s7580_s11 = scalar_lea.vmem %s282_s29, 32 }
 0x156   :  { %p7577_p5 = scmp.ne.s32.totalorder %s282_s29, %s7576_s8  ;;  %p7581_p6 = scmp.lt.s32.totalorder %s282_s29, %s282_s29 }
 0x157   :  { %p7582_p7 = scmp.lt.s32.totalorder %s7580_s11, %s7576_s8 }
 0x159   :  { %p7583_p8 = por %p7582_p7, %p7581_p6 }
 0x15b   :  { %p7584_p9 = pnand %p7583_p8, %p7577_p5 }
 0x15d   :  { %7587 = shalt.err (!%p7584_p9)
}
 0x15e   :  { %284 = dma.hbm_to_vmem [thread:$0]  %s8883_s0, 16, %s282_s29, [#allocation27]  }
 0x15f   :  { %s7588_s12 = scalar_lea.hbm %s7867_s17, 512 }
 0x160   :  { %p7589_p10 = scmp.ne.s32.totalorder %s7867_s17, %s7588_s12  ;;  %p7592_p11 = scmp.lt.u32.totalorder %s7588_s12, %s7867_s17 }
 0x162   :  { %p7594_p12 = pnand %p7592_p11, %p7589_p10 }
 0x164   :  { %7597 = shalt.err (!%p7594_p12)
}
 0x165   :  { %s7598_s7 = scalar_lea.vmem %s7978_s14, 512  ;;  %p7603_p0 = scmp.lt.s32.totalorder %s7978_s14, %s7978_s14 }
 0x166   :  { %p7599_p13 = scmp.ne.s32.totalorder %s7978_s14, %s7598_s7  ;;  %p7604_p1 = scmp.lt.s32.totalorder %s7598_s7, %s7598_s7 }
 0x168   :  { %p7605_p2 = por %p7604_p1, %p7603_p0 }
 0x16a   :  { %p7606_p3 = pnand %p7605_p2, %p7599_p13 }
 0x16c   :  { %7609 = shalt.err (!%p7606_p3)
}
 0x16d   :  { %300 = dma.hbm_to_vmem [thread:$0]  %s7867_s17, 512, %s7978_s14, [#allocation30], %s7686_s28, %s7686_s28, %s7687_s1  }
 0x16e   :  { %7632 = dma.done.wait [#allocation3], 128  }
 0x16f   :  { %7633 = vsyncadd [#allocation3], 4294967168 }
 0x170   :  { %7634 = dma.done.wait [#allocation6], 1040  }
 0x171   :  { %7635 = vsyncadd [#allocation6], 4294966256 }
 0x172   :  { %7636 = dma.done.wait [#allocation9], 32  }
 0x173   :  { %7637 = vsyncadd [#allocation9], 4294967264 }
 0x174   :  { %7638 = dma.done.wait [#allocation12], 32  }
 0x175   :  { %7639 = vsyncadd [#allocation12], 4294967264 }
 0x176   :  { %7640 = dma.done.wait [#allocation15], 576  }
 0x177   :  { %7641 = vsyncadd [#allocation15], 4294966720 }
 0x178   :  { %7642 = dma.done.wait [#allocation18], 1088  }
 0x179   :  { %7643 = vsyncadd [#allocation18], 4294966208 }
 0x17a   :  { %7644 = dma.done.wait [#allocation21], 8256  }
 0x17b   :  { %7645 = vsyncadd [#allocation21], 4294959040 }
 0x17c   :  { %7646 = dma.done.wait [#allocation24], 128  }
 0x17d   :  { %7647 = vsyncadd [#allocation24], 4294967168 }
 0x17e   :  { %7648 = dma.done.wait [#allocation27], 80  }
 0x17f   :  { %7649 = vsyncadd [#allocation27], 4294967216 }
 0x180   :  { %7650 = dma.done.wait [#allocation30], 512  }
 0x181   :  { %7651 = vsyncadd [#allocation30], 4294966784  ;;  %s8884_s17 = sld [smem:[#allocation44_spill]]  ;;  %v7709_v0 = vmov 0.0|0.0   ;;  %vm7710_vm0 = vmmov 0   ;;  %v7711_v1 = vmov 0.0  }
 0x182   :  { %6314 = vmatprep.subr.bf16.mxu0 %v7709_v0  ;;  %6327 = vmatprep.subr.bf16.mxu1 %v7709_v0  ;;  %v374_v2 = vld [vmem:[#allocation5] sm:$0xff]  ;;  %v375_v3 = vld [vmem:[#allocation5 + $0x8] sm:$0xff]  ;;  %v376_v7 = vld [vmem:[#allocation5 + $0x10] sm:$0xff]  ;;  %s8885_s28 = sld [smem:[#allocation47_spill]]  ;;  %vm393_vm1 = vcmask 1043456   ;;  %vm7712_vm2 = vmmov 1  }
 0x183   :  { %5183 = vmatprep.mubr.msk.f32.mxu0 %vm7710_vm0, %v7711_v1  ;;  %5202 = vmatprep.mubr.msk.f32.mxu1 %vm7710_vm0, %v7711_v1  ;;  %v6315_v5 = vpack.c.bf16 %v375_v3, %v374_v2  ;;  %v377_v8 = vld [vmem:[#allocation5 + $0x18] sm:$0xff]  ;;  %v378_v14 = vld [vmem:[#allocation5 + $0x20] sm:$0xff]  ;;  %v379_v15 = vld [vmem:[#allocation5 + $0x28] sm:$0xff]  ;;  %vm389_vm4 = vcmask 490496   ;;  %s8888_s1 = sld [smem:[#allocation46_spill]]  ;;  %s8889_s15 = sld [smem:[#allocation43_spill]] }
 0x184   :  { %v6318_v12 = vpack.c.bf16 %v377_v8, %v376_v7  ;;  %v6321_v18 = vpack.c.bf16 %v379_v15, %v378_v14  ;;  %v380_v20 = vld [vmem:[#allocation5 + $0x30] sm:$0xff]  ;;  %v381_v21 = vld [vmem:[#allocation5 + $0x38] sm:$0xf]  ;;  %vm8015_vm3 = vmpackc.low %vm393_vm1, %vm7712_vm2  ;;  %s8890_s16 = sld [smem:[#allocation45_spill]]  ;;  %s8891_s6 = sld [smem:[#allocation50_spill]]  ;;  %vm804_vm5 = vcmask 130048  }
 0x185   :  { %6316 = vmatpush3.bf16.msra.mxu0 %v6315_v5  ;;  %v6324_v24 = vpack.c.bf16 %v381_v21, %v380_v20  ;;  %v8024_v29 = vld [vmem:[#allocation2] sm:$0xff]  ;;  %v837_v21 = vld [vmem:[#allocation17] sm:$0xff]  ;;  %v840_v25 = vld [vmem:[#allocation17 + $0x18] sm:$0xff]  ;;  %s8892_s19 = sld [smem:[#allocation49_spill]]  ;;  %s8893_s18 = sld [smem:[#allocation48_spill]]  ;;  %vm1737_vm6 = vcmask 261120  }
 0x186   :  { %6317 = vmatprep.subr.bf16.mxu0 %v7709_v0  ;;  %s8894_s25 = sld [smem:[#allocation54_spill]]  ;;  %s8895_s9 = sld [smem:[#allocation53_spill]] }
 0x187   :  { %v467_v4 = vld [vmem:[%s8884_s17] sm:$0xff]  ;;  %v468_v6 = vld [vmem:[%s8884_s17 + $0x8] sm:$0xff]  ;;  %v469_v10 = vld [vmem:[%s8884_s17 + $0x10] sm:$0xff]  ;;  %s8896_s22 = sld [smem:[#allocation56_spill]]  ;;  %s7713_s20 = smov [#allocation31]  }
 0x188   :  { %v6328_v9 = vpack.c.bf16 %v468_v6, %v467_v4  ;;  %v470_v11 = vld [vmem:[%s8884_s17 + $0x18] sm:$0xff]  ;;  %v471_v16 = vld [vmem:[%s8884_s17 + $0x20] sm:$0xff]  ;;  %v472_v17 = vld [vmem:[%s8884_s17 + $0x28] sm:$0xff]  ;;  %s4467_s27 = sshll.u32 %s7713_s20, 4  ;;  %s4468_s27 = int_to_ptr.vmem [resolvable:$true] %s4467_s27 }
 0x189   :  { %v6331_v13 = vpack.c.bf16 %v470_v11, %v469_v10  ;;  %6319 = vmatpush3.bf16.msra.mxu0 %v6318_v12  ;;  %v6334_v19 = vpack.c.bf16 %v472_v17, %v471_v16  ;;  %v473_v22 = vld [vmem:[%s8884_s17 + $0x30] sm:$0xff]  ;;  %v474_v23 = vld [vmem:[%s8884_s17 + $0x38] sm:$0xf]  ;;  %v358_v27 = vld [vmem:[%s8885_s28] sm:$0xff]  ;;  %s7610_s5 = scalar_lea.vmem %s4468_s27, 128  ;;  %p7615_p5 = scmp.lt.s32.totalorder %s4468_s27, %s4468_s27 }
 0x18a   :  { %6329 = vmatpush3.bf16.msra.mxu1 %v6328_v9  ;;  %6320 = vmatprep.subr.bf16.mxu0 %v7709_v0  ;;  %v6337_v26 = vpack.c.bf16 %v474_v23, %v473_v22  ;;  %v359_v28 = vld [vmem:[%s8885_s28 + $0x8] sm:$0xff]  ;;  %v360_v31 = vld [vmem:[%s8885_s28 + $0x10] sm:$0xff]  ;;  %v361_v32 = vld [vmem:[%s8885_s28 + $0x18] sm:$0xff]  ;;  %p7611_p4 = scmp.ne.s32.totalorder %s4468_s27, %s7610_s5  ;;  %p7616_p6 = scmp.lt.s32.totalorder %s7610_s5, %s7610_s5 }
 0x18b   :  { %6330 = vmatprep.subr.bf16.mxu1 %v7709_v0  ;;  %v8028_v30 = vpack.c.bf16 %v359_v28, %v358_v27  ;;  %v8041_v33 = vpack.c.bf16 %v361_v32, %v360_v31  ;;  %v362_v34 = vld [vmem:[%s8885_s28 + $0x20] sm:$0xff]  ;;  %v363_v35 = vld [vmem:[%s8885_s28 + $0x28] sm:$0xff]  ;;  %v364_v37 = vld [vmem:[%s8885_s28 + $0x30] sm:$0xff] }
 0x18c   :  { %v8049_v36 = vpack.c.bf16 %v363_v35, %v362_v34  ;;  %v365_v38 = vld [vmem:[%s8885_s28 + $0x38] sm:$0xff]  ;;  %v366_v40 = vld [vmem:[%s8885_s28 + $0x40] sm:$0xff]  ;;  %v367_v41 = vld [vmem:[%s8885_s28 + $0x48] sm:$0xff]  ;;  %p7617_p7 = por %p7616_p6, %p7615_p5 }
 0x18d   :  { %6322 = vmatpush3.bf16.msra.mxu0 %v6321_v18  ;;  %v8055_v39 = vpack.c.bf16 %v365_v38, %v364_v37  ;;  %v8061_v42 = vpack.c.bf16 %v367_v41, %v366_v40  ;;  %v368_v43 = vld [vmem:[%s8885_s28 + $0x50] sm:$0xff]  ;;  %v369_v44 = vld [vmem:[%s8885_s28 + $0x58] sm:$0xff]  ;;  %v370_v46 = vld [vmem:[%s8885_s28 + $0x60] sm:$0xff] }
 0x18e   :  { %6332 = vmatpush3.bf16.msra.mxu1 %v6331_v13  ;;  %6323 = vmatprep.subr.bf16.mxu0 %v7709_v0  ;;  %v8067_v45 = vpack.c.bf16 %v369_v44, %v368_v43  ;;  %v371_v47 = vld [vmem:[%s8885_s28 + $0x68] sm:$0xff]  ;;  %v372_v49 = vld [vmem:[%s8885_s28 + $0x70] sm:$0xff]  ;;  %v373_v50 = vld [vmem:[%s8885_s28 + $0x78] sm:$0xff]  ;;  %p7618_p8 = pnand %p7617_p7, %p7611_p4 }
 0x18f   :  { %6333 = vmatprep.subr.bf16.mxu1 %v7709_v0  ;;  %v8073_v48 = vpack.c.bf16 %v371_v47, %v370_v46  ;;  %v8080_v51 = vpack.c.bf16 %v373_v50, %v372_v49  ;;  %v555_v52 = vld [vmem:[%s8888_s1] sm:$0xff]  ;;  %v556_v53 = vld [vmem:[%s8888_s1 + $0x8] sm:$0xff]  ;;  %v557_v54 = vld [vmem:[%s8888_s1 + $0x10] sm:$0xff] }
 0x190   :  { %v6341_v55 = vpack.c.bf16 %v556_v53, %v555_v52  ;;  %v558_v56 = vld [vmem:[%s8888_s1 + $0x18] sm:$0xff]  ;;  %v559_v58 = vld [vmem:[%s8888_s1 + $0x20] sm:$0xff]  ;;  %v560_v59 = vld [vmem:[%s8888_s1 + $0x28] sm:$0xff] }
 0x191   :  { %6326 = vmatpush3.bf16.msk.msra.mxu0 %vm8015_vm3, %v6324_v24  ;;  %v6344_v57 = vpack.c.bf16 %v558_v56, %v557_v54  ;;  %v6347_v60 = vpack.c.bf16 %v560_v59, %v559_v58  ;;  %v561_v61 = vld [vmem:[%s8888_s1 + $0x30] sm:$0xff]  ;;  %v562_v62 = vld [vmem:[%s8888_s1 + $0x38] sm:$0xf]  ;;  %v4516_v2 = vld [vmem:[%s8889_s15] ss:$0 sm:$0xff] }
 0x192   :  { %6335 = vmatpush3.bf16.msra.mxu1 %v6334_v19  ;;  %6340 = vmatprep.subr.bf16.mxu0 %v7709_v0  ;;  %v6350_v63 = vpack.c.bf16 %v562_v62, %v561_v61  ;;  %v4519_v3 = vld [vmem:[%s8890_s16] ss:$0 sm:$0xff]  ;;  %v847_v18 = vld [vmem:[%s8891_s6 + $0x8] sm:$0xff]  ;;  %v841_v22 = vld [vmem:[#allocation17 + $0x20] sm:$0xff] }
 0x193   :  { %6336 = vmatprep.subr.bf16.mxu1 %v7709_v0  ;;  %v838_v16 = vld [vmem:[#allocation17 + $0x8] sm:$0xff]  ;;  %v851_v20 = vld [vmem:[%s8891_s6 + $0x28] sm:$0xff]  ;;  %v6403_v24 = vpack.c.bf16 %v841_v22, %v837_v21  ;;  %v4528_v50 = vld [vmem:[#allocation13] ss:$0 sm:$0xff] }
 0x194   :  { %5184 = vmatmul.mubr.msk.f32.vlgmr.msra.gmra.mrb[0].mxu0 %vm389_vm4, %v8024_v29  ;;  %v842_v17 = vld [vmem:[#allocation17 + $0x28] sm:$0xff]  ;;  %v6417_v23 = vpack.c.bf16 %v851_v20, %v847_v18  ;;  %v4527_v47 = vld [vmem:[#allocation11] ss:$0 sm:$0xff]  ;;  %v839_v53 = vld [vmem:[#allocation17 + $0x10] sm:$0xff] }
 0x195   :  { %5221 = vmatprep.mubr.msk.f32.mxu0 %vm7710_vm0, %v7711_v1  ;;  %6342 = vmatpush3.bf16.msra.mxu0 %v6341_v55  ;;  %v6401_v19 = vpack.c.bf16 %v842_v17, %v838_v16  ;;  %v846_v31 = vld [vmem:[%s8891_s6] sm:$0xff]  ;;  %v1492_v61 = vld [vmem:[%s8892_s19 + $0x8] sm:$0xff]  ;;  %v849_v62 = vld [vmem:[%s8891_s6 + $0x18] sm:$0xff] }
 0x196   :  { %6339 = vmatpush3.bf16.msk.msra.mxu1 %vm8015_vm3, %v6337_v26  ;;  %6343 = vmatprep.subr.bf16.mxu0 %v7709_v0  ;;  %v844_v26 = vld [vmem:[#allocation17 + $0x38] sm:$0xff]  ;;  %v850_v32 = vld [vmem:[%s8891_s6 + $0x20] sm:$0xff]  ;;  %v1502_v21 = vld [vmem:[%s8892_s19 + $0x58] sm:$0xff] }
 0x197   :  { %6353 = vmatprep.subr.bf16.mxu1 %v7709_v0  ;;  %v6405_v27 = vpack.c.bf16 %v844_v26, %v840_v25  ;;  %v6419_v38 = vpack.c.bf16 %v850_v32, %v846_v31  ;;  %v843_v54 = vld [vmem:[#allocation17 + $0x30] sm:$0xff]  ;;  %v1501_v20 = vld [vmem:[%s8892_s19 + $0x50] sm:$0xff]  ;;  %v8180_v32 = vld [vmem:[#allocation20] sm:$0xf] }
 0x198   :  { %v6407_v56 = vpack.c.bf16 %v843_v54, %v839_v53  ;;  %v1499_v17 = vld [vmem:[%s8892_s19 + $0x40] sm:$0xff]  ;;  %v1500_v18 = vld [vmem:[%s8892_s19 + $0x48] sm:$0xff]  ;;  %v6449_v22 = vpack.c.bf16 %v1502_v21, %v1501_v20  ;;  %v1505_v26 = vld [vmem:[%s8892_s19 + $0x70] sm:$0xff] }
 0x199   :  { %5203 = vmatmul.mubr.msk.f32.vlgmr.msra.gmra.mrb[0].mxu1 %vm389_vm4, %v8024_v29  ;;  %6345 = vmatpush3.bf16.msra.mxu0 %v6344_v57  ;;  %v4522_v57 = vld [vmem:[#allocation7] ss:$0 sm:$0xff]  ;;  %v1475_v53 = vld [vmem:[%s8893_s18 + $0x20] sm:$0xff] }
 0x19a   :  { %6355 = vmatpush3.bf16.msra.mxu1 %v8028_v30  ;;  %5256 = vmatprep.mubr.msk.f32.mxu1 %vm7710_vm0, %v7711_v1  ;;  %v1476_v54 = vld [vmem:[%s8893_s18 + $0x28] sm:$0xff] }
 0x19b   :  { %6356 = vmatprep.subr.bf16.mxu1 %v7709_v0  ;;  %6346 = vmatprep.subr.bf16.mxu0 %v7709_v0 }
 0x19d   :  { %6348 = vmatpush3.bf16.msra.mxu0 %v6347_v60  ;;  %v1491_v60 = vld [vmem:[%s8892_s19] sm:$0xff] }
 0x19e   :  { %6358 = vmatpush3.bf16.msra.mxu1 %v8041_v33  ;;  %6349 = vmatprep.subr.bf16.mxu0 %v7709_v0 }
 0x19f   :  { %6359 = vmatprep.subr.bf16.mxu1 %v7709_v0 }
 0x1a1   :  { %6352 = vmatpush3.bf16.msk.msra.mxu0 %vm8015_vm3, %v6350_v63  ;;  %v853_v63 = vld [vmem:[%s8891_s6 + $0x38] sm:$0xff] }
 0x1a2   :  { %6361 = vmatpush3.bf16.msra.mxu1 %v8049_v36  ;;  %6377 = vmatprep.subr.bf16.mxu0 %v7709_v0 }
 0x1a3   :  { %6362 = vmatprep.subr.bf16.mxu1 %v7709_v0 }
 0x1a4   :  { %5222 = vmatmul.mubr.msk.f32.vlgmr.msra.gmra.mrb[2].mxu0 %vm389_vm4, %v8024_v29 }
 0x1a5   :  { %6379 = vmatpush3.bf16.msra.mxu0 %v8028_v30  ;;  %5291 = vmatprep.mubr.msk.f32.mxu0 %vm7710_vm0, %v7711_v1 }
 0x1a6   :  { %6364 = vmatpush3.bf16.msra.mxu1 %v8055_v39  ;;  %6380 = vmatprep.subr.bf16.mxu0 %v7709_v0 }
 0x1a7   :  { %6365 = vmatprep.subr.bf16.mxu1 %v7709_v0 }
 0x1a9   :  { %6382 = vmatpush3.bf16.msra.mxu0 %v8041_v33 }
 0x1aa   :  { %6367 = vmatpush3.bf16.msra.mxu1 %v8061_v42  ;;  %6383 = vmatprep.subr.bf16.mxu0 %v7709_v0 }
 0x1ab   :  { %6368 = vmatprep.subr.bf16.mxu1 %v7709_v0 }
 0x1ad   :  { %6385 = vmatpush3.bf16.msra.mxu0 %v8049_v36 }
 0x1ae   :  { %6370 = vmatpush3.bf16.msra.mxu1 %v8067_v45  ;;  %6386 = vmatprep.subr.bf16.mxu0 %v7709_v0 }
 0x1af   :  { %6371 = vmatprep.subr.bf16.mxu1 %v7709_v0 }
 0x1b1   :  { %6388 = vmatpush3.bf16.msra.mxu0 %v8055_v39 }
 0x1b2   :  { %6373 = vmatpush3.bf16.msra.mxu1 %v8073_v48  ;;  %6389 = vmatprep.subr.bf16.mxu0 %v7709_v0 }
 0x1b3   :  { %6374 = vmatprep.subr.bf16.mxu1 %v7709_v0 }
 0x1b5   :  { %6391 = vmatpush3.bf16.msra.mxu0 %v8061_v42 }
 0x1b6   :  { %6376 = vmatpush3.bf16.msra.mxu1 %v8080_v51  ;;  %6392 = vmatprep.subr.bf16.mxu0 %v7709_v0 }
 0x1b7   :  { %6402 = vmatprep.subr.bf16.mxu1 %v6401_v19 }
 0x1b9   :  { %6394 = vmatpush3.bf16.msra.mxu0 %v8067_v45 }
 0x1ba   :  { %6395 = vmatprep.subr.bf16.mxu0 %v7709_v0 }
 0x1bd   :  { %6397 = vmatpush3.bf16.msra.mxu0 %v8073_v48 }
 0x1be   :  { %6398 = vmatprep.subr.bf16.mxu0 %v7709_v0 }
 0x1c1   :  { %6400 = vmatpush3.bf16.msra.mxu0 %v8080_v51 }
 0x1c2   :  { %6418 = vmatprep.subr.bf16.mxu0 %v6417_v23 }
 0x267   :  { %v463_v4 = vpop.f32.mrb[0].mxu0 }
 0x268   :  { %v464_v5 = vadd.f32 %v4516_v2, %v463_v4  ;;  %v5185_v7 = vpop.f32.mrb[1].mxu0  ;;  %v6434_v2 = vpack.c.bf16 %v1492_v61, %v1491_v60  ;;  %v1493_v4 = vld [vmem:[%s8892_s19 + $0x10] sm:$0xff]  ;;  %v1478_v60 = vld [vmem:[%s8893_s18 + $0x38] sm:$0xff] }
 0x269   :  { %v848_v7 = vld [vmem:[%s8891_s6 + $0x10] sm:$0xff] }
 0x26a   :  { %5257 = vmatmul.mubr.f32.vlgmr.msra.gmra.mrb[2].mxu1 %v464_v5 }
 0x26b   :  { %943 = vmatprep.mubr.f32.mxu1 %v7711_v1  ;;  %6404 = vmatpush1.bf16.msra.mxu1 %v6403_v24 }
 0x26c   :  { %v551_v6 = vpop.f32.mrb[0].mxu1  ;;  %6406 = vmatprep.subr.bf16.mxu1 %v6405_v27 }
 0x26d   :  { %v552_v8 = vadd.f32 %v4519_v3, %v551_v6  ;;  %v5204_v9 = vpop.f32.mrb[1].mxu1  ;;  %v6421_v6 = vpack.c.bf16 %v853_v63, %v849_v62  ;;  %v1479_v62 = vld [vmem:[%s8893_s18 + $0x40] sm:$0xff]  ;;  %v1480_v63 = vld [vmem:[%s8893_s18 + $0x48] sm:$0xff] }
 0x26f   :  { %v805_v10 = vsel %vm804_vm5, %v552_v8, 0.0 }
 0x270   :  { %806 = vadd.xlane.f32.xlu0 %v805_v10  ;;  %v1495_v10 = vld [vmem:[%s8892_s19 + $0x20] sm:$0xff] }
 0x277   :  { %v639_v28 = vpop.f32.mrb[2].mxu0 }
 0x278   :  { %v5223_v29 = vpop.f32.mrb[3].mxu0  ;;  %v640_v59 = vadd.f32 %v4522_v57, %v639_v28 }
 0x279   :  { %v856_v29 = vlaneseq }
 0x27a   :  { %v836_v3 = vmax.f32 %v640_v59, 0.0  ;;  %v1477_v59 = vld [vmem:[%s8893_s18 + $0x30] sm:$0xff] }
 0x27b   :  { %v8178_v31 = vshrl.u32 %v856_v29, 7  ;;  %v8219_v61 = vpack.c.bf16 %v1478_v60, %v1477_v59  ;;  %v8305_v60 = vld [vmem:[#allocation19] sm:$0xf] }
 0x27d   :  { %v858_v59 = vsub.s32 0, %v8178_v31 }
 0x2fd   :  { %v807_v11 = vpop.xlane.xlu0 %806 }
 0x2fe   :  { %v809_v12 = vmul.f32 0.0625, %v807_v11  ;;  %v1496_v11 = vld [vmem:[%s8892_s19 + $0x28] sm:$0xff] }
 0x300   :  { %v810_v13 = vsub.f32 %v552_v8, %v809_v12  ;;  %v852_v8 = vld [vmem:[%s8891_s6 + $0x30] sm:$0xff] }
 0x301   :  { %v6423_v12 = vpack.c.bf16 %v852_v8, %v848_v7 }
 0x302   :  { %v811_v14 = vmul.f32 %v810_v13, %v810_v13 }
 0x304   :  { %v812_v15 = vsel %vm804_vm5, %v811_v14, 0.0  ;;  %v1497_v14 = vld [vmem:[%s8892_s19 + $0x30] sm:$0xff] }
 0x305   :  { %813 = vadd.xlane.f32.xlu0 %v812_v15  ;;  %v1498_v15 = vld [vmem:[%s8892_s19 + $0x38] sm:$0xff] }
 0x306   :  { %v6443_v16 = vpack.c.bf16 %v1498_v15, %v1497_v14 }
 0x33d   :  { %v711_v34 = vpop.f32.mrb[2].mxu1 }
 0x33e   :  { %v8125_v35 = vsub.f32 %v464_v5, %v711_v34  ;;  %v5258_v37 = vpop.f32.mrb[3].mxu1  ;;  %v1494_v5 = vld [vmem:[%s8892_s19 + $0x18] sm:$0xff]  ;;  %v862_v34 = vsub.s32 1, %v8178_v31 }
 0x33f   :  { %v6437_v9 = vpack.c.bf16 %v1494_v5, %v1493_v4  ;;  %v1482_v4 = vld [vmem:[%s8893_s18 + $0x58] sm:$0xff] }
 0x340   :  { %v716_v40 = vmul.f32 %v8125_v35, %v8125_v35  ;;  %v8186_v37 = vrot.slane %v8180_v32, %v862_v34 }
 0x342   :  { %5292 = vmatmul.mubr.f32.vlgmr.msra.gmra.mrb[4].mxu0 %v716_v40  ;;  %v870_v40 = vsub.s32 3, %v8178_v31 }
 0x343   :  { %6420 = vmatpush1.bf16.msra.mxu0 %v6419_v38  ;;  %1251 = vmatprep.mubr.f32.mxu0 %v7711_v1 }
 0x344   :  { %6426 = vmatprep.subr.bf16.mxu0 %v6417_v23  ;;  %v1503_v23 = vld [vmem:[%s8892_s19 + $0x60] sm:$0xff] }
 0x392   :  { %v814_v41 = vpop.xlane.xlu0 %813 }
 0x393   :  { %v815_v43 = vmul.f32 0.0625, %v814_v41 }
 0x395   :  { %v816_v44 = vadd.f32 1e-05, %v815_v43  ;;  %v8198_v43 = vrot.slane %v8180_v32, %v870_v40 }
 0x397   :  { %7177 = vrsqrt.f32 %v816_v44  ;;  %v1471_v44 = vld [vmem:[%s8893_s18] sm:$0xff] }
 0x3a1   :  { %v7178_v46 = vpop.eup %7177 }
 0x3a2   :  { %v818_v49 = vmul.f32 %v7178_v46, %v810_v13  ;;  %v6440_v13 = vpack.c.bf16 %v1496_v11, %v1495_v10  ;;  %v1472_v46 = vld [vmem:[%s8893_s18 + $0x8] sm:$0xff] }
 0x3a3   :  { %v1484_v10 = vld [vmem:[%s8893_s18 + $0x68] sm:$0xff] }
 0x3a4   :  { %v826_v52 = vmul.f32 %v4527_v47, %v818_v49  ;;  %v1473_v47 = vld [vmem:[%s8893_s18 + $0x10] sm:$0xff]  ;;  %v8203_v49 = vpack.c.bf16 %v1472_v46, %v1471_v44  ;;  %v4526_v11 = vld [vmem:[#allocation10] ss:$0 sm:$0xff] }
 0x3a6   :  { %v834_v55 = vadd.f32 %v4528_v50, %v826_v52  ;;  %v1474_v50 = vld [vmem:[%s8893_s18 + $0x18] sm:$0xff] }
 0x3a7   :  { %v8207_v52 = vpack.c.bf16 %v1474_v50, %v1473_v47 }
 0x3a8   :  { %v835_v58 = vmax.f32 %v834_v55, 0.0 }
 0x3aa   :  { %4529 = vmatmul.mubr.msk.f32.vlgmr.msra.gmra.mrb[4].mxu1 %vm804_vm5, %v835_v58  ;;  %4533 = vmatmul.mubr.msk.f32.vlgmr.msra.gmra.mrb[6].mxu0 %vm804_vm5, %v835_v58 }
 0x3ab   :  { %6408 = vmatpush1.bf16.msra.mxu1 %v6407_v56  ;;  %1014 = vmatprep.mubr.f32.mxu1 %v7711_v1 }
 0x3ac   :  { %6410 = vmatprep.subr.bf16.mxu1 %v6401_v19  ;;  %6428 = vmatpush1.bf16.msra.mxu0 %v6419_v38  ;;  %v6446_v19 = vpack.c.bf16 %v1500_v18, %v1499_v17  ;;  %v866_v38 = vsub.s32 2, %v8178_v31 }
 0x3ad   :  { %1393 = vmatprep.mubr.f32.mxu0 %v7711_v1  ;;  %6433 = vmatprep.subr.bf16.mxu0 %v7709_v0 }
 0x3ae   :  { %4530 = vmatmul.mubr.msk.f32.vlgmr.msra.gmra.mrb[6].mxu1 %vm804_vm5, %v835_v58  ;;  %v8193_v41 = vrot.slane %v8180_v32, %v866_v38 }
 0x3af   :  { %6412 = vmatpush1.bf16.msra.mxu1 %v6403_v24  ;;  %1088 = vmatprep.mubr.f32.mxu1 %v7711_v1  ;;  %v1504_v24 = vld [vmem:[%s8892_s19 + $0x68] sm:$0xff] }
 0x3b0   :  { %6414 = vmatprep.subr.bf16.mxu1 %v6405_v27  ;;  %4535 = vmatmul.mubr.msk.f32.vlgmr.msra.gmra.mrb[8].mxu0 %vm804_vm5, %v836_v3  ;;  %v6452_v25 = vpack.c.bf16 %v1504_v24, %v1503_v23  ;;  %v1506_v27 = vld [vmem:[%s8892_s19 + $0x78] sm:$0xff] }
 0x3b1   :  { %6435 = vmatpush3.bf16.msra.mxu0 %v6434_v2  ;;  %5326 = vmatprep.mubr.msk.f32.mxu0 %vm7710_vm0, %v7711_v1  ;;  %v6455_v28 = vpack.c.bf16 %v1506_v27, %v1505_v26  ;;  %v8225_v2 = vpack.c.bf16 %v1480_v63, %v1479_v62  ;;  %v1486_v23 = vld [vmem:[%s8893_s18 + $0x78] sm:$0xff]  ;;  %v859_v62 = vrot.slane %v8305_v60, %v858_v59  ;;  %v4537_v63 = vld [vmem:[#allocation16] ss:$0 sm:$0xff] }
 0x3b2   :  { %4531 = vmatmul.mubr.msk.f32.vlgmr.msra.gmra.mrb[8].mxu1 %vm804_vm5, %v836_v3  ;;  %6436 = vmatprep.subr.bf16.mxu0 %v7709_v0 }
 0x3b3   :  { %6416 = vmatpush1.bf16.msra.mxu1 %v6407_v56  ;;  %1159 = vmatprep.mubr.f32.mxu1 %v7711_v1 }
 0x3b4   :  { %6422 = vmatprep.subr.bf16.mxu1 %v6421_v6 }
 0x3b5   :  { %6438 = vmatpush3.bf16.msra.mxu0 %v6437_v9  ;;  %v1483_v9 = vld [vmem:[%s8893_s18 + $0x60] sm:$0xff] }
 0x3b6   :  { %4532 = vmatmul.mubr.msk.f32.vlgmr.msra.gmra.mrb[10].mxu1 %vm804_vm5, %v836_v3  ;;  %6439 = vmatprep.subr.bf16.mxu0 %v7709_v0 }
 0x3b7   :  { %6424 = vmatpush1.bf16.msra.mxu1 %v6423_v12  ;;  %1322 = vmatprep.mubr.f32.mxu1 %v7711_v1 }
 0x3b8   :  { %6430 = vmatprep.subr.bf16.mxu1 %v6421_v6  ;;  %v4525_v6 = vld [vmem:[#allocation8] ss:$0 sm:$0xff] }
 0x3b9   :  { %6441 = vmatpush3.bf16.msra.mxu0 %v6440_v13  ;;  %v8238_v13 = vpack.c.bf16 %v1484_v10, %v1483_v9  ;;  %v1488_v10 = vld [vmem:[#allocation14 + $0x8] sm:$0xff] }
 0x3ba   :  { %4534 = vmatmul.mubr.msk.f32.vlgmr.msra.gmra.mrb[12].mxu1 %vm804_vm5, %v835_v58  ;;  %6442 = vmatprep.subr.bf16.mxu0 %v7709_v0  ;;  %v8213_v58 = vpack.c.bf16 %v1476_v54, %v1475_v53 }
 0x3bb   :  { %6432 = vmatpush1.bf16.msra.mxu1 %v6423_v12  ;;  %1464 = vmatprep.mubr.f32.mxu1 %v7711_v1 }
 0x3bc   :  { %6457 = vmatprep.subr.bf16.mxu1 %v7709_v0 }
 0x3bd   :  { %6444 = vmatpush3.bf16.msra.mxu0 %v6443_v16 }
 0x3be   :  { %4536 = vmatmul.mubr.msk.f32.vlgmr.msra.gmra.mrb[14].mxu1 %vm804_vm5, %v836_v3  ;;  %6445 = vmatprep.subr.bf16.mxu0 %v7709_v0  ;;  %v1481_v3 = vld [vmem:[%s8893_s18 + $0x50] sm:$0xff] }
 0x3bf   :  { %5361 = vmatprep.mubr.msk.f32.mxu1 %vm7710_vm0, %v7711_v1  ;;  %6459 = vmatpush3.bf16.msra.mxu1 %v8203_v49  ;;  %v8231_v7 = vpack.c.bf16 %v1482_v4, %v1481_v3 }
 0x3c0   :  { %6460 = vmatprep.subr.bf16.mxu1 %v7709_v0 }
 0x3c1   :  { %6447 = vmatpush3.bf16.msra.mxu0 %v6446_v19 }
 0x3c2   :  { %6448 = vmatprep.subr.bf16.mxu0 %v7709_v0 }
 0x3c3   :  { %6462 = vmatpush3.bf16.msra.mxu1 %v8207_v52 }
 0x3c4   :  { %6463 = vmatprep.subr.bf16.mxu1 %v7709_v0 }
 0x3c5   :  { %6450 = vmatpush3.bf16.msra.mxu0 %v6449_v22  ;;  %v1485_v22 = vld [vmem:[%s8893_s18 + $0x70] sm:$0xff] }
 0x3c6   :  { %6451 = vmatprep.subr.bf16.mxu0 %v7709_v0 }
 0x3c7   :  { %6465 = vmatpush3.bf16.msra.mxu1 %v8213_v58 }
 0x3c8   :  { %6466 = vmatprep.subr.bf16.mxu1 %v7709_v0 }
 0x3c9   :  { %6453 = vmatpush3.bf16.msra.mxu0 %v6452_v25  ;;  %v8277_v25 = vpack.c.bf16 %v1486_v23, %v1485_v22 }
 0x3ca   :  { %6454 = vmatprep.subr.bf16.mxu0 %v7709_v0 }
 0x3cb   :  { %6468 = vmatpush3.bf16.msra.mxu1 %v8219_v61 }
 0x3cc   :  { %6469 = vmatprep.subr.bf16.mxu1 %v7709_v0 }
 0x3cd   :  { %6456 = vmatpush3.bf16.msra.mxu0 %v6455_v28 }
 0x3ce   :  { %6481 = vmatprep.subr.bf16.mxu0 %v7709_v0 }
 0x3cf   :  { %6471 = vmatpush3.bf16.msra.mxu1 %v8225_v2 }
 0x3d0   :  { %6472 = vmatprep.subr.bf16.mxu1 %v7709_v0 }
 0x3d3   :  { %6474 = vmatpush3.bf16.msra.mxu1 %v8231_v7 }
 0x3d4   :  { %6475 = vmatprep.subr.bf16.mxu1 %v7709_v0 }
 0x3d7   :  { %6477 = vmatpush3.bf16.msra.mxu1 %v8238_v13 }
 0x3d8   :  { %6478 = vmatprep.subr.bf16.mxu1 %v7709_v0 }
 0x3db   :  { %6480 = vmatpush3.bf16.msra.mxu1 %v8277_v25 }
 0x3dc   :  { %6505 = vmatprep.subr.bf16.mxu1 %v7709_v0 }
 0x415   :  { %v783_v55 = vpop.f32.mrb[4].mxu0 }
 0x416   :  { %v784_v56 = vadd.f32 1e-05, %v783_v55  ;;  %v5293_v57 = vpop.f32.mrb[5].mxu0 }
 0x418   :  { %7179 = vrsqrt.f32 %v784_v56 }
 0x422   :  { %v7180_v5 = vpop.eup %7179 }
 0x423   :  { %v788_v8 = vmul.f32 %v7180_v5, %v8125_v35 }
 0x425   :  { %v795_v12 = vmul.f32 %v4525_v6, %v788_v8 }
 0x427   :  { %v802_v14 = vadd.f32 %v4526_v11, %v795_v12  ;;  %v1489_v11 = vld [vmem:[#allocation14 + $0x10] sm:$0xff] }
 0x429   :  { %v8241_v15 = vmax.f32 %v802_v14, 0.0  ;;  %v1490_v14 = vld [vmem:[#allocation14 + $0x18] sm:$0xff] }
 0x42b   :  { %5327 = vmatmul.mubr.f32.vlgmr.msra.gmra.mrb[10].mxu0 %v8241_v15 }
 0x42c   :  { %6483 = vmatpush3.bf16.msra.mxu0 %v8203_v49  ;;  %5396 = vmatprep.mubr.msk.f32.mxu0 %vm7710_vm0, %v7711_v1 }
 0x42d   :  { %6484 = vmatprep.subr.bf16.mxu0 %v7709_v0 }
 0x430   :  { %6486 = vmatpush3.bf16.msra.mxu0 %v8207_v52 }
 0x431   :  { %6487 = vmatprep.subr.bf16.mxu0 %v7709_v0 }
 0x434   :  { %6489 = vmatpush3.bf16.msra.mxu0 %v8213_v58 }
 0x435   :  { %6490 = vmatprep.subr.bf16.mxu0 %v7709_v0 }
 0x438   :  { %6492 = vmatpush3.bf16.msra.mxu0 %v8219_v61 }
 0x439   :  { %6493 = vmatprep.subr.bf16.mxu0 %v7709_v0 }
 0x43c   :  { %6495 = vmatpush3.bf16.msra.mxu0 %v8225_v2 }
 0x43d   :  { %6496 = vmatprep.subr.bf16.mxu0 %v7709_v0 }
 0x440   :  { %6498 = vmatpush3.bf16.msra.mxu0 %v8231_v7 }
 0x441   :  { %6499 = vmatprep.subr.bf16.mxu0 %v7709_v0 }
 0x444   :  { %6501 = vmatpush3.bf16.msra.mxu0 %v8238_v13 }
 0x445   :  { %6502 = vmatprep.subr.bf16.mxu0 %v7709_v0 }
 0x448   :  { %6504 = vmatpush3.bf16.msra.mxu0 %v8277_v25 }
 0x449   :  { %6541 = vmatprep.subr.bf16.mxu0 %v7709_v0 }
 0x47d   :  { %v945_v35 = vpop.f32.mrb[4].mxu1  ;;  %v8262_v16 = vpop.f32.mrb[6].mxu0 }
 0x47e   :  { %v8264_v17 = vpop.f32.mrb[5].mxu1  ;;  %v1255_v18 = vpop.f32.mrb[7].mxu0  ;;  %v946_v4 = vadd.f32 %v945_v35, %v859_v62  ;;  %v8333_v35 = vpack.c.bf16 %v1490_v14, %v1489_v11  ;;  %v1892_v14 = vld [vmem:[#allocation22 + $0x20] sm:$0xff] }
 0x47f   :  { %v8267_v19 = vadd.f32 %v1255_v18, %v8186_v37 }
 0x481   :  { %v8269_v20 = vpop.f32.mrb[6].mxu1 }
 0x482   :  { %v8271_v21 = vpop.f32.mrb[7].mxu1 }
 0x483   :  { %v8275_v24 = vpop.f32.mrb[8].mxu0 }
 0x484   :  { %v1397_v26 = vpop.f32.mrb[9].mxu0 }
 0x485   :  { %v1090_v27 = vpop.f32.mrb[8].mxu1  ;;  %v8280_v28 = vadd.f32 %v1397_v26, %v8186_v37 }
 0x486   :  { %v8284_v29 = vpop.f32.mrb[9].mxu1  ;;  %v1091_v5 = vadd.f32 %v1090_v27, %v859_v62 }
 0x489   :  { %v8288_v44 = vpop.f32.mrb[10].mxu1 }
 0x48a   :  { %v8290_v46 = vpop.f32.mrb[11].mxu1 }
 0x48d   :  { %v1324_v47 = vpop.f32.mrb[12].mxu1 }
 0x48e   :  { %v8293_v50 = vadd.f32 %v1324_v47, %v8193_v41  ;;  %v1326_v37 = vpop.f32.mrb[13].mxu1 }
 0x48f   :  { %v8296_v53 = vadd.f32 %v1326_v37, %v8198_v43 }
 0x491   :  { %v1466_v54 = vpop.f32.mrb[14].mxu1 }
 0x492   :  { %v8299_v55 = vadd.f32 %v1466_v54, %v8193_v41  ;;  %v1468_v56 = vpop.f32.mrb[15].mxu1 }
 0x493   :  { %v8302_v57 = vadd.f32 %v1468_v56, %v8198_v43  ;;  %v1487_v43 = vld [vmem:[#allocation14] sm:$0xff] }
 0x494   :  { %v8330_v12 = vpack.c.bf16 %v1488_v10, %v1487_v43  ;;  %v1890_v43 = vld [vmem:[#allocation22 + $0x10] sm:$0xff]  ;;  %v1891_v10 = vld [vmem:[#allocation22 + $0x18] sm:$0xff] }
 0x495   :  { %v6521_v11 = vpack.c.bf16 %v1891_v10, %v1890_v43 }
 0x4fe   :  { %v1580_v3 = vpop.f32.mrb[10].mxu0 }
 0x4ff   :  { %v1581_v6 = vadd.f32 %v4537_v63, %v1580_v3  ;;  %v5328_v8 = vpop.f32.mrb[11].mxu0 }
 0x500   :  { %v1888_v8 = vld [vmem:[#allocation22] sm:$0xff] }
 0x501   :  { %v1584_v41 = vmul.f32 %v1581_v6, %v946_v4  ;;  %v1655_v9 = vmul.f32 %v1581_v6, %v1091_v5 }
 0x503   :  { %5362 = vmatmul.mubr.f32.vlgmr.msra.gmra.mrb[16].mxu1 %v1584_v41  ;;  %5397 = vmatmul.mubr.f32.vlgmr.msra.gmra.mrb[12].mxu0 %v1655_v9  ;;  %v1889_v41 = vld [vmem:[#allocation22 + $0x8] sm:$0xff] }
 0x504   :  { %5407 = vmatprep.mubr.msk.f32.mxu1 %vm7710_vm0, %v7711_v1  ;;  %6543 = vmatpush3.bf16.msra.mxu0 %v8028_v30  ;;  %v6518_v9 = vpack.c.bf16 %v1889_v41, %v1888_v8  ;;  %v1903_v8 = vld [vmem:[#allocation22 + $0x78] sm:$0xff] }
 0x505   :  { %6544 = vmatprep.subr.bf16.mxu0 %v7709_v0  ;;  %5488 = vmatprep.mubr.msk.f32.mxu0 %vm7710_vm0, %v7711_v1 }
 0x506   :  { %6507 = vmatpush3.bf16.msra.mxu1 %v8330_v12 }
 0x507   :  { %6508 = vmatprep.subr.bf16.mxu1 %v7709_v0 }
 0x508   :  { %6546 = vmatpush3.bf16.msra.mxu0 %v8041_v33 }
 0x509   :  { %6547 = vmatprep.subr.bf16.mxu0 %v7709_v0 }
 0x50a   :  { %6510 = vmatpush3.bf16.msra.mxu1 %v8333_v35 }
 0x50b   :  { %6511 = vmatprep.subr.bf16.mxu1 %v7709_v0 }
 0x50c   :  { %6549 = vmatpush3.bf16.msra.mxu0 %v8049_v36 }
 0x50d   :  { %6550 = vmatprep.subr.bf16.mxu0 %v7709_v0 }
 0x510   :  { %6552 = vmatpush3.bf16.msra.mxu0 %v8055_v39 }
 0x511   :  { %6553 = vmatprep.subr.bf16.mxu0 %v7709_v0 }
 0x514   :  { %6555 = vmatpush3.bf16.msra.mxu0 %v8061_v42 }
 0x515   :  { %6556 = vmatprep.subr.bf16.mxu0 %v7709_v0 }
 0x518   :  { %6558 = vmatpush3.bf16.msra.mxu0 %v8067_v45 }
 0x519   :  { %6559 = vmatprep.subr.bf16.mxu0 %v7709_v0 }
 0x51c   :  { %6561 = vmatpush3.bf16.msra.mxu0 %v8073_v48 }
 0x51d   :  { %6562 = vmatprep.subr.bf16.mxu0 %v7709_v0 }
 0x520   :  { %6564 = vmatpush3.bf16.msra.mxu0 %v8080_v51 }
 0x521   :  { %6589 = vmatprep.subr.bf16.mxu0 %v7709_v0 }
 0x5d6   :  { %v1651_v18 = vpop.f32.mrb[16].mxu1  ;;  %v1722_v22 = vpop.f32.mrb[12].mxu0 }
 0x5d7   :  { %v1726_v23 = vmax.f32 %v1651_v18, %v1722_v22  ;;  %v5363_v26 = vpop.f32.mrb[17].mxu1  ;;  %v5398_v27 = vpop.f32.mrb[13].mxu0 }
 0x5d8   :  { %v1895_v26 = vld [vmem:[#allocation22 + $0x38] sm:$0xff] }
 0x5d9   :  { %v1727_v47 = vsub.f32 %v1651_v18, %v1726_v23  ;;  %v1730_v37 = vsub.f32 %v1722_v22, %v1726_v23  ;;  %v1893_v18 = vld [vmem:[#allocation22 + $0x28] sm:$0xff]  ;;  %v1894_v23 = vld [vmem:[#allocation22 + $0x30] sm:$0xff] }
 0x5da   :  { %v6524_v22 = vpack.c.bf16 %v1893_v18, %v1892_v14  ;;  %v6527_v27 = vpack.c.bf16 %v1895_v26, %v1894_v23 }
 0x5db   :  { %v1728_v54 = vmul.f32 1.442695, %v1727_v47  ;;  %v1731_v56 = vmul.f32 1.442695, %v1730_v37  ;;  %v1896_v47 = vld [vmem:[#allocation22 + $0x40] sm:$0xff]  ;;  %v1897_v37 = vld [vmem:[#allocation22 + $0x48] sm:$0xff] }
 0x5dd   :  { %7181 = vpow2.f32 %v1728_v54  ;;  %v6530_v54 = vpack.c.bf16 %v1897_v37, %v1896_v47  ;;  %v4543_v37 = vld [vmem:[%s8892_s19 + $0x80] sm:$0xff] }
 0x5de   :  { %7183 = vpow2.f32 %v1731_v56  ;;  %v1898_v56 = vld [vmem:[#allocation22 + $0x50] sm:$0xff] }
 0x5e7   :  { %v7182_v62 = vpop.eup %7181 }
 0x5e8   :  { %v7184_v63 = vpop.eup %7183 }
 0x5e9   :  { %v1733_v3 = vadd.f32 %v7184_v63, %v7182_v62 }
 0x5eb   :  { %7185 = vrcp.f32 %v1733_v3  ;;  %v1900_v3 = vld [vmem:[#allocation22 + $0x60] sm:$0xff] }
 0x5f5   :  { %v7186_v4 = vpop.eup %7185 }
 0x5f6   :  { %v1736_v5 = vmul.f32 %v7186_v4, %v7182_v62  ;;  %v1812_v6 = vmul.f32 %v7186_v4, %v7184_v63  ;;  %v1899_v62 = vld [vmem:[#allocation22 + $0x58] sm:$0xff]  ;;  %v1901_v4 = vld [vmem:[#allocation22 + $0x68] sm:$0xff] }
 0x5f7   :  { %v6533_v63 = vpack.c.bf16 %v1899_v62, %v1898_v56  ;;  %v4545_v56 = vld [vmem:[%s8892_s19 + $0x90] sm:$0xff] }
 0x5f8   :  { %5408 = vmatmul.mubr.msk.f32.vlgmr.msra.gmra.mrb[18].mxu1 %vm1737_vm6, %v1736_v5  ;;  %v6536_v5 = vpack.c.bf16 %v1901_v4, %v1900_v3  ;;  %v4547_v4 = vld [vmem:[%s8892_s19 + $0xa0] sm:$0xff] }
 0x5f9   :  { %6513 = vmatpush3.bf16.msra.mxu1 %v8330_v12  ;;  %5418 = vmatprep.mubr.msk.f32.mxu1 %vm7710_vm0, %v7711_v1 }
 0x5fa   :  { %6514 = vmatprep.subr.bf16.mxu1 %v7709_v0 }
 0x5fd   :  { %6516 = vmatpush3.bf16.msra.mxu1 %v8333_v35 }
 0x5fe   :  { %6517 = vmatprep.subr.bf16.mxu1 %v7709_v0 }
 0x600   :  { %5419 = vmatmul.mubr.msk.f32.vlgmr.msra.gmra.mrb[20].mxu1 %vm1737_vm6, %v1812_v6  ;;  %v1902_v6 = vld [vmem:[#allocation22 + $0x70] sm:$0xff] }
 0x601   :  { %6519 = vmatpush3.bf16.msra.mxu1 %v6518_v9  ;;  %5453 = vmatprep.mubr.msk.f32.mxu1 %vm7710_vm0, %v7711_v1  ;;  %v6539_v41 = vpack.c.bf16 %v1903_v8, %v1902_v6  ;;  %v1170_v9 = vrot.slane %v8180_v32, %v858_v59  ;;  %v4540_v32 = vld [vmem:[#allocation23] ss:$0 sm:$0xff] }
 0x602   :  { %6520 = vmatprep.subr.bf16.mxu1 %v7709_v0 }
 0x603   :  { %v1254_v43 = vadd.f32 %v8262_v16, %v1170_v9  ;;  %v1396_v18 = vadd.f32 %v8275_v24, %v1170_v9 }
 0x605   :  { %6522 = vmatpush3.bf16.msra.mxu1 %v6521_v11 }
 0x606   :  { %6523 = vmatprep.subr.bf16.mxu1 %v7709_v0 }
 0x609   :  { %6525 = vmatpush3.bf16.msra.mxu1 %v6524_v22 }
 0x60a   :  { %6526 = vmatprep.subr.bf16.mxu1 %v7709_v0 }
 0x60d   :  { %6528 = vmatpush3.bf16.msra.mxu1 %v6527_v27 }
 0x60e   :  { %6529 = vmatprep.subr.bf16.mxu1 %v7709_v0 }
 0x611   :  { %6531 = vmatpush3.bf16.msra.mxu1 %v6530_v54  ;;  %v4544_v54 = vld [vmem:[%s8892_s19 + $0x88] sm:$0xff] }
 0x612   :  { %6532 = vmatprep.subr.bf16.mxu1 %v7709_v0  ;;  %v6590_v62 = vpack.c.bf16 %v4544_v54, %v4543_v37  ;;  %v4558_v37 = vld [vmem:[%s8892_s19 + $0xf8] sm:$0xff] }
 0x615   :  { %6534 = vmatpush3.bf16.msra.mxu1 %v6533_v63  ;;  %v4546_v63 = vld [vmem:[%s8892_s19 + $0x98] sm:$0xff] }
 0x616   :  { %6535 = vmatprep.subr.bf16.mxu1 %v7709_v0  ;;  %v6593_v3 = vpack.c.bf16 %v4546_v63, %v4545_v56 }
 0x619   :  { %6537 = vmatpush3.bf16.msra.mxu1 %v6536_v5  ;;  %v4548_v5 = vld [vmem:[%s8892_s19 + $0xa8] sm:$0xff] }
 0x61a   :  { %6538 = vmatprep.subr.bf16.mxu1 %v7709_v0  ;;  %v6596_v6 = vpack.c.bf16 %v4548_v5, %v4547_v4  ;;  %v4541_v4 = vld [vmem:[#allocation25] ss:$0 sm:$0xff] }
 0x61d   :  { %6540 = vmatpush3.bf16.msra.mxu1 %v6539_v41 }
 0x61e   :  { %6565 = vmatprep.subr.bf16.mxu1 %v7709_v0 }
 0x6cb   :  { %v1807_v10 = vpop.f32.mrb[18].mxu1 }
 0x6cc   :  { %v1811_v11 = vmul.f32 %v1807_v10, %v1254_v43  ;;  %v5409_v14 = vpop.f32.mrb[19].mxu1  ;;  %v4549_v10 = vld [vmem:[%s8892_s19 + $0xb0] sm:$0xff] }
 0x6d3   :  { %v1882_v22 = vpop.f32.mrb[20].mxu1 }
 0x6d4   :  { %v1886_v23 = vmul.f32 %v1882_v22, %v1396_v18  ;;  %v5420_v26 = vpop.f32.mrb[21].mxu1  ;;  %v4551_v18 = vld [vmem:[%s8892_s19 + $0xc0] sm:$0xff]  ;;  %v4552_v22 = vld [vmem:[%s8892_s19 + $0xc8] sm:$0xff] }
 0x6d5   :  { %v4553_v26 = vld [vmem:[%s8892_s19 + $0xd0] sm:$0xff] }
 0x6d6   :  { %v1887_v27 = vadd.f32 %v1886_v23, %v1811_v11  ;;  %v4550_v11 = vld [vmem:[%s8892_s19 + $0xb8] sm:$0xff]  ;;  %v6602_v23 = vpack.c.bf16 %v4552_v22, %v4551_v18 }
 0x6d7   :  { %v6599_v14 = vpack.c.bf16 %v4550_v11, %v4549_v10 }
 0x6d8   :  { %5454 = vmatmul.mubr.f32.vlgmr.msra.gmra.mrb[22].mxu1 %v1887_v27  ;;  %v4554_v27 = vld [vmem:[%s8892_s19 + $0xd8] sm:$0xff] }
 0x6d9   :  { %6567 = vmatpush3.bf16.msra.mxu1 %v8028_v30  ;;  %5523 = vmatprep.mubr.msk.f32.mxu1 %vm7710_vm0, %v7711_v1 }
 0x6da   :  { %6568 = vmatprep.subr.bf16.mxu1 %v7709_v0 }
 0x6dd   :  { %6570 = vmatpush3.bf16.msra.mxu1 %v8041_v33 }
 0x6de   :  { %6571 = vmatprep.subr.bf16.mxu1 %v7709_v0 }
 0x6e1   :  { %6573 = vmatpush3.bf16.msra.mxu1 %v8049_v36 }
 0x6e2   :  { %6574 = vmatprep.subr.bf16.mxu1 %v7709_v0 }
 0x6e5   :  { %6576 = vmatpush3.bf16.msra.mxu1 %v8055_v39 }
 0x6e6   :  { %6577 = vmatprep.subr.bf16.mxu1 %v7709_v0 }
 0x6e9   :  { %6579 = vmatpush3.bf16.msra.mxu1 %v8061_v42 }
 0x6ea   :  { %6580 = vmatprep.subr.bf16.mxu1 %v7709_v0 }
 0x6ed   :  { %6582 = vmatpush3.bf16.msra.mxu1 %v8067_v45 }
 0x6ee   :  { %6583 = vmatprep.subr.bf16.mxu1 %v7709_v0 }
 0x6f1   :  { %6585 = vmatpush3.bf16.msra.mxu1 %v8073_v48 }
 0x6f2   :  { %6586 = vmatprep.subr.bf16.mxu1 %v7709_v0 }
 0x6f5   :  { %6588 = vmatpush3.bf16.msra.mxu1 %v8080_v51 }
 0x6f6   :  { %6613 = vmatprep.subr.bf16.mxu1 %v7709_v0 }
 0x7ab   :  { %v1977_v16 = vpop.f32.mrb[22].mxu1 }
 0x7ac   :  { %v1978_v24 = vadd.f32 %v4540_v32, %v1977_v16  ;;  %v5455_v59 = vpop.f32.mrb[23].mxu1  ;;  %v6605_v32 = vpack.c.bf16 %v4554_v27, %v4553_v26  ;;  %v4555_v16 = vld [vmem:[%s8892_s19 + $0xe0] sm:$0xff] }
 0x7ae   :  { %v1981_v47 = vadd.f32 %v1978_v24, %v8241_v15  ;;  %v4556_v24 = vld [vmem:[%s8892_s19 + $0xe8] sm:$0xff] }
 0x7af   :  { %v6608_v59 = vpack.c.bf16 %v4556_v24, %v4555_v16  ;;  %v2545_v24 = vld [vmem:[#allocation22 + $0xa0] sm:$0xff] }
 0x7b0   :  { %5489 = vmatmul.mubr.f32.vlgmr.msra.gmra.mrb[14].mxu0 %v1981_v47 }
 0x7b1   :  { %5558 = vmatprep.mubr.msk.f32.mxu0 %vm7710_vm0, %v7711_v1  ;;  %6591 = vmatpush3.bf16.msra.mxu0 %v6590_v62 }
 0x7b2   :  { %6592 = vmatprep.subr.bf16.mxu0 %v7709_v0 }
 0x7b5   :  { %6594 = vmatpush3.bf16.msra.mxu0 %v6593_v3 }
 0x7b6   :  { %6595 = vmatprep.subr.bf16.mxu0 %v7709_v0 }
 0x7b9   :  { %6597 = vmatpush3.bf16.msra.mxu0 %v6596_v6  ;;  %v4542_v6 = vld [vmem:[#allocation26] ss:$0 sm:$0xff] }
 0x7ba   :  { %6598 = vmatprep.subr.bf16.mxu0 %v7709_v0 }
 0x7bd   :  { %6600 = vmatpush3.bf16.msra.mxu0 %v6599_v14 }
 0x7be   :  { %6601 = vmatprep.subr.bf16.mxu0 %v7709_v0 }
 0x7c1   :  { %6603 = vmatpush3.bf16.msra.mxu0 %v6602_v23 }
 0x7c2   :  { %6604 = vmatprep.subr.bf16.mxu0 %v7709_v0 }
 0x7c5   :  { %6606 = vmatpush3.bf16.msra.mxu0 %v6605_v32  ;;  %v2544_v32 = vld [vmem:[#allocation22 + $0x98] sm:$0xff] }
 0x7c6   :  { %6607 = vmatprep.subr.bf16.mxu0 %v7709_v0 }
 0x7c9   :  { %6609 = vmatpush3.bf16.msra.mxu0 %v6608_v59  ;;  %v2546_v59 = vld [vmem:[#allocation22 + $0xa8] sm:$0xff] }
 0x7ca   :  { %6610 = vmatprep.subr.bf16.mxu0 %v7709_v0 }
 0x883   :  { %v2050_v8 = vpop.f32.mrb[14].mxu0 }
 0x884   :  { %v2054_v41 = vsub.f32 %v1981_v47, %v2050_v8  ;;  %v5490_v9 = vpop.f32.mrb[15].mxu0  ;;  %v4557_v47 = vld [vmem:[%s8892_s19 + $0xf0] sm:$0xff] }
 0x885   :  { %v6611_v54 = vpack.c.bf16 %v4558_v37, %v4557_v47  ;;  %v6680_v47 = vpack.c.bf16 %v2546_v59, %v2545_v24  ;;  %v2547_v37 = vld [vmem:[#allocation22 + $0xb0] sm:$0xff]  ;;  %v2554_v24 = vld [vmem:[#allocation22 + $0xe8] sm:$0xff] }
 0x886   :  { %v2055_v43 = vmul.f32 %v2054_v41, %v2054_v41 }
 0x887   :  { %6612 = vmatpush3.bf16.msra.mxu0 %v6611_v54  ;;  %v2548_v54 = vld [vmem:[#allocation22 + $0xb8] sm:$0xff] }
 0x888   :  { %5524 = vmatmul.mubr.f32.vlgmr.msra.gmra.mrb[24].mxu1 %v2055_v43  ;;  %6637 = vmatprep.subr.bf16.mxu0 %v7709_v0  ;;  %v4559_v43 = vld [vmem:[#allocation16 + $0x1] ss:$0 sm:$0xff] }
 0x889   :  { %6615 = vmatpush3.bf16.msra.mxu1 %v8203_v49  ;;  %5593 = vmatprep.mubr.msk.f32.mxu1 %vm7710_vm0, %v7711_v1 }
 0x88a   :  { %6616 = vmatprep.subr.bf16.mxu1 %v7709_v0 }
 0x88d   :  { %6618 = vmatpush3.bf16.msra.mxu1 %v8207_v52 }
 0x88e   :  { %6619 = vmatprep.subr.bf16.mxu1 %v7709_v0 }
 0x891   :  { %6621 = vmatpush3.bf16.msra.mxu1 %v8213_v58 }
 0x892   :  { %6622 = vmatprep.subr.bf16.mxu1 %v7709_v0 }
 0x895   :  { %6624 = vmatpush3.bf16.msra.mxu1 %v8219_v61 }
 0x896   :  { %6625 = vmatprep.subr.bf16.mxu1 %v7709_v0 }
 0x899   :  { %6627 = vmatpush3.bf16.msra.mxu1 %v8225_v2 }
 0x89a   :  { %6628 = vmatprep.subr.bf16.mxu1 %v7709_v0 }
 0x89d   :  { %6630 = vmatpush3.bf16.msra.mxu1 %v8231_v7 }
 0x89e   :  { %6631 = vmatprep.subr.bf16.mxu1 %v7709_v0 }
 0x8a1   :  { %6633 = vmatpush3.bf16.msra.mxu1 %v8238_v13 }
 0x8a2   :  { %6634 = vmatprep.subr.bf16.mxu1 %v7709_v0 }
 0x8a5   :  { %6636 = vmatpush3.bf16.msra.mxu1 %v8277_v25 }
 0x8a6   :  { %6661 = vmatprep.subr.bf16.mxu1 %v7709_v0 }
 0x95b   :  { %v2122_v56 = vpop.f32.mrb[24].mxu1 }
 0x95c   :  { %v2123_v62 = vadd.f32 1e-05, %v2122_v56  ;;  %v5525_v63 = vpop.f32.mrb[25].mxu1  ;;  %v6683_v56 = vpack.c.bf16 %v2548_v54, %v2547_v37  ;;  %v2556_v37 = vld [vmem:[#allocation22 + $0xf8] sm:$0xff] }
 0x95d   :  { %v2550_v63 = vld [vmem:[#allocation22 + $0xc8] sm:$0xff] }
 0x95e   :  { %7187 = vrsqrt.f32 %v2123_v62  ;;  %v2549_v62 = vld [vmem:[#allocation22 + $0xc0] sm:$0xff] }
 0x968   :  { %v7188_v3 = vpop.eup %7187 }
 0x969   :  { %v2127_v5 = vmul.f32 %v7188_v3, %v2054_v41  ;;  %v863_v41 = vrot.slane %v8305_v60, %v862_v34  ;;  %v2541_v34 = vld [vmem:[#allocation22 + $0x80] sm:$0xff]  ;;  %v6686_v3 = vpack.c.bf16 %v2550_v63, %v2549_v62 }
 0x96b   :  { %v2134_v8 = vmul.f32 %v4541_v4, %v2127_v5  ;;  %v948_v11 = vadd.f32 %v8264_v17, %v863_v41  ;;  %v1093_v14 = vadd.f32 %v8284_v29, %v863_v41  ;;  %v2542_v17 = vld [vmem:[#allocation22 + $0x88] sm:$0xff]  ;;  %v2543_v29 = vld [vmem:[#allocation22 + $0x90] sm:$0xff] }
 0x96c   :  { %v6674_v27 = vpack.c.bf16 %v2542_v17, %v2541_v34  ;;  %v6677_v16 = vpack.c.bf16 %v2544_v32, %v2543_v29  ;;  %v2551_v29 = vld [vmem:[#allocation22 + $0xd0] sm:$0xff] }
 0x96d   :  { %v8424_v9 = vadd.f32 %v4542_v6, %v2134_v8 }
 0x96f   :  { %5559 = vmatmul.mubr.f32.vlgmr.msra.gmra.mrb[16].mxu0 %v8424_v9 }
 0x970   :  { %6639 = vmatpush3.bf16.msra.mxu0 %v8203_v49  ;;  %5628 = vmatprep.mubr.msk.f32.mxu0 %vm7710_vm0, %v7711_v1 }
 0x971   :  { %6640 = vmatprep.subr.bf16.mxu0 %v7709_v0 }
 0x974   :  { %6642 = vmatpush3.bf16.msra.mxu0 %v8207_v52 }
 0x975   :  { %6643 = vmatprep.subr.bf16.mxu0 %v7709_v0 }
 0x978   :  { %6645 = vmatpush3.bf16.msra.mxu0 %v8213_v58 }
 0x979   :  { %6646 = vmatprep.subr.bf16.mxu0 %v7709_v0 }
 0x97c   :  { %6648 = vmatpush3.bf16.msra.mxu0 %v8219_v61 }
 0x97d   :  { %6649 = vmatprep.subr.bf16.mxu0 %v7709_v0 }
 0x980   :  { %6651 = vmatpush3.bf16.msra.mxu0 %v8225_v2 }
 0x981   :  { %6652 = vmatprep.subr.bf16.mxu0 %v7709_v0 }
 0x984   :  { %6654 = vmatpush3.bf16.msra.mxu0 %v8231_v7 }
 0x985   :  { %6655 = vmatprep.subr.bf16.mxu0 %v7709_v0 }
 0x988   :  { %6657 = vmatpush3.bf16.msra.mxu0 %v8238_v13 }
 0x989   :  { %6658 = vmatprep.subr.bf16.mxu0 %v7709_v0 }
 0x98c   :  { %6660 = vmatpush3.bf16.msra.mxu0 %v8277_v25 }
 0x98d   :  { %6673 = vmatprep.subr.bf16.mxu0 %v7709_v0 }
 0xa42   :  { %v2233_v10 = vpop.f32.mrb[16].mxu0 }
 0xa43   :  { %v2234_v18 = vadd.f32 %v4559_v43, %v2233_v10  ;;  %v5560_v22 = vpop.f32.mrb[17].mxu0 }
 0xa45   :  { %v2237_v23 = vmul.f32 %v2234_v18, %v948_v11  ;;  %v2308_v26 = vmul.f32 %v2234_v18, %v1093_v14 }
 0xa47   :  { %5594 = vmatmul.mubr.f32.vlgmr.msra.gmra.mrb[26].mxu1 %v2237_v23  ;;  %5629 = vmatmul.mubr.f32.vlgmr.msra.gmra.mrb[18].mxu0 %v2308_v26 }
 0xa48   :  { %6663 = vmatpush3.bf16.msra.mxu1 %v8330_v12  ;;  %5639 = vmatprep.mubr.msk.f32.mxu1 %vm7710_vm0, %v7711_v1 }
 0xa49   :  { %6664 = vmatprep.subr.bf16.mxu1 %v7709_v0  ;;  %5685 = vmatprep.mubr.msk.f32.mxu0 %vm7710_vm0, %v7711_v1 }
 0xa4a   :  { %6675 = vmatpush3.bf16.msra.mxu0 %v6674_v27  ;;  %v2552_v27 = vld [vmem:[#allocation22 + $0xd8] sm:$0xff] }
 0xa4b   :  { %6676 = vmatprep.subr.bf16.mxu0 %v7709_v0  ;;  %v6689_v32 = vpack.c.bf16 %v2552_v27, %v2551_v29 }
 0xa4c   :  { %6666 = vmatpush3.bf16.msra.mxu1 %v8333_v35 }
 0xa4d   :  { %6667 = vmatprep.subr.bf16.mxu1 %v7709_v0 }
 0xa4e   :  { %6678 = vmatpush3.bf16.msra.mxu0 %v6677_v16  ;;  %v2553_v16 = vld [vmem:[#allocation22 + $0xe0] sm:$0xff] }
 0xa4f   :  { %6679 = vmatprep.subr.bf16.mxu0 %v7709_v0  ;;  %v6692_v59 = vpack.c.bf16 %v2554_v24, %v2553_v16  ;;  %v4571_v16 = vld [vmem:[%s8892_s19 + $0x130] sm:$0xff]  ;;  %v4572_v24 = vld [vmem:[%s8892_s19 + $0x138] sm:$0xff] }
 0xa52   :  { %6681 = vmatpush3.bf16.msra.mxu0 %v6680_v47  ;;  %v2555_v47 = vld [vmem:[#allocation22 + $0xf0] sm:$0xff] }
 0xa53   :  { %6682 = vmatprep.subr.bf16.mxu0 %v7709_v0  ;;  %v6695_v54 = vpack.c.bf16 %v2556_v37, %v2555_v47  ;;  %v4573_v47 = vld [vmem:[%s8892_s19 + $0x140] sm:$0xff]  ;;  %v4574_v37 = vld [vmem:[%s8892_s19 + $0x148] sm:$0xff] }
 0xa56   :  { %6684 = vmatpush3.bf16.msra.mxu0 %v6683_v56 }
 0xa57   :  { %6685 = vmatprep.subr.bf16.mxu0 %v7709_v0 }
 0xa5a   :  { %6687 = vmatpush3.bf16.msra.mxu0 %v6686_v3 }
 0xa5b   :  { %6688 = vmatprep.subr.bf16.mxu0 %v7709_v0 }
 0xa5e   :  { %6690 = vmatpush3.bf16.msra.mxu0 %v6689_v32 }
 0xa5f   :  { %6691 = vmatprep.subr.bf16.mxu0 %v7709_v0 }
 0xa62   :  { %6693 = vmatpush3.bf16.msra.mxu0 %v6692_v59  ;;  %v6755_v59 = vpack.c.bf16 %v4572_v24, %v4571_v16 }
 0xa63   :  { %6694 = vmatprep.subr.bf16.mxu0 %v7709_v0 }
 0xa66   :  { %6696 = vmatpush3.bf16.msra.mxu0 %v6695_v54  ;;  %v6758_v54 = vpack.c.bf16 %v4574_v37, %v4573_v47  ;;  %v3201_v37 = vld [vmem:[#allocation22 + $0x120] sm:$0xff] }
 0xa67   :  { %6721 = vmatprep.subr.bf16.mxu0 %v7709_v0 }
 0xb1a   :  { %v2304_v4 = vpop.f32.mrb[26].mxu1  ;;  %v2375_v5 = vpop.f32.mrb[18].mxu0 }
 0xb1b   :  { %v2379_v6 = vmax.f32 %v2304_v4, %v2375_v5  ;;  %v5595_v8 = vpop.f32.mrb[27].mxu1  ;;  %v5630_v41 = vpop.f32.mrb[19].mxu0 }
 0xb1d   :  { %v2380_v43 = vsub.f32 %v2304_v4, %v2379_v6  ;;  %v2383_v10 = vsub.f32 %v2375_v5, %v2379_v6 }
 0xb1f   :  { %v2381_v11 = vmul.f32 1.442695, %v2380_v43  ;;  %v2384_v14 = vmul.f32 1.442695, %v2383_v10  ;;  %v4565_v10 = vld [vmem:[%s8892_s19 + $0x100] sm:$0xff] }
 0xb21   :  { %7189 = vpow2.f32 %v2381_v11  ;;  %v4566_v11 = vld [vmem:[%s8892_s19 + $0x108] sm:$0xff] }
 0xb22   :  { %7191 = vpow2.f32 %v2384_v14  ;;  %v4567_v14 = vld [vmem:[%s8892_s19 + $0x110] sm:$0xff] }
 0xb2b   :  { %v7190_v18 = vpop.eup %7189 }
 0xb2c   :  { %v7192_v22 = vpop.eup %7191 }
 0xb2d   :  { %v2386_v23 = vadd.f32 %v7192_v22, %v7190_v18 }
 0xb2f   :  { %7193 = vrcp.f32 %v2386_v23 }
 0xb39   :  { %v7194_v26 = vpop.eup %7193 }
 0xb3a   :  { %v2389_v34 = vmul.f32 %v7194_v26, %v7190_v18  ;;  %v2464_v17 = vmul.f32 %v7194_v26, %v7192_v22  ;;  %v6746_v18 = vpack.c.bf16 %v4566_v11, %v4565_v10  ;;  %v4568_v22 = vld [vmem:[%s8892_s19 + $0x118] sm:$0xff]  ;;  %v4569_v26 = vld [vmem:[%s8892_s19 + $0x120] sm:$0xff] }
 0xb3b   :  { %v6749_v23 = vpack.c.bf16 %v4568_v22, %v4567_v14  ;;  %v4563_v11 = vld [vmem:[#allocation25 + $0x1] ss:$0 sm:$0xff] }
 0xb3c   :  { %5640 = vmatmul.mubr.msk.f32.vlgmr.msra.gmra.mrb[28].mxu1 %vm1737_vm6, %v2389_v34  ;;  %v4570_v34 = vld [vmem:[%s8892_s19 + $0x128] sm:$0xff] }
 0xb3d   :  { %6669 = vmatpush3.bf16.msra.mxu1 %v8330_v12  ;;  %5650 = vmatprep.mubr.msk.f32.mxu1 %vm7710_vm0, %v7711_v1 }
 0xb3e   :  { %6670 = vmatprep.subr.bf16.mxu1 %v7709_v0 }
 0xb41   :  { %6672 = vmatpush3.bf16.msra.mxu1 %v8333_v35 }
 0xb42   :  { %6697 = vmatprep.subr.bf16.mxu1 %v7709_v0 }
 0xb44   :  { %5651 = vmatmul.mubr.msk.f32.vlgmr.msra.gmra.mrb[30].mxu1 %vm1737_vm6, %v2464_v17  ;;  %v6752_v17 = vpack.c.bf16 %v4570_v34, %v4569_v26  ;;  %v867_v26 = vrot.slane %v8305_v60, %v866_v38  ;;  %v4581_v34 = vld [vmem:[#allocation16 + $0x2] ss:$0 sm:$0xff]  ;;  %v3197_v38 = vld [vmem:[#allocation22 + $0x100] sm:$0xff] }
 0xb45   :  { %6699 = vmatpush3.bf16.msra.mxu1 %v8028_v30  ;;  %5720 = vmatprep.mubr.msk.f32.mxu1 %vm7710_vm0, %v7711_v1 }
 0xb46   :  { %6700 = vmatprep.subr.bf16.mxu1 %v7709_v0 }
 0xb49   :  { %6702 = vmatpush3.bf16.msra.mxu1 %v8041_v33 }
 0xb4a   :  { %6703 = vmatprep.subr.bf16.mxu1 %v7709_v0 }
 0xb4d   :  { %6705 = vmatpush3.bf16.msra.mxu1 %v8049_v36 }
 0xb4e   :  { %6706 = vmatprep.subr.bf16.mxu1 %v7709_v0 }
 0xb51   :  { %6708 = vmatpush3.bf16.msra.mxu1 %v8055_v39 }
 0xb52   :  { %6709 = vmatprep.subr.bf16.mxu1 %v7709_v0 }
 0xb55   :  { %6711 = vmatpush3.bf16.msra.mxu1 %v8061_v42 }
 0xb56   :  { %6712 = vmatprep.subr.bf16.mxu1 %v7709_v0 }
 0xb59   :  { %6714 = vmatpush3.bf16.msra.mxu1 %v8067_v45 }
 0xb5a   :  { %6715 = vmatprep.subr.bf16.mxu1 %v7709_v0 }
 0xb5d   :  { %6717 = vmatpush3.bf16.msra.mxu1 %v8073_v48 }
 0xb5e   :  { %6718 = vmatprep.subr.bf16.mxu1 %v7709_v0 }
 0xb61   :  { %6720 = vmatpush3.bf16.msra.mxu1 %v8080_v51 }
 0xb62   :  { %6745 = vmatprep.subr.bf16.mxu1 %v7709_v0 }
 0xc0f   :  { %v2459_v56 = vpop.f32.mrb[28].mxu1 }
 0xc10   :  { %v2463_v62 = vmul.f32 %v2459_v56, %v8267_v19  ;;  %v5641_v63 = vpop.f32.mrb[29].mxu1  ;;  %v4562_v19 = vld [vmem:[#allocation23 + $0x1] ss:$0 sm:$0xff]  ;;  %v4575_v56 = vld [vmem:[%s8892_s19 + $0x150] sm:$0xff] }
 0xc17   :  { %v2534_v3 = vpop.f32.mrb[30].mxu1 }
 0xc18   :  { %v2538_v4 = vmul.f32 %v2534_v3, %v8280_v28  ;;  %v5652_v5 = vpop.f32.mrb[31].mxu1  ;;  %v4577_v3 = vld [vmem:[%s8892_s19 + $0x160] sm:$0xff] }
 0xc1a   :  { %v2539_v6 = vadd.f32 %v2538_v4, %v2463_v62  ;;  %v4576_v62 = vld [vmem:[%s8892_s19 + $0x158] sm:$0xff]  ;;  %v4578_v4 = vld [vmem:[%s8892_s19 + $0x168] sm:$0xff] }
 0xc1b   :  { %v6761_v63 = vpack.c.bf16 %v4576_v62, %v4575_v56  ;;  %v6764_v5 = vpack.c.bf16 %v4578_v4, %v4577_v3  ;;  %v3203_v62 = vld [vmem:[#allocation22 + $0x130] sm:$0xff]  ;;  %v3205_v4 = vld [vmem:[#allocation22 + $0x140] sm:$0xff] }
 0xc1c   :  { %5686 = vmatmul.mubr.f32.vlgmr.msra.gmra.mrb[20].mxu0 %v2539_v6  ;;  %v4579_v6 = vld [vmem:[%s8892_s19 + $0x170] sm:$0xff] }
 0xc1d   :  { %6723 = vmatpush3.bf16.msra.mxu0 %v8028_v30  ;;  %5755 = vmatprep.mubr.msk.f32.mxu0 %vm7710_vm0, %v7711_v1 }
 0xc1e   :  { %6724 = vmatprep.subr.bf16.mxu0 %v7709_v0 }
 0xc21   :  { %6726 = vmatpush3.bf16.msra.mxu0 %v8041_v33 }
 0xc22   :  { %6727 = vmatprep.subr.bf16.mxu0 %v7709_v0 }
 0xc25   :  { %6729 = vmatpush3.bf16.msra.mxu0 %v8049_v36 }
 0xc26   :  { %6730 = vmatprep.subr.bf16.mxu0 %v7709_v0 }
 0xc29   :  { %6732 = vmatpush3.bf16.msra.mxu0 %v8055_v39 }
 0xc2a   :  { %6733 = vmatprep.subr.bf16.mxu0 %v7709_v0 }
 0xc2d   :  { %6735 = vmatpush3.bf16.msra.mxu0 %v8061_v42 }
 0xc2e   :  { %6736 = vmatprep.subr.bf16.mxu0 %v7709_v0 }
 0xc31   :  { %6738 = vmatpush3.bf16.msra.mxu0 %v8067_v45 }
 0xc32   :  { %6739 = vmatprep.subr.bf16.mxu0 %v7709_v0 }
 0xc35   :  { %6741 = vmatpush3.bf16.msra.mxu0 %v8073_v48 }
 0xc36   :  { %6742 = vmatprep.subr.bf16.mxu0 %v7709_v0 }
 0xc39   :  { %6744 = vmatpush3.bf16.msra.mxu0 %v8080_v51 }
 0xc3a   :  { %6769 = vmatprep.subr.bf16.mxu0 %v7709_v0 }
 0xcef   :  { %v2631_v28 = vpop.f32.mrb[20].mxu0 }
 0xcf0   :  { %v2632_v8 = vadd.f32 %v4562_v19, %v2631_v28  ;;  %v5687_v41 = vpop.f32.mrb[21].mxu0  ;;  %v4580_v19 = vld [vmem:[%s8892_s19 + $0x178] sm:$0xff] }
 0xcf1   :  { %v6767_v28 = vpack.c.bf16 %v4580_v19, %v4579_v6 }
 0xcf2   :  { %v2635_v43 = vadd.f32 %v2632_v8, %v8424_v9 }
 0xcf4   :  { %5721 = vmatmul.mubr.f32.vlgmr.msra.gmra.mrb[32].mxu1 %v2635_v43 }
 0xcf5   :  { %5790 = vmatprep.mubr.msk.f32.mxu1 %vm7710_vm0, %v7711_v1  ;;  %6747 = vmatpush3.bf16.msra.mxu1 %v6746_v18  ;;  %v4564_v18 = vld [vmem:[#allocation26 + $0x1] ss:$0 sm:$0xff] }
 0xcf6   :  { %6748 = vmatprep.subr.bf16.mxu1 %v7709_v0 }
 0xcf9   :  { %6750 = vmatpush3.bf16.msra.mxu1 %v6749_v23 }
 0xcfa   :  { %6751 = vmatprep.subr.bf16.mxu1 %v7709_v0 }
 0xcfd   :  { %6753 = vmatpush3.bf16.msra.mxu1 %v6752_v17 }
 0xcfe   :  { %6754 = vmatprep.subr.bf16.mxu1 %v7709_v0 }
 0xd01   :  { %6756 = vmatpush3.bf16.msra.mxu1 %v6755_v59  ;;  %v3200_v59 = vld [vmem:[#allocation22 + $0x118] sm:$0xff] }
 0xd02   :  { %6757 = vmatprep.subr.bf16.mxu1 %v7709_v0 }
 0xd05   :  { %6759 = vmatpush3.bf16.msra.mxu1 %v6758_v54  ;;  %v3202_v54 = vld [vmem:[#allocation22 + $0x128] sm:$0xff] }
 0xd06   :  { %6760 = vmatprep.subr.bf16.mxu1 %v7709_v0  ;;  %v6836_v56 = vpack.c.bf16 %v3202_v54, %v3201_v37 }
 0xd09   :  { %6762 = vmatpush3.bf16.msra.mxu1 %v6761_v63  ;;  %v3204_v63 = vld [vmem:[#allocation22 + $0x138] sm:$0xff] }
 0xd0a   :  { %6763 = vmatprep.subr.bf16.mxu1 %v7709_v0  ;;  %v6839_v3 = vpack.c.bf16 %v3204_v63, %v3203_v62 }
 0xd0d   :  { %6765 = vmatpush3.bf16.msra.mxu1 %v6764_v5  ;;  %v3206_v5 = vld [vmem:[#allocation22 + $0x148] sm:$0xff] }
 0xd0e   :  { %6766 = vmatprep.subr.bf16.mxu1 %v7709_v0  ;;  %v6842_v6 = vpack.c.bf16 %v3206_v5, %v3205_v4 }
 0xd11   :  { %6768 = vmatpush3.bf16.msra.mxu1 %v6767_v28 }
 0xd12   :  { %6793 = vmatprep.subr.bf16.mxu1 %v7709_v0 }
 0xdc7   :  { %v2706_v9 = vpop.f32.mrb[32].mxu1 }
 0xdc8   :  { %v2710_v29 = vsub.f32 %v2635_v43, %v2706_v9  ;;  %v5722_v27 = vpop.f32.mrb[33].mxu1  ;;  %v1017_v9 = vadd.f32 %v8269_v20, %v867_v26  ;;  %v3198_v20 = vld [vmem:[#allocation22 + $0x108] sm:$0xff] }
 0xdc9   :  { %v6830_v60 = vpack.c.bf16 %v3198_v20, %v3197_v38  ;;  %v3210_v38 = vld [vmem:[#allocation22 + $0x168] sm:$0xff] }
 0xdca   :  { %v2711_v32 = vmul.f32 %v2710_v29, %v2710_v29 }
 0xdcc   :  { %5756 = vmatmul.mubr.f32.vlgmr.msra.gmra.mrb[22].mxu0 %v2711_v32 }
 0xdcd   :  { %6771 = vmatpush3.bf16.msra.mxu0 %v8203_v49  ;;  %5825 = vmatprep.mubr.msk.f32.mxu0 %vm7710_vm0, %v7711_v1 }
 0xdce   :  { %6772 = vmatprep.subr.bf16.mxu0 %v7709_v0 }
 0xdd1   :  { %6774 = vmatpush3.bf16.msra.mxu0 %v8207_v52 }
 0xdd2   :  { %6775 = vmatprep.subr.bf16.mxu0 %v7709_v0 }
 0xdd5   :  { %6777 = vmatpush3.bf16.msra.mxu0 %v8213_v58 }
 0xdd6   :  { %6778 = vmatprep.subr.bf16.mxu0 %v7709_v0 }
 0xdd9   :  { %6780 = vmatpush3.bf16.msra.mxu0 %v8219_v61 }
 0xdda   :  { %6781 = vmatprep.subr.bf16.mxu0 %v7709_v0 }
 0xddd   :  { %6783 = vmatpush3.bf16.msra.mxu0 %v8225_v2 }
 0xdde   :  { %6784 = vmatprep.subr.bf16.mxu0 %v7709_v0 }
 0xde1   :  { %6786 = vmatpush3.bf16.msra.mxu0 %v8231_v7 }
 0xde2   :  { %6787 = vmatprep.subr.bf16.mxu0 %v7709_v0 }
 0xde5   :  { %6789 = vmatpush3.bf16.msra.mxu0 %v8238_v13 }
 0xde6   :  { %6790 = vmatprep.subr.bf16.mxu0 %v7709_v0 }
 0xde9   :  { %6792 = vmatpush3.bf16.msra.mxu0 %v8277_v25 }
 0xdea   :  { %6829 = vmatprep.subr.bf16.mxu0 %v7709_v0 }
 0xe9f   :  { %v2778_v8 = vpop.f32.mrb[22].mxu0 }
 0xea0   :  { %v2779_v41 = vadd.f32 1e-05, %v2778_v8  ;;  %v5757_v43 = vpop.f32.mrb[23].mxu0 }
 0xea2   :  { %7195 = vrsqrt.f32 %v2779_v41 }
 0xeac   :  { %v7196_v10 = vpop.eup %7195 }
 0xead   :  { %v2783_v14 = vmul.f32 %v7196_v10, %v2710_v29  ;;  %v1162_v29 = vadd.f32 %v8288_v44, %v867_v26  ;;  %v3199_v44 = vld [vmem:[#allocation22 + $0x110] sm:$0xff] }
 0xeae   :  { %v6833_v47 = vpack.c.bf16 %v3200_v59, %v3199_v44  ;;  %v3211_v44 = vld [vmem:[#allocation22 + $0x170] sm:$0xff] }
 0xeaf   :  { %v2790_v22 = vmul.f32 %v4563_v11, %v2783_v14 }
 0xeb1   :  { %v8557_v23 = vadd.f32 %v4564_v18, %v2790_v22 }
 0xeb3   :  { %5791 = vmatmul.mubr.f32.vlgmr.msra.gmra.mrb[34].mxu1 %v8557_v23 }
 0xeb4   :  { %6795 = vmatpush3.bf16.msra.mxu1 %v8203_v49  ;;  %5860 = vmatprep.mubr.msk.f32.mxu1 %vm7710_vm0, %v7711_v1 }
 0xeb5   :  { %6796 = vmatprep.subr.bf16.mxu1 %v7709_v0 }
 0xeb8   :  { %6798 = vmatpush3.bf16.msra.mxu1 %v8207_v52 }
 0xeb9   :  { %6799 = vmatprep.subr.bf16.mxu1 %v7709_v0 }
 0xebc   :  { %6801 = vmatpush3.bf16.msra.mxu1 %v8213_v58 }
 0xebd   :  { %6802 = vmatprep.subr.bf16.mxu1 %v7709_v0 }
 0xec0   :  { %6804 = vmatpush3.bf16.msra.mxu1 %v8219_v61 }
 0xec1   :  { %6805 = vmatprep.subr.bf16.mxu1 %v7709_v0 }
 0xec4   :  { %6807 = vmatpush3.bf16.msra.mxu1 %v8225_v2 }
 0xec5   :  { %6808 = vmatprep.subr.bf16.mxu1 %v7709_v0 }
 0xec8   :  { %6810 = vmatpush3.bf16.msra.mxu1 %v8231_v7 }
 0xec9   :  { %6811 = vmatprep.subr.bf16.mxu1 %v7709_v0 }
 0xecc   :  { %6813 = vmatpush3.bf16.msra.mxu1 %v8238_v13 }
 0xecd   :  { %6814 = vmatprep.subr.bf16.mxu1 %v7709_v0 }
 0xed0   :  { %6816 = vmatpush3.bf16.msra.mxu1 %v8277_v25 }
 0xed1   :  { %6817 = vmatprep.subr.bf16.mxu1 %v7709_v0 }
 0xf86   :  { %v2889_v17 = vpop.f32.mrb[34].mxu1 }
 0xf87   :  { %v2890_v27 = vadd.f32 %v4581_v34, %v2889_v17  ;;  %v5792_v32 = vpop.f32.mrb[35].mxu1 }
 0xf88   :  { %v3208_v32 = vld [vmem:[#allocation22 + $0x158] sm:$0xff] }
 0xf89   :  { %v2893_v16 = vmul.f32 %v2890_v27, %v1017_v9  ;;  %v2964_v24 = vmul.f32 %v2890_v27, %v1162_v29  ;;  %v3207_v27 = vld [vmem:[#allocation22 + $0x150] sm:$0xff] }
 0xf8b   :  { %5826 = vmatmul.mubr.f32.vlgmr.msra.gmra.mrb[24].mxu0 %v2893_v16  ;;  %5861 = vmatmul.mubr.f32.vlgmr.msra.gmra.mrb[36].mxu1 %v2964_v24  ;;  %v6845_v16 = vpack.c.bf16 %v3208_v32, %v3207_v27  ;;  %v3209_v24 = vld [vmem:[#allocation22 + $0x160] sm:$0xff]  ;;  %v4596_v32 = vld [vmem:[%s8892_s19 + $0x1c8] sm:$0xff] }
 0xf8c   :  { %6819 = vmatpush3.bf16.msra.mxu1 %v8330_v12  ;;  %5871 = vmatprep.mubr.msk.f32.mxu1 %vm7710_vm0, %v7711_v1  ;;  %v6848_v20 = vpack.c.bf16 %v3210_v38, %v3209_v24  ;;  %v4595_v27 = vld [vmem:[%s8892_s19 + $0x1c0] sm:$0xff]  ;;  %v4597_v24 = vld [vmem:[%s8892_s19 + $0x1d0] sm:$0xff]  ;;  %v4598_v38 = vld [vmem:[%s8892_s19 + $0x1d8] sm:$0xff] }
 0xf8d   :  { %6820 = vmatprep.subr.bf16.mxu1 %v7709_v0  ;;  %5917 = vmatprep.mubr.msk.f32.mxu0 %vm7710_vm0, %v7711_v1 }
 0xf8e   :  { %6831 = vmatpush3.bf16.msra.mxu0 %v6830_v60  ;;  %v3212_v60 = vld [vmem:[#allocation22 + $0x178] sm:$0xff] }
 0xf8f   :  { %6832 = vmatprep.subr.bf16.mxu0 %v7709_v0  ;;  %v6851_v59 = vpack.c.bf16 %v3212_v60, %v3211_v44  ;;  %v4599_v44 = vld [vmem:[%s8892_s19 + $0x1e0] sm:$0xff]  ;;  %v4600_v60 = vld [vmem:[%s8892_s19 + $0x1e8] sm:$0xff] }
 0xf90   :  { %6822 = vmatpush3.bf16.msra.mxu1 %v8333_v35 }
 0xf91   :  { %6823 = vmatprep.subr.bf16.mxu1 %v7709_v0 }
 0xf92   :  { %6834 = vmatpush3.bf16.msra.mxu0 %v6833_v47 }
 0xf93   :  { %6835 = vmatprep.subr.bf16.mxu0 %v7709_v0 }
 0xf96   :  { %6837 = vmatpush3.bf16.msra.mxu0 %v6836_v56 }
 0xf97   :  { %6838 = vmatprep.subr.bf16.mxu0 %v7709_v0 }
 0xf9a   :  { %6840 = vmatpush3.bf16.msra.mxu0 %v6839_v3 }
 0xf9b   :  { %6841 = vmatprep.subr.bf16.mxu0 %v7709_v0 }
 0xf9e   :  { %6843 = vmatpush3.bf16.msra.mxu0 %v6842_v6 }
 0xf9f   :  { %6844 = vmatprep.subr.bf16.mxu0 %v7709_v0 }
 0xfa2   :  { %6846 = vmatpush3.bf16.msra.mxu0 %v6845_v16  ;;  %v6914_v16 = vpack.c.bf16 %v4596_v32, %v4595_v27  ;;  %v3857_v32 = vld [vmem:[#allocation22 + $0x1a0] sm:$0xff] }
 0xfa3   :  { %6847 = vmatprep.subr.bf16.mxu0 %v7709_v0 }
 0xfa6   :  { %6849 = vmatpush3.bf16.msra.mxu0 %v6848_v20  ;;  %v6917_v20 = vpack.c.bf16 %v4598_v38, %v4597_v24  ;;  %v3859_v38 = vld [vmem:[#allocation22 + $0x1b0] sm:$0xff] }
 0xfa7   :  { %6850 = vmatprep.subr.bf16.mxu0 %v7709_v0 }
 0xfaa   :  { %6852 = vmatpush3.bf16.msra.mxu0 %v6851_v59  ;;  %v6920_v59 = vpack.c.bf16 %v4600_v60, %v4599_v44  ;;  %v3861_v60 = vld [vmem:[#allocation22 + $0x1c0] sm:$0xff] }
 0xfab   :  { %6877 = vmatprep.subr.bf16.mxu0 %v7709_v0 }
0x105e   :  { %v2960_v19 = vpop.f32.mrb[24].mxu0  ;;  %v3031_v28 = vpop.f32.mrb[36].mxu1 }
0x105f   :  { %v3035_v8 = vmax.f32 %v2960_v19, %v3031_v28  ;;  %v5827_v41 = vpop.f32.mrb[25].mxu0  ;;  %v5862_v43 = vpop.f32.mrb[37].mxu1 }
0x1060   :  { %v4590_v43 = vld [vmem:[%s8892_s19 + $0x198] sm:$0xff] }
0x1061   :  { %v3036_v10 = vsub.f32 %v2960_v19, %v3035_v8  ;;  %v3039_v11 = vsub.f32 %v3031_v28, %v3035_v8  ;;  %v4587_v19 = vld [vmem:[%s8892_s19 + $0x180] sm:$0xff]  ;;  %v4588_v28 = vld [vmem:[%s8892_s19 + $0x188] sm:$0xff]  ;;  %v4589_v8 = vld [vmem:[%s8892_s19 + $0x190] sm:$0xff] }
0x1062   :  { %v6902_v41 = vpack.c.bf16 %v4588_v28, %v4587_v19 }
0x1063   :  { %v3037_v14 = vmul.f32 1.442695, %v3036_v10  ;;  %v3040_v18 = vmul.f32 1.442695, %v3039_v11  ;;  %v6905_v10 = vpack.c.bf16 %v4590_v43, %v4589_v8  ;;  %v4591_v11 = vld [vmem:[%s8892_s19 + $0x1a0] sm:$0xff] }
0x1065   :  { %7197 = vpow2.f32 %v3037_v14  ;;  %v4592_v14 = vld [vmem:[%s8892_s19 + $0x1a8] sm:$0xff] }
0x1066   :  { %7199 = vpow2.f32 %v3040_v18  ;;  %v6908_v18 = vpack.c.bf16 %v4592_v14, %v4591_v11 }
0x106f   :  { %v7198_v22 = vpop.eup %7197 }
0x1070   :  { %v7200_v26 = vpop.eup %7199 }
0x1071   :  { %v3042_v34 = vadd.f32 %v7200_v26, %v7198_v22 }
0x1073   :  { %7201 = vrcp.f32 %v3042_v34 }
0x107d   :  { %v7202_v17 = vpop.eup %7201 }
0x107e   :  { %v3045_v9 = vmul.f32 %v7202_v17, %v7198_v22  ;;  %v3120_v29 = vmul.f32 %v7202_v17, %v7200_v26  ;;  %v4593_v17 = vld [vmem:[%s8892_s19 + $0x1b0] sm:$0xff] }
0x1080   :  { %5872 = vmatmul.mubr.msk.f32.vlgmr.msra.gmra.mrb[38].mxu1 %vm1737_vm6, %v3045_v9  ;;  %v4594_v9 = vld [vmem:[%s8892_s19 + $0x1b8] sm:$0xff] }
0x1081   :  { %6825 = vmatpush3.bf16.msra.mxu1 %v8330_v12  ;;  %5882 = vmatprep.mubr.msk.f32.mxu1 %vm7710_vm0, %v7711_v1 }
0x1082   :  { %6826 = vmatprep.subr.bf16.mxu1 %v7709_v0 }
0x1085   :  { %6828 = vmatpush3.bf16.msra.mxu1 %v8333_v35 }
0x1086   :  { %6853 = vmatprep.subr.bf16.mxu1 %v7709_v0 }
0x1088   :  { %5883 = vmatmul.mubr.msk.f32.vlgmr.msra.gmra.mrb[40].mxu1 %vm1737_vm6, %v3120_v29  ;;  %v6911_v29 = vpack.c.bf16 %v4594_v9, %v4593_v17  ;;  %v3855_v9 = vld [vmem:[#allocation22 + $0x190] sm:$0xff] }
0x1089   :  { %6855 = vmatpush3.bf16.msra.mxu1 %v8028_v30  ;;  %5952 = vmatprep.mubr.msk.f32.mxu1 %vm7710_vm0, %v7711_v1 }
0x108a   :  { %6856 = vmatprep.subr.bf16.mxu1 %v7709_v0 }
0x108d   :  { %6858 = vmatpush3.bf16.msra.mxu1 %v8041_v33 }
0x108e   :  { %6859 = vmatprep.subr.bf16.mxu1 %v7709_v0 }
0x1091   :  { %6861 = vmatpush3.bf16.msra.mxu1 %v8049_v36 }
0x1092   :  { %6862 = vmatprep.subr.bf16.mxu1 %v7709_v0 }
0x1095   :  { %6864 = vmatpush3.bf16.msra.mxu1 %v8055_v39 }
0x1096   :  { %6865 = vmatprep.subr.bf16.mxu1 %v7709_v0 }
0x1099   :  { %6867 = vmatpush3.bf16.msra.mxu1 %v8061_v42 }
0x109a   :  { %6868 = vmatprep.subr.bf16.mxu1 %v7709_v0 }
0x109d   :  { %6870 = vmatpush3.bf16.msra.mxu1 %v8067_v45 }
0x109e   :  { %6871 = vmatprep.subr.bf16.mxu1 %v7709_v0 }
0x10a1   :  { %6873 = vmatpush3.bf16.msra.mxu1 %v8073_v48 }
0x10a2   :  { %6874 = vmatprep.subr.bf16.mxu1 %v7709_v0 }
0x10a5   :  { %6876 = vmatpush3.bf16.msra.mxu1 %v8080_v51 }
0x10a6   :  { %6901 = vmatprep.subr.bf16.mxu1 %v7709_v0 }
0x1153   :  { %v3115_v47 = vpop.f32.mrb[38].mxu1 }
0x1154   :  { %v3119_v37 = vmul.f32 %v3115_v47, %v8293_v50  ;;  %v5873_v54 = vpop.f32.mrb[39].mxu1  ;;  %v4584_v50 = vld [vmem:[#allocation23 + $0x2] ss:$0 sm:$0xff]  ;;  %v4601_v47 = vld [vmem:[%s8892_s19 + $0x1f0] sm:$0xff] }
0x115b   :  { %v3190_v56 = vpop.f32.mrb[40].mxu1 }
0x115c   :  { %v3194_v62 = vmul.f32 %v3190_v56, %v8299_v55  ;;  %v5884_v63 = vpop.f32.mrb[41].mxu1 }
0x115e   :  { %v3195_v3 = vadd.f32 %v3194_v62, %v3119_v37  ;;  %v4602_v37 = vld [vmem:[%s8892_s19 + $0x1f8] sm:$0xff] }
0x115f   :  { %v6923_v54 = vpack.c.bf16 %v4602_v37, %v4601_v47  ;;  %v3863_v37 = vld [vmem:[#allocation22 + $0x1d0] sm:$0xff] }
0x1160   :  { %5918 = vmatmul.mubr.f32.vlgmr.msra.gmra.mrb[26].mxu0 %v3195_v3 }
0x1161   :  { %6879 = vmatpush3.bf16.msra.mxu0 %v8028_v30  ;;  %5987 = vmatprep.mubr.msk.f32.mxu0 %vm7710_vm0, %v7711_v1 }
0x1162   :  { %6880 = vmatprep.subr.bf16.mxu0 %v7709_v0 }
0x1165   :  { %6882 = vmatpush3.bf16.msra.mxu0 %v8041_v33 }
0x1166   :  { %6883 = vmatprep.subr.bf16.mxu0 %v7709_v0 }
0x1169   :  { %6885 = vmatpush3.bf16.msra.mxu0 %v8049_v36 }
0x116a   :  { %6886 = vmatprep.subr.bf16.mxu0 %v7709_v0 }
0x116d   :  { %6888 = vmatpush3.bf16.msra.mxu0 %v8055_v39 }
0x116e   :  { %6889 = vmatprep.subr.bf16.mxu0 %v7709_v0 }
0x1171   :  { %6891 = vmatpush3.bf16.msra.mxu0 %v8061_v42 }
0x1172   :  { %6892 = vmatprep.subr.bf16.mxu0 %v7709_v0 }
0x1175   :  { %6894 = vmatpush3.bf16.msra.mxu0 %v8067_v45 }
0x1176   :  { %6895 = vmatprep.subr.bf16.mxu0 %v7709_v0 }
0x1179   :  { %6897 = vmatpush3.bf16.msra.mxu0 %v8073_v48 }
0x117a   :  { %6898 = vmatprep.subr.bf16.mxu0 %v7709_v0 }
0x117d   :  { %6900 = vmatpush3.bf16.msra.mxu0 %v8080_v51 }
0x117e   :  { %6925 = vmatprep.subr.bf16.mxu0 %v7709_v0 }
0x1233   :  { %v3287_v55 = vpop.f32.mrb[26].mxu0 }
0x1234   :  { %v3288_v4 = vadd.f32 %v4584_v50, %v3287_v55  ;;  %v5919_v5 = vpop.f32.mrb[27].mxu0  ;;  %v4585_v50 = vld [vmem:[#allocation25 + $0x2] ss:$0 sm:$0xff] }
0x1236   :  { %v3291_v6 = vadd.f32 %v3288_v4, %v8557_v23  ;;  %v4586_v4 = vld [vmem:[#allocation26 + $0x2] ss:$0 sm:$0xff] }
0x1238   :  { %5953 = vmatmul.mubr.f32.vlgmr.msra.gmra.mrb[42].mxu1 %v3291_v6 }
0x1239   :  { %6022 = vmatprep.mubr.msk.f32.mxu1 %vm7710_vm0, %v7711_v1  ;;  %6903 = vmatpush3.bf16.msra.mxu1 %v6902_v41 }
0x123a   :  { %6904 = vmatprep.subr.bf16.mxu1 %v7709_v0 }
0x123d   :  { %6906 = vmatpush3.bf16.msra.mxu1 %v6905_v10 }
0x123e   :  { %6907 = vmatprep.subr.bf16.mxu1 %v7709_v0 }
0x1241   :  { %6909 = vmatpush3.bf16.msra.mxu1 %v6908_v18 }
0x1242   :  { %6910 = vmatprep.subr.bf16.mxu1 %v7709_v0 }
0x1245   :  { %6912 = vmatpush3.bf16.msra.mxu1 %v6911_v29  ;;  %v3856_v29 = vld [vmem:[#allocation22 + $0x198] sm:$0xff] }
0x1246   :  { %6913 = vmatprep.subr.bf16.mxu1 %v7709_v0  ;;  %v6989_v27 = vpack.c.bf16 %v3856_v29, %v3855_v9  ;;  %v4120_v9 = vld [vmem:[%s8895_s9 + $0x50] sm:$0xff]  ;;  %v4121_v29 = vld [vmem:[%s8895_s9 + $0x58] sm:$0xff] }
0x1249   :  { %6915 = vmatpush3.bf16.msra.mxu1 %v6914_v16  ;;  %v3858_v16 = vld [vmem:[#allocation22 + $0x1a8] sm:$0xff] }
0x124a   :  { %6916 = vmatprep.subr.bf16.mxu1 %v7709_v0  ;;  %v6992_v24 = vpack.c.bf16 %v3858_v16, %v3857_v32  ;;  %v4122_v32 = vld [vmem:[%s8895_s9 + $0x60] sm:$0xff]  ;;  %v4123_v16 = vld [vmem:[%s8895_s9 + $0x68] sm:$0xff] }
0x124d   :  { %6918 = vmatpush3.bf16.msra.mxu1 %v6917_v20  ;;  %v3860_v20 = vld [vmem:[#allocation22 + $0x1b8] sm:$0xff] }
0x124e   :  { %6919 = vmatprep.subr.bf16.mxu1 %v7709_v0  ;;  %v6995_v44 = vpack.c.bf16 %v3860_v20, %v3859_v38  ;;  %v4124_v38 = vld [vmem:[%s8895_s9 + $0x70] sm:$0xff]  ;;  %v4125_v20 = vld [vmem:[%s8895_s9 + $0x78] sm:$0xff] }
0x1251   :  { %6921 = vmatpush3.bf16.msra.mxu1 %v6920_v59  ;;  %v3862_v59 = vld [vmem:[#allocation22 + $0x1c8] sm:$0xff] }
0x1252   :  { %6922 = vmatprep.subr.bf16.mxu1 %v7709_v0  ;;  %v6998_v47 = vpack.c.bf16 %v3862_v59, %v3861_v60  ;;  %v4132_v60 = vld [vmem:[%s8894_s25 + $0x30] sm:$0xff]  ;;  %v4133_v59 = vld [vmem:[%s8894_s25 + $0x38] sm:$0xff] }
0x1255   :  { %6924 = vmatpush3.bf16.msra.mxu1 %v6923_v54  ;;  %v3864_v54 = vld [vmem:[#allocation22 + $0x1d8] sm:$0xff] }
0x1256   :  { %6949 = vmatprep.subr.bf16.mxu1 %v7709_v0 }
0x130b   :  { %v3362_v23 = vpop.f32.mrb[42].mxu1 }
0x130c   :  { %v3366_v22 = vsub.f32 %v3291_v6, %v3362_v23  ;;  %v5954_v26 = vpop.f32.mrb[43].mxu1  ;;  %v3854_v23 = vld [vmem:[#allocation22 + $0x188] sm:$0xff] }
0x130e   :  { %v3367_v34 = vmul.f32 %v3366_v22, %v3366_v22 }
0x1310   :  { %5988 = vmatmul.mubr.f32.vlgmr.msra.gmra.mrb[28].mxu0 %v3367_v34 }
0x1311   :  { %6927 = vmatpush3.bf16.msra.mxu0 %v8203_v49  ;;  %6057 = vmatprep.mubr.msk.f32.mxu0 %vm7710_vm0, %v7711_v1 }
0x1312   :  { %6928 = vmatprep.subr.bf16.mxu0 %v7709_v0 }
0x1315   :  { %6930 = vmatpush3.bf16.msra.mxu0 %v8207_v52 }
0x1316   :  { %6931 = vmatprep.subr.bf16.mxu0 %v7709_v0 }
0x1319   :  { %6933 = vmatpush3.bf16.msra.mxu0 %v8213_v58 }
0x131a   :  { %6934 = vmatprep.subr.bf16.mxu0 %v7709_v0 }
0x131d   :  { %6936 = vmatpush3.bf16.msra.mxu0 %v8219_v61 }
0x131e   :  { %6937 = vmatprep.subr.bf16.mxu0 %v7709_v0 }
0x1321   :  { %6939 = vmatpush3.bf16.msra.mxu0 %v8225_v2 }
0x1322   :  { %6940 = vmatprep.subr.bf16.mxu0 %v7709_v0 }
0x1325   :  { %6942 = vmatpush3.bf16.msra.mxu0 %v8231_v7 }
0x1326   :  { %6943 = vmatprep.subr.bf16.mxu0 %v7709_v0 }
0x1329   :  { %6945 = vmatpush3.bf16.msra.mxu0 %v8238_v13 }
0x132a   :  { %6946 = vmatprep.subr.bf16.mxu0 %v7709_v0 }
0x132d   :  { %6948 = vmatpush3.bf16.msra.mxu0 %v8277_v25 }
0x132e   :  { %6973 = vmatprep.subr.bf16.mxu0 %v7709_v0 }
0x13e3   :  { %v3434_v56 = vpop.f32.mrb[28].mxu0 }
0x13e4   :  { %v3435_v62 = vadd.f32 1e-05, %v3434_v56  ;;  %v5989_v63 = vpop.f32.mrb[29].mxu0  ;;  %v7001_v56 = vpack.c.bf16 %v3864_v54, %v3863_v37  ;;  %v4134_v37 = vld [vmem:[%s8894_s25 + $0x40] sm:$0xff]  ;;  %v4135_v54 = vld [vmem:[%s8894_s25 + $0x48] sm:$0xff] }
0x13e5   :  { %v3866_v63 = vld [vmem:[#allocation22 + $0x1e8] sm:$0xff] }
0x13e6   :  { %7203 = vrsqrt.f32 %v3435_v62  ;;  %v3865_v62 = vld [vmem:[#allocation22 + $0x1e0] sm:$0xff] }
0x13f0   :  { %v7204_v3 = vpop.eup %7203 }
0x13f1   :  { %v3439_v55 = vmul.f32 %v7204_v3, %v3366_v22  ;;  %v7004_v3 = vpack.c.bf16 %v3866_v63, %v3865_v62  ;;  %v7070_v62 = vpack.c.bf16 %v4135_v54, %v4134_v37  ;;  %v4137_v63 = vld [vmem:[%s8894_s25 + $0x58] sm:$0xff] }
0x13f3   :  { %v3446_v5 = vmul.f32 %v4585_v50, %v3439_v55  ;;  %v3867_v50 = vld [vmem:[#allocation22 + $0x1f0] sm:$0xff]  ;;  %v3868_v55 = vld [vmem:[#allocation22 + $0x1f8] sm:$0xff] }
0x13f5   :  { %v8690_v6 = vadd.f32 %v4586_v4, %v3446_v5  ;;  %v7007_v4 = vpack.c.bf16 %v3868_v55, %v3867_v50  ;;  %v4138_v50 = vld [vmem:[%s8894_s25 + $0x60] sm:$0xff]  ;;  %v4139_v55 = vld [vmem:[%s8894_s25 + $0x68] sm:$0xff] }
0x13f7   :  { %6023 = vmatmul.mubr.f32.vlgmr.msra.gmra.mrb[44].mxu1 %v8690_v6 }
0x13f8   :  { %6951 = vmatpush3.bf16.msra.mxu1 %v8203_v49  ;;  %6092 = vmatprep.mubr.msk.f32.mxu1 %vm7710_vm0, %v7711_v1  ;;  %v7213_v49 = vld [vmem:[#allocation19] sm:$0xf] }
0x13f9   :  { %6952 = vmatprep.subr.bf16.mxu1 %v7709_v0 }
0x13fc   :  { %6954 = vmatpush3.bf16.msra.mxu1 %v8207_v52  ;;  %v871_v52 = vrot.slane %v7213_v49, %v870_v40 }
0x13fd   :  { %6955 = vmatprep.subr.bf16.mxu1 %v7709_v0 }
0x1400   :  { %6957 = vmatpush3.bf16.msra.mxu1 %v8213_v58  ;;  %v4603_v58 = vld [vmem:[#allocation16 + $0x3] ss:$0 sm:$0xff] }
0x1401   :  { %6958 = vmatprep.subr.bf16.mxu1 %v7709_v0 }
0x1404   :  { %6960 = vmatpush3.bf16.msra.mxu1 %v8219_v61 }
0x1405   :  { %6961 = vmatprep.subr.bf16.mxu1 %v7709_v0 }
0x1408   :  { %6963 = vmatpush3.bf16.msra.mxu1 %v8225_v2  ;;  %v1019_v2 = vadd.f32 %v8271_v21, %v871_v52 }
0x1409   :  { %6964 = vmatprep.subr.bf16.mxu1 %v7709_v0 }
0x140c   :  { %6966 = vmatpush3.bf16.msra.mxu1 %v8231_v7  ;;  %v1164_v7 = vadd.f32 %v8290_v46, %v871_v52 }
0x140d   :  { %6967 = vmatprep.subr.bf16.mxu1 %v7709_v0 }
0x1410   :  { %6969 = vmatpush3.bf16.msra.mxu1 %v8238_v13 }
0x1411   :  { %6970 = vmatprep.subr.bf16.mxu1 %v7709_v0 }
0x1414   :  { %6972 = vmatpush3.bf16.msra.mxu1 %v8277_v25 }
0x1415   :  { %6979 = vmatprep.subr.bf16.mxu1 %v7709_v0 }
0x14ca   :  { %v3545_v61 = vpop.f32.mrb[44].mxu1 }
0x14cb   :  { %v3546_v19 = vadd.f32 %v4603_v58, %v3545_v61  ;;  %v6024_v28 = vpop.f32.mrb[45].mxu1 }
0x14cc   :  { %v4130_v28 = vld [vmem:[%s8894_s25 + $0x20] sm:$0xff] }
0x14cd   :  { %v3549_v8 = vmul.f32 %v3546_v19, %v1019_v2  ;;  %v3620_v13 = vmul.f32 %v3546_v19, %v1164_v7 }
0x14cf   :  { %6058 = vmatmul.mubr.f32.vlgmr.msra.gmra.mrb[30].mxu0 %v3549_v8  ;;  %6093 = vmatmul.mubr.f32.vlgmr.msra.gmra.mrb[46].mxu1 %v3620_v13  ;;  %v4131_v8 = vld [vmem:[%s8894_s25 + $0x28] sm:$0xff]  ;;  %v4110_v13 = vld [vmem:[%s8895_s9] sm:$0xff] }
0x14d0   :  { %6975 = vmatpush3.bf16.msra.mxu0 %v8330_v12  ;;  %6981 = vmatpush3.bf16.msra.mxu1 %v8330_v12 }
0x14d1   :  { %6976 = vmatprep.subr.bf16.mxu0 %v7709_v0  ;;  %6982 = vmatprep.subr.bf16.mxu1 %v7709_v0 }
0x14d2   :  { %6103 = vmatprep.mubr.msk.f32.mxu0 %vm7710_vm0, %v7711_v1  ;;  %6114 = vmatprep.mubr.msk.f32.mxu1 %vm7710_vm0, %v7711_v1 }
0x14d4   :  { %6978 = vmatpush3.bf16.msra.mxu0 %v8333_v35  ;;  %6984 = vmatpush3.bf16.msra.mxu1 %v8333_v35  ;;  %v3853_v35 = vld [vmem:[#allocation22 + $0x180] sm:$0xff] }
0x14d5   :  { %6985 = vmatprep.subr.bf16.mxu0 %v7709_v0  ;;  %7009 = vmatprep.subr.bf16.mxu1 %v7709_v0  ;;  %v6986_v26 = vpack.c.bf16 %v3854_v23, %v3853_v35  ;;  %v4116_v35 = vld [vmem:[%s8895_s9 + $0x30] sm:$0xff]  ;;  %v4117_v23 = vld [vmem:[%s8895_s9 + $0x38] sm:$0xff] }
0x15a2   :  { %v3616_v31 = vpop.f32.mrb[30].mxu0  ;;  %v3687_v40 = vpop.f32.mrb[46].mxu1 }
0x15a3   :  { %v3691_v21 = vmax.f32 %v3616_v31, %v3687_v40  ;;  %v6059_v25 = vpop.f32.mrb[31].mxu0  ;;  %v6094_v46 = vpop.f32.mrb[47].mxu1 }
0x15a5   :  { %v3692_v12 = vsub.f32 %v3616_v31, %v3691_v21  ;;  %v3695_v41 = vsub.f32 %v3687_v40, %v3691_v21  ;;  %v4111_v31 = vld [vmem:[%s8895_s9 + $0x8] sm:$0xff] }
0x15a6   :  { %v7082_v46 = vpack.c.bf16 %v4111_v31, %v4110_v13 }
0x15a7   :  { %v3693_v43 = vmul.f32 1.442695, %v3692_v12  ;;  %v3696_v10 = vmul.f32 1.442695, %v3695_v41  ;;  %v4112_v41 = vld [vmem:[%s8895_s9 + $0x10] sm:$0xff] }
0x15a9   :  { %7205 = vpow2.f32 %v3693_v43  ;;  %v4113_v43 = vld [vmem:[%s8895_s9 + $0x18] sm:$0xff] }
0x15aa   :  { %7207 = vpow2.f32 %v3696_v10  ;;  %v7085_v10 = vpack.c.bf16 %v4113_v43, %v4112_v41  ;;  %v4378_v41 = vld [vmem:[#allocation29 + $0x10] sm:$0xff]  ;;  %v4379_v43 = vld [vmem:[#allocation29 + $0x18] sm:$0xff] }
0x15b3   :  { %v7206_v11 = vpop.eup %7205 }
0x15b4   :  { %v7208_v14 = vpop.eup %7207 }
0x15b5   :  { %v3698_v18 = vadd.f32 %v7208_v14, %v7206_v11 }
0x15b7   :  { %7209 = vrcp.f32 %v3698_v18 }
0x15c1   :  { %v7210_v22 = vpop.eup %7209 }
0x15c2   :  { %v3701_v34 = vmul.f32 %v7210_v22, %v7206_v11  ;;  %v3776_v17 = vmul.f32 %v7210_v22, %v7208_v14  ;;  %v4114_v11 = vld [vmem:[%s8895_s9 + $0x20] sm:$0xff]  ;;  %v4115_v14 = vld [vmem:[%s8895_s9 + $0x28] sm:$0xff]  ;;  %v7091_v22 = vpack.c.bf16 %v4117_v23, %v4116_v35 }
0x15c3   :  { %v7088_v18 = vpack.c.bf16 %v4115_v14, %v4114_v11  ;;  %v4610_v11 = vld [vmem:[%s7862_s24] ss:$0 sm:$0xff] }
0x15c4   :  { %6104 = vmatmul.mubr.msk.f32.vlgmr.msra.gmra.mrb[32].mxu0 %vm1737_vm6, %v3701_v34  ;;  %6115 = vmatmul.mubr.msk.f32.vlgmr.msra.gmra.mrb[48].mxu1 %vm1737_vm6, %v3776_v17  ;;  %v4119_v34 = vld [vmem:[%s8895_s9 + $0x48] sm:$0xff] }
0x15c5   :  { %6987 = vmatpush3.bf16.msra.mxu0 %v6986_v26  ;;  %6149 = vmatprep.mubr.msk.f32.mxu0 %vm7710_vm0, %v7711_v1  ;;  %v4118_v26 = vld [vmem:[%s8895_s9 + $0x40] sm:$0xff] }
0x15c6   :  { %6988 = vmatprep.subr.bf16.mxu0 %v7709_v0  ;;  %7011 = vmatpush3.bf16.msra.mxu1 %v8028_v30  ;;  %v7094_v17 = vpack.c.bf16 %v4119_v34, %v4118_v26 }
0x15c7   :  { %7012 = vmatprep.subr.bf16.mxu1 %v7709_v0  ;;  %6184 = vmatprep.mubr.msk.f32.mxu1 %vm7710_vm0, %v7711_v1 }
0x15c9   :  { %6990 = vmatpush3.bf16.msra.mxu0 %v6989_v27  ;;  %v7097_v27 = vpack.c.bf16 %v4121_v29, %v4120_v9 }
0x15ca   :  { %6991 = vmatprep.subr.bf16.mxu0 %v7709_v0  ;;  %7014 = vmatpush3.bf16.msra.mxu1 %v8041_v33 }
0x15cb   :  { %7015 = vmatprep.subr.bf16.mxu1 %v7709_v0 }
0x15cd   :  { %6993 = vmatpush3.bf16.msra.mxu0 %v6992_v24  ;;  %v7100_v24 = vpack.c.bf16 %v4123_v16, %v4122_v32 }
0x15ce   :  { %6994 = vmatprep.subr.bf16.mxu0 %v7709_v0  ;;  %7017 = vmatpush3.bf16.msra.mxu1 %v8049_v36 }
0x15cf   :  { %7018 = vmatprep.subr.bf16.mxu1 %v7709_v0 }
0x15d1   :  { %6996 = vmatpush3.bf16.msra.mxu0 %v6995_v44  ;;  %v7103_v44 = vpack.c.bf16 %v4125_v20, %v4124_v38 }
0x15d2   :  { %6997 = vmatprep.subr.bf16.mxu0 %v7709_v0  ;;  %7020 = vmatpush3.bf16.msra.mxu1 %v8055_v39 }
0x15d3   :  { %7021 = vmatprep.subr.bf16.mxu1 %v7709_v0 }
0x15d5   :  { %6999 = vmatpush3.bf16.msra.mxu0 %v6998_v47  ;;  %v7067_v47 = vpack.c.bf16 %v4133_v59, %v4132_v60 }
0x15d6   :  { %7000 = vmatprep.subr.bf16.mxu0 %v7709_v0  ;;  %7023 = vmatpush3.bf16.msra.mxu1 %v8061_v42 }
0x15d7   :  { %7024 = vmatprep.subr.bf16.mxu1 %v7709_v0 }
0x15d9   :  { %7002 = vmatpush3.bf16.msra.mxu0 %v7001_v56  ;;  %v4136_v56 = vld [vmem:[%s8894_s25 + $0x50] sm:$0xff] }
0x15da   :  { %7003 = vmatprep.subr.bf16.mxu0 %v7709_v0  ;;  %7026 = vmatpush3.bf16.msra.mxu1 %v8067_v45 }
0x15db   :  { %7027 = vmatprep.subr.bf16.mxu1 %v7709_v0 }
0x15dd   :  { %7005 = vmatpush3.bf16.msra.mxu0 %v7004_v3  ;;  %v7073_v3 = vpack.c.bf16 %v4137_v63, %v4136_v56 }
0x15de   :  { %7006 = vmatprep.subr.bf16.mxu0 %v7709_v0  ;;  %7029 = vmatpush3.bf16.msra.mxu1 %v8073_v48 }
0x15df   :  { %7030 = vmatprep.subr.bf16.mxu1 %v7709_v0 }
0x15e1   :  { %7008 = vmatpush3.bf16.msra.mxu0 %v7007_v4  ;;  %v4140_v4 = vld [vmem:[%s8894_s25 + $0x70] sm:$0xff] }
0x15e2   :  { %7032 = vmatpush3.bf16.msra.mxu1 %v8080_v51  ;;  %7033 = vmatprep.subr.bf16.mxu0 %v7709_v0 }
0x15e3   :  { %7057 = vmatprep.subr.bf16.mxu1 %v7709_v0 }
0x1697   :  { %v3771_v5 = vpop.f32.mrb[32].mxu0  ;;  %v3846_v49 = vpop.f32.mrb[48].mxu1 }
0x1698   :  { %v3775_v52 = vmul.f32 %v3771_v5, %v8296_v53  ;;  %v3850_v58 = vmul.f32 %v3846_v49, %v8302_v57  ;;  %v6105_v61 = vpop.f32.mrb[33].mxu0  ;;  %v6116_v2 = vpop.f32.mrb[49].mxu1  ;;  %v4128_v53 = vld [vmem:[%s8894_s25 + $0x10] sm:$0xff]  ;;  %v4129_v57 = vld [vmem:[%s8894_s25 + $0x18] sm:$0xff] }
0x1699   :  { %v7061_v19 = vpack.c.bf16 %v4129_v57, %v4128_v53  ;;  %v4141_v5 = vld [vmem:[%s8894_s25 + $0x78] sm:$0xff]  ;;  %v4292_v53 = vld [vmem:[%s8896_s22 + $0x8] sm:$0xff]  ;;  %v4293_v57 = vld [vmem:[%s8896_s22 + $0x10] sm:$0xff] }
0x169a   :  { %v3851_v7 = vadd.f32 %v3850_v58, %v3775_v52  ;;  %v7079_v49 = vpack.c.bf16 %v4141_v5, %v4140_v4 }
0x169c   :  { %6150 = vmatmul.mubr.f32.vlgmr.msra.gmra.mrb[34].mxu0 %v3851_v7  ;;  %v4607_v7 = vld [vmem:[#allocation25 + $0x3] ss:$0 sm:$0xff] }
0x169d   :  { %7035 = vmatpush3.bf16.msra.mxu0 %v8028_v30  ;;  %6219 = vmatprep.mubr.msk.f32.mxu0 %vm7710_vm0, %v7711_v1  ;;  %v4606_v30 = vld [vmem:[#allocation23 + $0x3] ss:$0 sm:$0xff] }
0x169e   :  { %7036 = vmatprep.subr.bf16.mxu0 %v7709_v0 }
0x16a1   :  { %7038 = vmatpush3.bf16.msra.mxu0 %v8041_v33 }
0x16a2   :  { %7039 = vmatprep.subr.bf16.mxu0 %v7709_v0 }
0x16a5   :  { %7041 = vmatpush3.bf16.msra.mxu0 %v8049_v36 }
0x16a6   :  { %7042 = vmatprep.subr.bf16.mxu0 %v7709_v0 }
0x16a9   :  { %7044 = vmatpush3.bf16.msra.mxu0 %v8055_v39 }
0x16aa   :  { %7045 = vmatprep.subr.bf16.mxu0 %v7709_v0 }
0x16ad   :  { %7047 = vmatpush3.bf16.msra.mxu0 %v8061_v42 }
0x16ae   :  { %7048 = vmatprep.subr.bf16.mxu0 %v7709_v0 }
0x16b1   :  { %7050 = vmatpush3.bf16.msra.mxu0 %v8067_v45  ;;  %v4126_v45 = vld [vmem:[%s8894_s25] sm:$0xff] }
0x16b2   :  { %7051 = vmatprep.subr.bf16.mxu0 %v7709_v0 }
0x16b5   :  { %7053 = vmatpush3.bf16.msra.mxu0 %v8073_v48  ;;  %v4127_v48 = vld [vmem:[%s8894_s25 + $0x8] sm:$0xff] }
0x16b6   :  { %7054 = vmatprep.subr.bf16.mxu0 %v7709_v0 }
0x16b9   :  { %7056 = vmatpush3.bf16.msra.mxu0 %v8080_v51  ;;  %v7058_v51 = vpack.c.bf16 %v4127_v48, %v4126_v45  ;;  %v4291_v48 = vld [vmem:[%s8896_s22] sm:$0xff] }
0x16ba   :  { %7081 = vmatprep.subr.bf16.mxu0 %v7709_v0 }
0x176f   :  { %v3943_v33 = vpop.f32.mrb[34].mxu0 }
0x1770   :  { %v3944_v36 = vadd.f32 %v4606_v30, %v3943_v33  ;;  %v6151_v39 = vpop.f32.mrb[35].mxu0  ;;  %v4608_v33 = vld [vmem:[#allocation26 + $0x3] ss:$0 sm:$0xff] }
0x1772   :  { %v3947_v42 = vadd.f32 %v3944_v36, %v8690_v6  ;;  %v7064_v6 = vpack.c.bf16 %v4131_v8, %v4130_v28 }
0x1774   :  { %6185 = vmatmul.mubr.f32.vlgmr.msra.gmra.mrb[50].mxu1 %v3947_v42 }
0x1775   :  { %6254 = vmatprep.mubr.msk.f32.mxu1 %vm7710_vm0, %v7711_v1  ;;  %7059 = vmatpush3.bf16.msra.mxu1 %v7058_v51  ;;  %v7106_v51 = vpack.c.bf16 %v4292_v53, %v4291_v48 }
0x1776   :  { %7060 = vmatprep.subr.bf16.mxu1 %v7709_v0 }
0x1779   :  { %7062 = vmatpush3.bf16.msra.mxu1 %v7061_v19  ;;  %v4294_v19 = vld [vmem:[%s8896_s22 + $0x18] sm:$0xff] }
0x177a   :  { %7063 = vmatprep.subr.bf16.mxu1 %v7709_v0  ;;  %v7109_v28 = vpack.c.bf16 %v4294_v19, %v4293_v57 }
0x177d   :  { %7065 = vmatpush3.bf16.msra.mxu1 %v7064_v6  ;;  %v4609_v6 = vld [vmem:[#allocation28] ss:$0 sm:$0xff] }
0x177e   :  { %7066 = vmatprep.subr.bf16.mxu1 %v7709_v0 }
0x1781   :  { %7068 = vmatpush3.bf16.msra.mxu1 %v7067_v47 }
0x1782   :  { %7069 = vmatprep.subr.bf16.mxu1 %v7709_v0 }
0x1785   :  { %7071 = vmatpush3.bf16.msra.mxu1 %v7070_v62 }
0x1786   :  { %7072 = vmatprep.subr.bf16.mxu1 %v7709_v0 }
0x1789   :  { %7074 = vmatpush3.bf16.msra.mxu1 %v7073_v3 }
0x178a   :  { %7075 = vmatprep.subr.bf16.mxu1 %v7709_v0 }
0x1847   :  { %v4018_v40 = vpop.f32.mrb[50].mxu1 }
0x1848   :  { %v8791_v21 = vsub.f32 %v3947_v42, %v4018_v40  ;;  %v6186_v25 = vpop.f32.mrb[51].mxu1  ;;  %v4376_v40 = vld [vmem:[#allocation29] sm:$0xff] }
0x184a   :  { %v4023_v12 = vmul.f32 %v8791_v21, %v8791_v21 }
0x184c   :  { %6220 = vmatmul.mubr.f32.vlgmr.msra.gmra.mrb[36].mxu0 %v4023_v12 }
0x184d   :  { %7083 = vmatpush3.bf16.msra.mxu0 %v7082_v46  ;;  %6289 = vmatprep.mubr.msk.f32.mxu0 %vm7710_vm0, %v7711_v1 }
0x184e   :  { %7084 = vmatprep.subr.bf16.mxu0 %v7709_v0 }
0x1851   :  { %7086 = vmatpush3.bf16.msra.mxu0 %v7085_v10  ;;  %v7115_v10 = vpack.c.bf16 %v4379_v43, %v4378_v41 }
0x1852   :  { %7087 = vmatprep.subr.bf16.mxu0 %v7709_v0 }
0x1855   :  { %7089 = vmatpush3.bf16.msra.mxu0 %v7088_v18 }
0x1856   :  { %7090 = vmatprep.subr.bf16.mxu0 %v7709_v0 }
0x1859   :  { %7092 = vmatpush3.bf16.msra.mxu0 %v7091_v22  ;;  %v4612_v22 = vld [vmem:[%s7872_s30] ss:$0 sm:$0xff] }
0x185a   :  { %7093 = vmatprep.subr.bf16.mxu0 %v7709_v0 }
0x185d   :  { %7095 = vmatpush3.bf16.msra.mxu0 %v7094_v17 }
0x185e   :  { %7096 = vmatprep.subr.bf16.mxu0 %v7709_v0 }
0x1861   :  { %7098 = vmatpush3.bf16.msra.mxu0 %v7097_v27 }
0x1862   :  { %7099 = vmatprep.subr.bf16.mxu0 %v7709_v0 }
0x1865   :  { %7101 = vmatpush3.bf16.msra.mxu0 %v7100_v24 }
0x1866   :  { %7102 = vmatprep.subr.bf16.mxu0 %v7709_v0 }
0x1869   :  { %7104 = vmatpush3.bf16.msra.mxu0 %v7103_v44 }
0x186c   :  { %6290 = vmatmul.mubr.f32.vlgmr.msra.gmra.mrb[38].mxu0 %v8241_v15  ;;  %v7076_v15 = vpack.c.bf16 %v4139_v55, %v4138_v50 }
0x186e   :  { %7077 = vmatpush3.bf16.msra.mxu1 %v7076_v15 }
0x186f   :  { %7078 = vmatprep.subr.bf16.mxu1 %v7709_v0 }
0x1872   :  { %7080 = vmatpush3.bf16.msra.mxu1 %v7079_v49 }
0x1873   :  { %7105 = vmatprep.subr.bf16.mxu1 %v7709_v0 }
0x191f   :  { %v4090_v52 = vpop.f32.mrb[36].mxu0 }
0x1920   :  { %v4091_v58 = vadd.f32 1e-05, %v4090_v52  ;;  %v6221_v61 = vpop.f32.mrb[37].mxu0 }
0x1922   :  { %7211 = vrsqrt.f32 %v4091_v58 }
0x192c   :  { %v7212_v2 = vpop.eup %7211 }
0x192d   :  { %v4095_v30 = vmul.f32 %v7212_v2, %v8791_v21  ;;  %v4377_v21 = vld [vmem:[#allocation29 + $0x8] sm:$0xff] }
0x192e   :  { %v7112_v46 = vpack.c.bf16 %v4377_v21, %v4376_v40 }
0x192f   :  { %v4102_v36 = vmul.f32 %v4607_v7, %v4095_v30 }
0x1931   :  { %v4109_v39 = vadd.f32 %v4608_v33, %v4102_v36 }
0x1933   :  { %6255 = vmatmul.mubr.f32.vlgmr.msra.gmra.mrb[52].mxu1 %v4109_v39 }
0x1934   :  { %6300 = vmatprep.mubr.msk.f32.mxu1 %vm7710_vm0, %v7711_v1  ;;  %7107 = vmatpush3.bf16.msra.mxu1 %v7106_v51 }
0x1935   :  { %7108 = vmatprep.subr.bf16.mxu1 %v7709_v0 }
0x1938   :  { %7110 = vmatpush3.bf16.msra.mxu1 %v7109_v28 }
0x1939   :  { %7111 = vmatprep.subr.bf16.mxu1 %v7709_v0 }
0x193f   :  { %v4278_v42 = vpop.f32.mrb[38].mxu0 }
0x1940   :  { %v6291_v45 = vpop.f32.mrb[39].mxu0 }
0x1a06   :  { %v4208_v8 = vpop.f32.mrb[52].mxu1 }
0x1a07   :  { %v4279_v13 = vadd.f32 %v4278_v42, %v4208_v8  ;;  %v6256_v31 = vpop.f32.mrb[53].mxu1 }
0x1a09   :  { %v4289_v25 = vadd.f32 %v4609_v6, %v4279_v13 }
0x1a0b   :  { %v4290_v12 = vmax.f32 %v4289_v25, 0.0 }
0x1a0d   :  { %6301 = vmatmul.mubr.msk.f32.vlgmr.msra.gmra.mrb[54].mxu1 %vm1737_vm6, %v4290_v12 }
0x1a0e   :  { %7113 = vmatpush3.bf16.msra.mxu1 %v7112_v46  ;;  %6311 = vmatprep.mubr.msk.f32.mxu1 %vm7710_vm0, %v7711_v1 }
0x1a0f   :  { %7114 = vmatprep.subr.bf16.mxu1 %v7709_v0 }
0x1a12   :  { %7116 = vmatpush3.bf16.msra.mxu1 %v7115_v10 }
0x1ae0   :  { %v4371_v14 = vpop.f32.mrb[54].mxu1 }
0x1ae1   :  { %v4372_v18 = vadd.f32 %v4610_v11, %v4371_v14  ;;  %v6302_v35 = vpop.f32.mrb[55].mxu1 }
0x1ae3   :  { %v4375_v23 = vmax.f32 %v4372_v18, 0.0 }
0x1ae5   :  { %6312 = vmatmul.mubr.msk.f32.vlgmr.msra.gmra.mrb[56].mxu1 %vm1737_vm6, %v4375_v23 }
0x1bb8   :  { %v4456_v26 = vpop.f32.mrb[56].mxu1 }
0x1bb9   :  { %v4457_v34 = vadd.f32 %v4612_v22, %v4456_v26  ;;  %v6313_v17 = vpop.f32.mrb[57].mxu1 }
0x1bbb   :  { %4460 = vst [vmem:[#allocation31] sm:$0xff] %v4457_v34 }
0x1bbc   :  { %7621 = shalt.err (!%p7618_p8)
}
0x1bbd   :  { %s7622_s24 = scalar_lea.hbm %s7877_s21, 128 }
0x1bbe   :  { %p7623_p9 = scmp.ne.s32.totalorder %s7877_s21, %s7622_s24  ;;  %p7626_p10 = scmp.lt.u32.totalorder %s7622_s24, %s7877_s21 }
0x1bc0   :  { %p7628_p11 = pnand %p7626_p10, %p7623_p9 }
0x1bc2   :  { %7631 = shalt.err (!%p7628_p11)
}
0x1bc3   :  { %4470 = dma.vmem_to_hbm [thread:$0]  %s4468_s27, 128, %s7877_s21, [#allocation4]  }
0x1bc4   :  { %7652 = dma.done.wait [#allocation4], 128  }
0x1bc5   :  { %7653 = vsyncadd [#allocation4], 4294967168 }
0x1bc6   :  { %4474 = vsyncpa [#allocation3], 1 }
0x1bc7   :  { %4475 = vsyncpa [#allocation6], 1 }
0x1bc8   :  { %4476 = vsyncpa [#allocation9], 1 }
0x1bc9   :  { %4477 = vsyncpa [#allocation12], 1 }
0x1bca   :  { %4478 = vsyncpa [#allocation15], 1 }
0x1bcb   :  { %4479 = vsyncpa [#allocation18], 1 }
0x1bcc   :  { %4480 = vsyncpa [#allocation21], 1 }
0x1bcd   :  { %4481 = vsyncpa [#allocation24], 1 }
0x1bce   :  { %4482 = vsyncpa [#allocation27], 1 }
0x1bcf   :  { %4483 = vsyncpa [#allocation30], 1 }
0x1bd0   :  { %4484 = vsyncpa [#allocation4], 1 }

</bundles_post_ra>
